<compile_context>
chip_gen: v6e
topology: v6e:2x2x1
jax: 0.10.0
libtpu: 0.0.40
codegen_flags: <defaults>
</compile_context>

<pallas_src>
import functools

import jax
import jax.numpy as jnp
import numpy as np
from jax import lax
from jax.experimental import pallas as pl
from jax.experimental.pallas import tpu as pltpu


def stream_kernel(x_ref,
                  sse_sc_ref, sse_sh_ref, sse_w_ref, sse_b_ref,
                  w9_ref, fuse_sh_ref,
                  o_ref, pad_ref, *, approx_sigmoid):
    H, W, C = x_ref.shape
    Cout = o_ref.shape[-1]
    HW = H * W
    cdt = w9_ref.dtype                       # matmul operand dtype (bf16 or f32)

    def sigmoid(v):                          # 1/(1+e^-v): exp and reciprocal both on EUP
        return pl.reciprocal(1.0 + jnp.exp(-v), approx=approx_sigmoid)

    x = x_ref[...].astype(jnp.float32)       # (H, W, C)
    x_flat = x.reshape(HW, C)

    # ---- SSE branch: BN -> global avg pool -> 1x1 conv(+bias) -> sigmoid gate ----
    bn = x_flat * sse_sc_ref[...] + sse_sh_ref[...]              # (HW, C)
    gap = jnp.mean(bn, axis=0, keepdims=True)                    # (1, C): mean BEFORE matmul
    logits = jnp.dot(gap.astype(cdt), sse_w_ref[...],
                     preferred_element_type=jnp.float32) + sse_b_ref[...]
    gate = sigmoid(logits)                                       # (1, Cout)

    # ---- Fuse branch: folded (1x1 + 3x3) conv + BN via 9 taps of a padded scratch ----
    # Zero the halo every step (cheap; keeps correctness when the grid is sharded
    # across TensorCores), then write the image into the interior once.
    pad_ref[...] = jnp.zeros_like(pad_ref)
    pad_ref[1:H + 1, 1:W + 1, :] = x
    acc = jnp.zeros((HW, Cout), jnp.float32)
    for ky in range(3):
        for kx in range(3):
            xt = pad_ref[ky:ky + H, kx:kx + W, :].astype(cdt).reshape(HW, C)
            acc = acc + jnp.dot(xt, w9_ref[ky * 3 + kx],
                                preferred_element_type=jnp.float32)
    fuse = acc + fuse_sh_ref[...]                                # (HW, Cout)

    # ---- combine + SiLU ----
    c = bn * gate + fuse                                         # requires C == Cout
    o_ref[...] = (c * sigmoid(c)).astype(o_ref.dtype)


def _full_spec(shape):
    nd = len(shape)
    return pl.BlockSpec(shape, lambda n, _nd=nd: (0,) * _nd)


def stream_forward(x_nchw, params, *, compute_dtype=jnp.bfloat16, out_dtype=jnp.float32):
    """x_nchw: (N, C, H, W) float32. Returns (N, Cout, H, W) in out_dtype."""
    N, C, H, W = x_nchw.shape
    Cout = params["f1_w"].shape[1]
    assert C == Cout, "Stream only broadcasts correctly when in_channels == out_channels"

    x = jnp.transpose(x_nchw, (0, 2, 3, 1)).astype(jnp.float32)          # NHWC

    # Fold fuse-conv1 (1x1) and both fuse BN scales into the 3x3 tap weights:
    #   fuse(x) = sum_k shift_k(x) @ (W3[k]*f2_sc) + x @ (W1*f1_sc) + (f1_sh + f2_sh)
    w9 = params["f2_w"].reshape(9, C, Cout) * params["f2_sc"].reshape(1, 1, Cout)
    w9 = w9.at[4].add(params["f1_w"] * params["f1_sc"].reshape(1, Cout))  # center tap
    fuse_sh = (params["f1_sh"] + params["f2_sh"]).astype(jnp.float32)
    w9 = w9.astype(compute_dtype)
    sse_w = params["sse_w"].astype(compute_dtype)

    kernel = functools.partial(
        stream_kernel,
        approx_sigmoid=(jnp.dtype(compute_dtype) == jnp.dtype(jnp.bfloat16)))

    # NOTE: for large H*W, add an H-block grid axis (two-pass for the global mean)
    # so per-step VMEM stays well under v7x's 64 MiB; at realistic channel counts
    # (C >= 128) the channel-minor layout is already lane-dense.
    out_flat = pl.pallas_call(
        kernel,
        out_shape=jax.ShapeDtypeStruct((N, H * W, Cout), out_dtype),
        grid_spec=pltpu.PrefetchScalarGridSpec(
            num_scalar_prefetch=0,
            grid=(N,),
            in_specs=[
                pl.BlockSpec((None, H, W, C), lambda n: (n, 0, 0, 0)),   # image
                _full_spec((1, C)), _full_spec((1, C)),                  # SSE BN scale/shift
                _full_spec((C, Cout)), _full_spec((1, Cout)),            # SSE 1x1 w / b
                _full_spec((9, C, Cout)), _full_spec((1, Cout)),         # folded fuse w / shift
            ],
            out_specs=pl.BlockSpec((None, H * W, Cout), lambda n: (n, 0, 0)),
            scratch_shapes=[pltpu.VMEM((H + 2, W + 2, C), jnp.float32)],  # padded halo
        ),
        compiler_params=pltpu.CompilerParams(
            dimension_semantics=("parallel",),
            vmem_limit_bytes=32 * 1024 * 1024,
        ),
    )(x, params["sse_sc"], params["sse_sh"], sse_w, params["sse_b"], w9, fuse_sh)

    out_nhwc = out_flat.reshape(N, H, W, Cout)
    return jnp.transpose(out_nhwc, (0, 3, 1, 2))                          # back to NCHW


# ---------------- deterministic parameter init ----------------

def _bn_scale_shift(key, ch, eps=1e-5):
    kg, kb, km, kv = jax.random.split(key, 4)
    gamma = jax.random.uniform(kg, (ch,), jnp.float32, 0.5, 1.5)
    beta = 0.1 * jax.random.normal(kb, (ch,), jnp.float32)
    mean = 0.1 * jax.random.normal(km, (ch,), jnp.float32)
    var = jax.random.uniform(kv, (ch,), jnp.float32, 0.5, 1.5)
    scale = gamma / jnp.sqrt(var + eps)
    shift = beta - mean * scale
    return scale.reshape(1, ch), shift.reshape(1, ch)


def init_params(key, C, Cout):
    ks = jax.random.split(key, 7)
    sse_sc, sse_sh = _bn_scale_shift(ks[0], C)
    sse_w = jax.random.normal(ks[1], (C, Cout), jnp.float32) / jnp.sqrt(C)
    sse_b = 0.1 * jax.random.normal(ks[2], (1, Cout), jnp.float32)
    f1_w = jax.random.normal(ks[3], (C, Cout), jnp.float32) / jnp.sqrt(C)
    f1_sc, f1_sh = _bn_scale_shift(ks[4], Cout)
    f2_w = jax.random.normal(ks[5], (3, 3, C, Cout), jnp.float32) / jnp.sqrt(9 * C)  # HWIO
    f2_sc, f2_sh = _bn_scale_shift(ks[6], Cout)
    return dict(sse_sc=sse_sc, sse_sh=sse_sh, sse_w=sse_w, sse_b=sse_b,
                f1_w=f1_w, f1_sc=f1_sc, f1_sh=f1_sh,
                f2_w=f2_w, f2_sc=f2_sc, f2_sh=f2_sh)


# ---------------- pure-JAX reference for validation ----------------

def stream_reference(x_nchw, params):
    x = jnp.transpose(x_nchw, (0, 2, 3, 1)).astype(jnp.float32)          # NHWC
    C = x.shape[-1]
    bn = x * params["sse_sc"].reshape(1, 1, 1, C) + params["sse_sh"].reshape(1, 1, 1, C)
    gap = jnp.mean(bn, axis=(1, 2), keepdims=True)                       # (N,1,1,C)
    logits = jnp.einsum("nhwc,co->nhwo", gap, params["sse_w"],
                        precision=lax.Precision.HIGHEST) + params["sse_b"].reshape(1, 1, 1, -1)
    sse_out = bn * jax.nn.sigmoid(logits)
    a = jnp.einsum("nhwc,co->nhwo", x, params["f1_w"], precision=lax.Precision.HIGHEST)
    a = a * params["f1_sc"].reshape(1, 1, 1, -1) + params["f1_sh"].reshape(1, 1, 1, -1)
    b = lax.conv_general_dilated(x, params["f2_w"], window_strides=(1, 1), padding="SAME",
                                 dimension_numbers=("NHWC", "HWIO", "NHWC"),
                                 precision=lax.Precision.HIGHEST)
    b = b * params["f2_sc"].reshape(1, 1, 1, -1) + params["f2_sh"].reshape(1, 1, 1, -1)
    c = sse_out + a + b
    d = c * jax.nn.sigmoid(c)
    return jnp.transpose(d, (0, 3, 1, 2))


if __name__ == "__main__":
    key = jax.random.PRNGKey(0)
    kx, kp = jax.random.split(key)

    N, C, H, W = 2, 16, 16, 16                      # in_channels == out_channels == 16
    x = jax.random.normal(kx, (N, C, H, W), jnp.float32)
    params = init_params(kp, C, C)

    ref = stream_reference(x, params)

    # f32 compute path: tight check.
    out_f32 = jax.block_until_ready(stream_forward(x, params, compute_dtype=jnp.float32))
    err_f32 = float(jnp.max(jnp.abs(out_f32 - ref)))
    assert out_f32.shape == (N, C, H, W), out_f32.shape
    assert np.isfinite(err_f32) and err_f32 < 1e-2, f"f32 max abs err too large: {err_f32}"

    # bf16 MXU path (production default): looser check.
    out_bf16 = jax.block_until_ready(stream_forward(x, params, compute_dtype=jnp.bfloat16))
    err_bf16 = float(jnp.max(jnp.abs(out_bf16 - ref)))
    assert out_bf16.shape == (N, C, H, W), out_bf16.shape
    assert np.isfinite(err_bf16) and err_bf16 < 5e-2, f"bf16 max abs err too large: {err_bf16}"

    print("KERNEL_OK")
</pallas_src>

<mosaic_0001>
module attributes {stable_mosaic.version = 11 : i64} {
  func.func @stream_kernel(%arg0: i32, %arg1: memref<1x16x16x16xf32, #tpu.memory_space<vmem>>, %arg2: memref<1x16xf32, #tpu.memory_space<vmem>>, %arg3: memref<1x16xf32, #tpu.memory_space<vmem>>, %arg4: memref<16x16xf32, #tpu.memory_space<vmem>>, %arg5: memref<1x16xf32, #tpu.memory_space<vmem>>, %arg6: memref<9x16x16xf32, #tpu.memory_space<vmem>>, %arg7: memref<1x16xf32, #tpu.memory_space<vmem>>, %arg8: memref<1x256x16xf32, #tpu.memory_space<vmem>>, %arg9: memref<18x18x16xf32, #tpu.memory_space<vmem>>) attributes {dimension_semantics = [#tpu.dimension_semantics<parallel>], iteration_bounds = array<i64: 2>, scalar_prefetch = 0 : i64, scratch_operands = 1 : i64, tpu.core_type = #tpu.core_type<tc>, window_params = [{transform_indices = @transform_0, window_bounds = array<i64: 1, 16, 16, 16>}, {pipeline_mode = #tpu.pipeline_mode<synchronous>, transform_indices = @transform_1, window_bounds = array<i64: 1, 16>}, {pipeline_mode = #tpu.pipeline_mode<synchronous>, transform_indices = @transform_2, window_bounds = array<i64: 1, 16>}, {pipeline_mode = #tpu.pipeline_mode<synchronous>, transform_indices = @transform_3, window_bounds = array<i64: 16, 16>}, {pipeline_mode = #tpu.pipeline_mode<synchronous>, transform_indices = @transform_4, window_bounds = array<i64: 1, 16>}, {pipeline_mode = #tpu.pipeline_mode<synchronous>, transform_indices = @transform_5, window_bounds = array<i64: 9, 16, 16>}, {pipeline_mode = #tpu.pipeline_mode<synchronous>, transform_indices = @transform_6, window_bounds = array<i64: 1, 16>}, {transform_indices = @transform_7, window_bounds = array<i64: 1, 256, 16>}]} {
    %c0 = arith.constant 0 : index
    %c0_0 = arith.constant 0 : index
    %c0_1 = arith.constant 0 : index
    %c0_2 = arith.constant 0 : index
    %0 = vector.load %arg1[%c0, %c0_0, %c0_1, %c0_2] : memref<1x16x16x16xf32, #tpu.memory_space<vmem>>, vector<1x16x16x16xf32>
    %1 = vector.shape_cast %0 : vector<1x16x16x16xf32> to vector<16x16x16xf32>
    %2 = vector.shape_cast %1 : vector<16x16x16xf32> to vector<256x16xf32>
    %c0_3 = arith.constant 0 : index
    %c0_4 = arith.constant 0 : index
    %3 = vector.load %arg2[%c0_3, %c0_4] : memref<1x16xf32, #tpu.memory_space<vmem>>, vector<1x16xf32>
    %4 = vector.broadcast %3 : vector<1x16xf32> to vector<256x16xf32>
    %5 = arith.mulf %2, %4 : vector<256x16xf32>
    %c0_5 = arith.constant 0 : index
    %c0_6 = arith.constant 0 : index
    %6 = vector.load %arg3[%c0_5, %c0_6] : memref<1x16xf32, #tpu.memory_space<vmem>>, vector<1x16xf32>
    %7 = vector.broadcast %6 : vector<1x16xf32> to vector<256x16xf32>
    %8 = arith.addf %5, %7 : vector<256x16xf32>
    %cst = arith.constant dense<0.000000e+00> : vector<16xf32>
    %9 = vector.multi_reduction <add>, %8, %cst [0] : vector<256x16xf32> to vector<16xf32>
    %10 = vector.shape_cast %9 : vector<16xf32> to vector<1x16xf32>
    %cst_7 = arith.constant 2.560000e+02 : f32
    %11 = vector.broadcast %cst_7 : f32 to vector<1x16xf32>
    %12 = arith.divf %10, %11 : vector<1x16xf32>
    %c0_8 = arith.constant 0 : index
    %c0_9 = arith.constant 0 : index
    %13 = vector.load %arg4[%c0_8, %c0_9] : memref<16x16xf32, #tpu.memory_space<vmem>>, vector<16x16xf32>
    %cst_10 = arith.constant dense<0.000000e+00> : vector<1x16xf32>
    %14 = tpu.matmul %12, %13, %cst_10 {dimension_numbers = #tpu.dot_dimension_numbers<[1], [0], [0], [1], [0, 0, 1, 1], [], []>} : vector<1x16xf32>, vector<16x16xf32>, vector<1x16xf32> -> vector<1x16xf32>
    %c0_11 = arith.constant 0 : index
    %c0_12 = arith.constant 0 : index
    %15 = vector.load %arg5[%c0_11, %c0_12] : memref<1x16xf32, #tpu.memory_space<vmem>>, vector<1x16xf32>
    %16 = arith.addf %14, %15 : vector<1x16xf32>
    %cst_13 = arith.constant 0.000000e+00 : f32
    %17 = vector.broadcast %cst_13 : f32 to vector<1x16xf32>
    %18 = arith.subf %17, %16 : vector<1x16xf32>
    %19 = math.exp %18 : vector<1x16xf32>
    %cst_14 = arith.constant 1.000000e+00 : f32
    %20 = vector.broadcast %cst_14 : f32 to vector<1x16xf32>
    %21 = arith.addf %20, %19 : vector<1x16xf32>
    %22 = tpu.reciprocal %21 : vector<1x16xf32> -> vector<1x16xf32>
    %cst_15 = arith.constant 0.000000e+00 : f32
    %23 = vector.broadcast %cst_15 : f32 to vector<18x18x16xf32>
    %c0_16 = arith.constant 0 : index
    %c0_17 = arith.constant 0 : index
    %c0_18 = arith.constant 0 : index
    %24 = vector.load %arg9[%c0_16, %c0_17, %c0_18] : memref<18x18x16xf32, #tpu.memory_space<vmem>>, vector<18x18x16xf32>
    tpu.vector_store %arg9[%c0_16, %c0_17, %c0_18], %23 {strides = array<i32>} : memref<18x18x16xf32, #tpu.memory_space<vmem>>, vector<18x18x16xf32>,
    %c1 = arith.constant 1 : index
    %c1_19 = arith.constant 1 : index
    %c0_20 = arith.constant 0 : index
    %25 = vector.load %arg9[%c1, %c1_19, %c0_20] : memref<18x18x16xf32, #tpu.memory_space<vmem>>, vector<16x16x16xf32>
    tpu.vector_store %arg9[%c1, %c1_19, %c0_20], %1 {strides = array<i32>} : memref<18x18x16xf32, #tpu.memory_space<vmem>>, vector<16x16x16xf32>,
    %cst_21 = arith.constant 0.000000e+00 : f32
    %26 = vector.broadcast %cst_21 : f32 to vector<256x16xf32>
    %c0_22 = arith.constant 0 : index
    %c0_23 = arith.constant 0 : index
    %c0_24 = arith.constant 0 : index
    %27 = vector.load %arg9[%c0_22, %c0_23, %c0_24] : memref<18x18x16xf32, #tpu.memory_space<vmem>>, vector<16x16x16xf32>
    %28 = vector.shape_cast %27 : vector<16x16x16xf32> to vector<256x16xf32>
    %c0_25 = arith.constant 0 : index
    %c0_26 = arith.constant 0 : index
    %c0_27 = arith.constant 0 : index
    %29 = vector.load %arg6[%c0_25, %c0_26, %c0_27] : memref<9x16x16xf32, #tpu.memory_space<vmem>>, vector<1x16x16xf32>
    %30 = vector.shape_cast %29 : vector<1x16x16xf32> to vector<16x16xf32>
    %cst_28 = arith.constant dense<0.000000e+00> : vector<256x16xf32>
    %31 = tpu.matmul %28, %30, %cst_28 {dimension_numbers = #tpu.dot_dimension_numbers<[1], [0], [0], [1], [0, 0, 1, 1], [], []>} : vector<256x16xf32>, vector<16x16xf32>, vector<256x16xf32> -> vector<256x16xf32>
    %32 = arith.addf %26, %31 : vector<256x16xf32>
    %c0_29 = arith.constant 0 : index
    %c1_30 = arith.constant 1 : index
    %c0_31 = arith.constant 0 : index
    %33 = vector.load %arg9[%c0_29, %c1_30, %c0_31] : memref<18x18x16xf32, #tpu.memory_space<vmem>>, vector<16x16x16xf32>
    %34 = vector.shape_cast %33 : vector<16x16x16xf32> to vector<256x16xf32>
    %c1_32 = arith.constant 1 : index
    %c0_33 = arith.constant 0 : index
    %c0_34 = arith.constant 0 : index
    %35 = vector.load %arg6[%c1_32, %c0_33, %c0_34] : memref<9x16x16xf32, #tpu.memory_space<vmem>>, vector<1x16x16xf32>
    %36 = vector.shape_cast %35 : vector<1x16x16xf32> to vector<16x16xf32>
    %cst_35 = arith.constant dense<0.000000e+00> : vector<256x16xf32>
    %37 = tpu.matmul %34, %36, %cst_35 {dimension_numbers = #tpu.dot_dimension_numbers<[1], [0], [0], [1], [0, 0, 1, 1], [], []>} : vector<256x16xf32>, vector<16x16xf32>, vector<256x16xf32> -> vector<256x16xf32>
    %38 = arith.addf %32, %37 : vector<256x16xf32>
    %c0_36 = arith.constant 0 : index
    %c2 = arith.constant 2 : index
    %c0_37 = arith.constant 0 : index
    %39 = vector.load %arg9[%c0_36, %c2, %c0_37] : memref<18x18x16xf32, #tpu.memory_space<vmem>>, vector<16x16x16xf32>
    %40 = vector.shape_cast %39 : vector<16x16x16xf32> to vector<256x16xf32>
    %c2_38 = arith.constant 2 : index
    %c0_39 = arith.constant 0 : index
    %c0_40 = arith.constant 0 : index
    %41 = vector.load %arg6[%c2_38, %c0_39, %c0_40] : memref<9x16x16xf32, #tpu.memory_space<vmem>>, vector<1x16x16xf32>
    %42 = vector.shape_cast %41 : vector<1x16x16xf32> to vector<16x16xf32>
    %cst_41 = arith.constant dense<0.000000e+00> : vector<256x16xf32>
    %43 = tpu.matmul %40, %42, %cst_41 {dimension_numbers = #tpu.dot_dimension_numbers<[1], [0], [0], [1], [0, 0, 1, 1], [], []>} : vector<256x16xf32>, vector<16x16xf32>, vector<256x16xf32> -> vector<256x16xf32>
    %44 = arith.addf %38, %43 : vector<256x16xf32>
    %c1_42 = arith.constant 1 : index
    %c0_43 = arith.constant 0 : index
    %c0_44 = arith.constant 0 : index
    %45 = vector.load %arg9[%c1_42, %c0_43, %c0_44] : memref<18x18x16xf32, #tpu.memory_space<vmem>>, vector<16x16x16xf32>
    %46 = vector.shape_cast %45 : vector<16x16x16xf32> to vector<256x16xf32>
    %c3 = arith.constant 3 : index
    %c0_45 = arith.constant 0 : index
    %c0_46 = arith.constant 0 : index
    %47 = vector.load %arg6[%c3, %c0_45, %c0_46] : memref<9x16x16xf32, #tpu.memory_space<vmem>>, vector<1x16x16xf32>
    %48 = vector.shape_cast %47 : vector<1x16x16xf32> to vector<16x16xf32>
    %cst_47 = arith.constant dense<0.000000e+00> : vector<256x16xf32>
    %49 = tpu.matmul %46, %48, %cst_47 {dimension_numbers = #tpu.dot_dimension_numbers<[1], [0], [0], [1], [0, 0, 1, 1], [], []>} : vector<256x16xf32>, vector<16x16xf32>, vector<256x16xf32> -> vector<256x16xf32>
    %50 = arith.addf %44, %49 : vector<256x16xf32>
    %c1_48 = arith.constant 1 : index
    %c1_49 = arith.constant 1 : index
    %c0_50 = arith.constant 0 : index
    %51 = vector.load %arg9[%c1_48, %c1_49, %c0_50] : memref<18x18x16xf32, #tpu.memory_space<vmem>>, vector<16x16x16xf32>
    %52 = vector.shape_cast %51 : vector<16x16x16xf32> to vector<256x16xf32>
    %c4 = arith.constant 4 : index
    %c0_51 = arith.constant 0 : index
    %c0_52 = arith.constant 0 : index
    %53 = vector.load %arg6[%c4, %c0_51, %c0_52] : memref<9x16x16xf32, #tpu.memory_space<vmem>>, vector<1x16x16xf32>
    %54 = vector.shape_cast %53 : vector<1x16x16xf32> to vector<16x16xf32>
    %cst_53 = arith.constant dense<0.000000e+00> : vector<256x16xf32>
    %55 = tpu.matmul %52, %54, %cst_53 {dimension_numbers = #tpu.dot_dimension_numbers<[1], [0], [0], [1], [0, 0, 1, 1], [], []>} : vector<256x16xf32>, vector<16x16xf32>, vector<256x16xf32> -> vector<256x16xf32>
    %56 = arith.addf %50, %55 : vector<256x16xf32>
    %c1_54 = arith.constant 1 : index
    %c2_55 = arith.constant 2 : index
    %c0_56 = arith.constant 0 : index
    %57 = vector.load %arg9[%c1_54, %c2_55, %c0_56] : memref<18x18x16xf32, #tpu.memory_space<vmem>>, vector<16x16x16xf32>
    %58 = vector.shape_cast %57 : vector<16x16x16xf32> to vector<256x16xf32>
    %c5 = arith.constant 5 : index
    %c0_57 = arith.constant 0 : index
    %c0_58 = arith.constant 0 : index
    %59 = vector.load %arg6[%c5, %c0_57, %c0_58] : memref<9x16x16xf32, #tpu.memory_space<vmem>>, vector<1x16x16xf32>
    %60 = vector.shape_cast %59 : vector<1x16x16xf32> to vector<16x16xf32>
    %cst_59 = arith.constant dense<0.000000e+00> : vector<256x16xf32>
    %61 = tpu.matmul %58, %60, %cst_59 {dimension_numbers = #tpu.dot_dimension_numbers<[1], [0], [0], [1], [0, 0, 1, 1], [], []>} : vector<256x16xf32>, vector<16x16xf32>, vector<256x16xf32> -> vector<256x16xf32>
    %62 = arith.addf %56, %61 : vector<256x16xf32>
    %c2_60 = arith.constant 2 : index
    %c0_61 = arith.constant 0 : index
    %c0_62 = arith.constant 0 : index
    %63 = vector.load %arg9[%c2_60, %c0_61, %c0_62] : memref<18x18x16xf32, #tpu.memory_space<vmem>>, vector<16x16x16xf32>
    %64 = vector.shape_cast %63 : vector<16x16x16xf32> to vector<256x16xf32>
    %c6 = arith.constant 6 : index
    %c0_63 = arith.constant 0 : index
    %c0_64 = arith.constant 0 : index
    %65 = vector.load %arg6[%c6, %c0_63, %c0_64] : memref<9x16x16xf32, #tpu.memory_space<vmem>>, vector<1x16x16xf32>
    %66 = vector.shape_cast %65 : vector<1x16x16xf32> to vector<16x16xf32>
    %cst_65 = arith.constant dense<0.000000e+00> : vector<256x16xf32>
    %67 = tpu.matmul %64, %66, %cst_65 {dimension_numbers = #tpu.dot_dimension_numbers<[1], [0], [0], [1], [0, 0, 1, 1], [], []>} : vector<256x16xf32>, vector<16x16xf32>, vector<256x16xf32> -> vector<256x16xf32>
    %68 = arith.addf %62, %67 : vector<256x16xf32>
    %c2_66 = arith.constant 2 : index
    %c1_67 = arith.constant 1 : index
    %c0_68 = arith.constant 0 : index
    %69 = vector.load %arg9[%c2_66, %c1_67, %c0_68] : memref<18x18x16xf32, #tpu.memory_space<vmem>>, vector<16x16x16xf32>
    %70 = vector.shape_cast %69 : vector<16x16x16xf32> to vector<256x16xf32>
    %c7 = arith.constant 7 : index
    %c0_69 = arith.constant 0 : index
    %c0_70 = arith.constant 0 : index
    %71 = vector.load %arg6[%c7, %c0_69, %c0_70] : memref<9x16x16xf32, #tpu.memory_space<vmem>>, vector<1x16x16xf32>
    %72 = vector.shape_cast %71 : vector<1x16x16xf32> to vector<16x16xf32>
    %cst_71 = arith.constant dense<0.000000e+00> : vector<256x16xf32>
    %73 = tpu.matmul %70, %72, %cst_71 {dimension_numbers = #tpu.dot_dimension_numbers<[1], [0], [0], [1], [0, 0, 1, 1], [], []>} : vector<256x16xf32>, vector<16x16xf32>, vector<256x16xf32> -> vector<256x16xf32>
    %74 = arith.addf %68, %73 : vector<256x16xf32>
    %c2_72 = arith.constant 2 : index
    %c2_73 = arith.constant 2 : index
    %c0_74 = arith.constant 0 : index
    %75 = vector.load %arg9[%c2_72, %c2_73, %c0_74] : memref<18x18x16xf32, #tpu.memory_space<vmem>>, vector<16x16x16xf32>
    %76 = vector.shape_cast %75 : vector<16x16x16xf32> to vector<256x16xf32>
    %c8 = arith.constant 8 : index
    %c0_75 = arith.constant 0 : index
    %c0_76 = arith.constant 0 : index
    %77 = vector.load %arg6[%c8, %c0_75, %c0_76] : memref<9x16x16xf32, #tpu.memory_space<vmem>>, vector<1x16x16xf32>
    %78 = vector.shape_cast %77 : vector<1x16x16xf32> to vector<16x16xf32>
    %cst_77 = arith.constant dense<0.000000e+00> : vector<256x16xf32>
    %79 = tpu.matmul %76, %78, %cst_77 {dimension_numbers = #tpu.dot_dimension_numbers<[1], [0], [0], [1], [0, 0, 1, 1], [], []>} : vector<256x16xf32>, vector<16x16xf32>, vector<256x16xf32> -> vector<256x16xf32>
    %80 = arith.addf %74, %79 : vector<256x16xf32>
    %c0_78 = arith.constant 0 : index
    %c0_79 = arith.constant 0 : index
    %81 = vector.load %arg7[%c0_78, %c0_79] : memref<1x16xf32, #tpu.memory_space<vmem>>, vector<1x16xf32>
    %82 = vector.broadcast %81 : vector<1x16xf32> to vector<256x16xf32>
    %83 = arith.addf %80, %82 : vector<256x16xf32>
    %84 = vector.broadcast %22 : vector<1x16xf32> to vector<256x16xf32>
    %85 = arith.mulf %8, %84 : vector<256x16xf32>
    %86 = arith.addf %85, %83 : vector<256x16xf32>
    %cst_80 = arith.constant 0.000000e+00 : f32
    %87 = vector.broadcast %cst_80 : f32 to vector<256x16xf32>
    %88 = arith.subf %87, %86 : vector<256x16xf32>
    %89 = math.exp %88 : vector<256x16xf32>
    %cst_81 = arith.constant 1.000000e+00 : f32
    %90 = vector.broadcast %cst_81 : f32 to vector<256x16xf32>
    %91 = arith.addf %90, %89 : vector<256x16xf32>
    %92 = tpu.reciprocal %91 : vector<256x16xf32> -> vector<256x16xf32>
    %93 = arith.mulf %86, %92 : vector<256x16xf32>
    %c0_82 = arith.constant 0 : index
    %c0_83 = arith.constant 0 : index
    %c0_84 = arith.constant 0 : index
    %94 = vector.load %arg8[%c0_82, %c0_83, %c0_84] : memref<1x256x16xf32, #tpu.memory_space<vmem>>, vector<1x256x16xf32>
    %95 = vector.shape_cast %94 : vector<1x256x16xf32> to vector<256x16xf32>
    %96 = vector.shape_cast %93 : vector<256x16xf32> to vector<1x256x16xf32>
    tpu.vector_store %arg8[%c0_82, %c0_83, %c0_84], %96 {strides = array<i32>} : memref<1x256x16xf32, #tpu.memory_space<vmem>>, vector<1x256x16xf32>,
    return
  }
  func.func @transform_0(%arg0: i32) -> (i32, i32, i32, i32) {
    %c0_i32 = arith.constant 0 : i32
    %c0_i32_0 = arith.constant 0 : i32
    %c0_i32_1 = arith.constant 0 : i32
    %c0_i32_2 = arith.constant 0 : i32
    return %arg0, %c0_i32, %c0_i32_0, %c0_i32_1 : i32, i32, i32, i32
  }
  func.func @transform_1(%arg0: i32) -> (i32, i32) {
    %c0_i32 = arith.constant 0 : i32
    %c0_i32_0 = arith.constant 0 : i32
    %c0_i32_1 = arith.constant 0 : i32
    return %c0_i32, %c0_i32_0 : i32, i32
  }
  func.func @transform_2(%arg0: i32) -> (i32, i32) {
    %c0_i32 = arith.constant 0 : i32
    %c0_i32_0 = arith.constant 0 : i32
    %c0_i32_1 = arith.constant 0 : i32
    return %c0_i32, %c0_i32_0 : i32, i32
  }
  func.func @transform_3(%arg0: i32) -> (i32, i32) {
    %c0_i32 = arith.constant 0 : i32
    %c0_i32_0 = arith.constant 0 : i32
    %c0_i32_1 = arith.constant 0 : i32
    return %c0_i32, %c0_i32_0 : i32, i32
  }
  func.func @transform_4(%arg0: i32) -> (i32, i32) {
    %c0_i32 = arith.constant 0 : i32
    %c0_i32_0 = arith.constant 0 : i32
    %c0_i32_1 = arith.constant 0 : i32
    return %c0_i32, %c0_i32_0 : i32, i32
  }
  func.func @transform_5(%arg0: i32) -> (i32, i32, i32) {
    %c0_i32 = arith.constant 0 : i32
    %c0_i32_0 = arith.constant 0 : i32
    %c0_i32_1 = arith.constant 0 : i32
    %c0_i32_2 = arith.constant 0 : i32
    return %c0_i32, %c0_i32_0, %c0_i32_1 : i32, i32, i32
  }
  func.func @transform_6(%arg0: i32) -> (i32, i32) {
    %c0_i32 = arith.constant 0 : i32
    %c0_i32_0 = arith.constant 0 : i32
    %c0_i32_1 = arith.constant 0 : i32
    return %c0_i32, %c0_i32_0 : i32, i32
  }
  func.func @transform_7(%arg0: i32) -> (i32, i32, i32) {
    %c0_i32 = arith.constant 0 : i32
    %c0_i32_0 = arith.constant 0 : i32
    %c0_i32_1 = arith.constant 0 : i32
    return %arg0, %c0_i32, %c0_i32_0 : i32, i32, i32
  }
}

</mosaic_0001>

<bundles_post_ra>
// kernel: tpu_custom_call.1
= control target key start
LH: loop header
LB: loop body
LE: loop exit
PB: predicated region body
PF: predicated region fallthrough
CT: control target
= control target key end

     0   :  { %12 = vsyncpa [#allocation4], 0  ;;  %s8513_s0 = inlined_call_operand.hbm [shape: f32[2,16,16,16], index: 0, kind: input, shape index: {}]   ;;  %s8514_s1 = inlined_call_operand.vmem [shape: f32[1,16], index: 1, kind: input, shape index: {}]   ;;  %s8515_s2 = inlined_call_operand.vmem [shape: f32[1,16], index: 2, kind: input, shape index: {}]   ;;  %s8516_s3 = inlined_call_operand.hbm [shape: f32[16,16], index: 3, kind: input, shape index: {}]   ;;  %s8517_s4 = inlined_call_operand.vmem [shape: f32[1,16], index: 4, kind: input, shape index: {}]   ;;  %s8518_s5 = inlined_call_operand.hbm [shape: f32[9,16,16], index: 5, kind: input, shape index: {}]   ;;  %s8519_s6 = inlined_call_operand.vmem [shape: f32[1,16], index: 6, kind: input, shape index: {}]   ;;  %s8520_s7 = inlined_call_operand.vmem [shape: f32[2,256,16], index: 7, kind: output, shape index: {}]  }
   0x1   :  { %14 = vsyncpa [#allocation4 + $0x1], 0 }
   0x2   :  { %15 = vsyncpa [#allocation6], 0  ;;  %s5985_s24 = smov 0   ;;  %s5987_s25 = smov 0  }
   0x3   :  { %s5989_s26 = smov 0   ;;  %s5991_s27 = smov 0  }
   0x4 LB: > { %s6004_s28 = sadd.s32 4294967295, %s5936_s27   ;;  %p41_p0 = scmp.ne.s32.totalorder %s5928_s25, %s5924_s24  ;;  %s5936_s27 = sphi %s5991_s27, %s8900_s27   ;;  %s5932_s26 = sphi %s5989_s26, %s8899_s26   ;;  %s5928_s25 = sphi %s5987_s25, %s8898_s25   ;;  %s5924_s24 = sphi %s5985_s24, %s8897_s24  }
   0x5   : > { %p8521_p1 = scmp.eq.s32.totalorder %s6004_s28, 0  ;;  %p4525_p2 = scmp.ge.s32.totalorder %s5936_s27, 1 }
   0x6   : > { %p204_p3 = scmp.lt.s32.totalorder %s5936_s27, 3  ;;  %s5938_s8 = smov [#allocation5]  }
   0x7   : > { %p6012_p4 = por %p8521_p1, %p41_p0  ;;  %s222_s9 = sshll.u32 %s5938_s8, 4  ;;  %s223_s9 = int_to_ptr.vmem [resolvable:$true] %s222_s9 }
   0x8   : > { %p6016_p5 = pnand %p4525_p2, %p204_p3  ;;  %s5939_s11 = smov [#allocation7]  }
   0x9   : > { %s8561_s29 = scalar_select %p6012_p4, 1, 0 }
   0xa   : > { %s8562_s30 = scalar_select %p6016_p5, 1, 0 }
   0xb   : > { %p5632_p6 = pneg %p6016_p5  ;;  %s238_s12 = sshll.u32 %s5939_s11, 4  ;;  %s239_s12 = int_to_ptr.vmem [resolvable:$true] %s238_s12 }
   0xc   : > { %s5829_s13 = scalar_lea.vmem %s223_s9, 256  ;;  %p5837_p12 = scmp.lt.s32.totalorder %s223_s9, %s223_s9 }
   0xd   : > { %p6024_p7 = pnand %p5632_p6, %p8521_p1  ;;  %p5830_p9 = scmp.ne.s32.totalorder %s223_s9, %s5829_s13 }
   0xe   : > { %p5838_p13 = scmp.lt.s32.totalorder %s5829_s13, %s5829_s13 }
   0xf   : > { %p5820_p8 = pneg %p6024_p7 }
  0x10   : > { %p5839_p0 = por %p5838_p13, %p5837_p12 }
  0x11   : > { %p5832_p10 = pnand %p5830_p9, %p5820_p8 }
  0x13   : > { %p5833_p11 = pneg %p5832_p10 }
  0x15   : > { %p5840_p2 = pnand %p5839_p0, %p5833_p11 }
  0x17   : > { %5843 = shalt.err (!%p5840_p2)
}
  0x18   : > { %s5940_s14 = smov 128   ;;  %s5941_s15 = smov 8  }
  0x19   : > { %5635 = dma.hbm_to_vmem [thread:$0]  (!%p6024_p7), %s8516_s3, 256, %s223_s9, [#allocation6], %s5940_s14, %s5940_s14, %s5941_s15  }
  0x1a   : > { %s5855_s18 = scalar_lea.vmem %s239_s12, 2304  ;;  %p5863_p10 = scmp.lt.s32.totalorder %s239_s12, %s239_s12 }
  0x1b   : > { %p5856_p3 = scmp.ne.s32.totalorder %s239_s12, %s5855_s18  ;;  %p5864_p11 = scmp.lt.s32.totalorder %s5855_s18, %s5855_s18 }
  0x1d   : > { %p5858_p6 = pnand %p5856_p3, %p5820_p8  ;;  %p5865_p12 = por %p5864_p11, %p5863_p10 }
  0x1f   : > { %p5859_p9 = pneg %p5858_p6 }
  0x21   : > { %p5866_p13 = pnand %p5865_p12, %p5859_p9 }
  0x23   : > { %5869 = shalt.err (!%p5866_p13)
}
  0x24   : > { %5638 = dma.hbm_to_vmem [thread:$0]  (!%p6024_p7), %s8518_s5, 2304, %s239_s12, [#allocation6], %s5940_s14, %s5940_s14, %s5941_s15  }
  0x25   : > { %s6053_s21 = sadd.s32 1, %s5936_s27   ;;  %s28_s22 = sadd.s32 1, %s5932_s26 }
  0x26   : > { %s25_s23 = ssub.s32 %s5936_s27, %s6053_s21  ;;  %p35_p8 = scmp.ne.s32.totalorder %s5932_s26, %s5928_s25 }
  0x27   : > { %p26_p0 = scmp.eq.s32.totalorder %s25_s23, 0  ;;  %p36_p2 = scmp.eq.s32.totalorder %s5936_s27, 0 }
  0x28   : > { %p5645_p3 = scmp.lt.s32.totalorder %s5936_s27, 2  ;;  %s255_s24 = sand.u32 1, %s5932_s26  }
  0x29   : > { %s6064_s8 = scalar_select %p26_p0, %s5932_s26, %s28_s22  }
  0x2a   : > { %p37_p6 = por %p36_p2, %p35_p8  ;;  %s4529_s9 = sshll.u32 %s255_s24, 8 }
  0x2b   : > { %s4832_s10 = sshll.u32 %s5936_s27, 12  ;;  %s259_s12 = scalar_lea.vmem [#allocation3], %s4529_s9 }
  0x2c   : > { %s6070_s16 = scalar_lea.hbm %s8513_s0, %s4832_s10  ;;  %s266_s17 = sshll.u32 %s259_s12, 4  ;;  %s6076_s17 = int_to_ptr.vmem [resolvable:$true] %s266_s17 }
  0x2d   : > { %p6072_p7 = pnand %p5645_p3, %p37_p6  ;;  %s6078_s19 = scalar_lea.sflag [#allocation4], %s255_s24 }
  0x2e   : > { %s5870_s27 = scalar_lea.hbm %s6070_s16, 4096  ;;  %s5875_s23 = scalar_lea.hbm %s8513_s0, 8192 }
  0x2f   : > { %p5871_p9 = scmp.ne.s32.totalorder %s6070_s16, %s5870_s27  ;;  %p5872_p10 = pneg %p6072_p7 }
  0x30   : > { %p5876_p13 = scmp.lt.s32.totalorder %s6070_s16, %s8513_s0  ;;  %p5877_p8 = scmp.lt.s32.totalorder %s5875_s23, %s5870_s27 }
  0x31   : > { %p5873_p11 = pnand %p5872_p10, %p5871_p9 }
  0x32   : > { %p5878_p0 = por %p5877_p8, %p5876_p13 }
  0x33   : > { %p5874_p12 = pneg %p5873_p11 }
  0x35   : > { %p5879_p2 = pnand %p5878_p0, %p5874_p12 }
  0x37   : > { %5882 = shalt.err (!%p5879_p2)
}
  0x38   : > { %s5883_s24 = scalar_lea.vmem %s6076_s17, 4096  ;;  %s5942_s11 = smov [#allocation3]  }
  0x39   : > { %p5884_p3 = scmp.ne.s32.totalorder %s6076_s17, %s5883_s24  ;;  %s5888_s13 = sshll.u32 %s5942_s11, 4  ;;  %s5889_s13 = int_to_ptr.vmem [resolvable:$false] %s5888_s13 }
  0x3a   : > { %s5890_s12 = scalar_lea.vmem %s5889_s13, 8192  ;;  %p5891_p11 = scmp.lt.s32.totalorder %s6076_s17, %s5889_s13 }
  0x3b   : > { %p5886_p6 = pnand %p5884_p3, %p5872_p10  ;;  %p5892_p1 = scmp.lt.s32.totalorder %s5890_s12, %s5883_s24 }
  0x3d   : > { %p5887_p9 = pneg %p5886_p6  ;;  %p5893_p4 = por %p5892_p1, %p5891_p11 }
  0x3f   : > { %p5894_p5 = pnand %p5893_p4, %p5887_p9 }
  0x41   : > { %5897 = shalt.err (!%p5894_p5)
}
  0x42   : > { %5642 = dma.hbm_to_vmem [thread:$0]  (!%p6072_p7), %s6070_s16, 4096, %s6076_s17, %s6078_s19, %s5940_s14, %s5940_s14, %s5941_s15  }
  0x43   : > { %p8565_p10 = scmp.ne.s32.totalorder %s8562_s30, 0 }
  0x45   : > { %278 = sbr.rel (%p8565_p10) target bundleno = 736 (0x2e0), region = 48 }
  0x4a   : > { %s280_s27 = sand.u32 1, %s5928_s25   ;;  %p8566_p1 = scmp.ne.s32.totalorder %s8561_s29, 0 }
  0x4b   : > { %s4533_s20 = sshll.u32 %s280_s27, 8  ;;  %s281_s22 = scalar_lea.sflag [#allocation4], %s280_s27 }
  0x4c   : > { %s6105_s23 = scalar_lea.vmem [#allocation3], %s4533_s20 }
  0x4d   : > { %5915 = dma.done.wait (%p8566_p1), %s281_s22, 4096  }
  0x4e   : > { %5917 = vsyncadd (%p8566_p1), %s281_s22, 4294963200  ;;  %p8567_p4 = scmp.eq.s32.totalorder %s6004_s28, 0 }
  0x50   : > { %5919 = dma.done.wait (%p8567_p4), [#allocation6], 2560   ;;  %p8568_p5 = pmov %p8567_p4 }
  0x51   : > { %vm438_vm0 = vcmask 130048   ;;  %vm593_vm1 = vcmask 123904   ;;  %v5943_v0 = vmov 0.0   ;;  %vm5944_vm2 = vmmov 0   ;;  %v6225_v1 = vld [vmem:[#allocation7 + $0x18] sm:$0xff]  ;;  %v6227_v2 = vld [vmem:[#allocation7 + $0x10] sm:$0xff] }
  0x52   : > { %5921 = vsyncadd (%p8568_p5), [#allocation6], 4294964736  ;;  %5143 = vmatprep.subr.mxu0 %v5943_v0  ;;  %613 = vst.msk [vmem:[#allocation2 + $0xa8] sm:$0xff] %vm438_vm0, %v5943_v0  ;;  %5147 = vmatprep.mubr.msk.f32.mxu0 %vm5944_vm2, %v5943_v0  ;;  %v328_v3 = vld [vmem:[%s6105_s23] sm:$0xff]  ;;  %v329_v4 = vld [vmem:[%s6105_s23 + $0x8] sm:$0xff]  ;;  %p323_p7 = scmp.lt.s32.totalorder %s6004_s28, 1 }
  0x53   : > { %614 = vst.msk [vmem:[#allocation2 + $0xb0] sm:$0xff] %vm438_vm0, %v5943_v0  ;;  %591 = vst.msk [vmem:[#allocation2] sm:$0xff] %vm438_vm0, %v5943_v0  ;;  %5618 = vmatprep.subr.mxu1 %v6225_v1  ;;  %v330_v5 = vld [vmem:[%s6105_s23 + $0x10] sm:$0xff]  ;;  %v331_v6 = vld [vmem:[%s6105_s23 + $0x18] sm:$0xff] }
  0x54   : > { %592 = vst.msk [vmem:[#allocation2 + $0x8] sm:$0xff] %vm438_vm0, %v5943_v0  ;;  %595 = vst.msk [vmem:[#allocation2 + $0x18] sm:$0xff] %vm438_vm0, %v5943_v0  ;;  %5620 = vmatpush3.msra.mxu1 %v6225_v1  ;;  %v332_v7 = vld [vmem:[%s6105_s23 + $0x20] sm:$0xff]  ;;  %v333_v8 = vld [vmem:[%s6105_s23 + $0x28] sm:$0xff]  ;;  %s8902_s28 = smov (!%p323_p7, %s6004_s28), 1 }
  0x55   : > { %596 = vst.msk [vmem:[#allocation2 + $0x20] sm:$0xff] %vm438_vm0, %v5943_v0  ;;  %598 = vst.msk [vmem:[#allocation2 + $0x30] sm:$0xff] %vm438_vm0, %v5943_v0  ;;  %v6239_v9 = vld [vmem:[%s6105_s23 + $0x30] sm:$0xff]  ;;  %5619 = vmatprep.subr.mxu1 %v6227_v2  ;;  %v6246_v10 = vld [vmem:[%s6105_s23 + $0x38] sm:$0xff]  ;;  %s4833_s9 = sshll.u32 %s8902_s28, 8 }
  0x56   : > { %599 = vst.msk [vmem:[#allocation2 + $0x38] sm:$0xff] %vm438_vm0, %v5943_v0  ;;  %601 = vst.msk [vmem:[#allocation2 + $0x48] sm:$0xff] %vm438_vm0, %v5943_v0  ;;  %v6249_v11 = vld [vmem:[%s6105_s23 + $0x40] sm:$0xff]  ;;  %v6252_v12 = vld [vmem:[%s6105_s23 + $0x48] sm:$0xff]  ;;  %5621 = vmatpush3.msra.mxu1 %v6227_v2  ;;  %s8294_s24 = scalar_lea.vmem %s8520_s7, %s4833_s9 }
  0x57   : > { %602 = vst.msk [vmem:[#allocation2 + $0x50] sm:$0xff] %vm438_vm0, %v5943_v0  ;;  %604 = vst.msk [vmem:[#allocation2 + $0x60] sm:$0xff] %vm438_vm0, %v5943_v0  ;;  %v6260_v13 = vld [vmem:[%s6105_s23 + $0x50] sm:$0xff]  ;;  %v6263_v14 = vld [vmem:[%s6105_s23 + $0x58] sm:$0xff] }
  0x58   : > { %605 = vst.msk [vmem:[#allocation2 + $0x68] sm:$0xff] %vm438_vm0, %v5943_v0  ;;  %607 = vst.msk [vmem:[#allocation2 + $0x78] sm:$0xff] %vm438_vm0, %v5943_v0  ;;  %v6266_v15 = vld [vmem:[%s6105_s23 + $0x60] sm:$0xff]  ;;  %v6277_v16 = vld [vmem:[%s8514_s1] ss:$0 sm:$0xff] }
  0x59   : > { %608 = vst.msk [vmem:[#allocation2 + $0x80] sm:$0xff] %vm438_vm0, %v5943_v0  ;;  %610 = vst.msk [vmem:[#allocation2 + $0x90] sm:$0xff] %vm438_vm0, %v5943_v0  ;;  %v6282_v17 = vld [vmem:[%s8515_s2] ss:$0 sm:$0xff]  ;;  %v511_v18 = vld [vmem:[#allocation5 + $0x8] sm:$0xff]  ;;  %v367_v19 = vmul.f32 %v6277_v16, %v328_v3  ;;  %v368_v20 = vmul.f32 %v6277_v16, %v329_v4  ;;  %v369_v21 = vmul.f32 %v6277_v16, %v330_v5 }
  0x5a   : > { %611 = vst.msk [vmem:[#allocation2 + $0x98] sm:$0xff] %vm438_vm0, %v5943_v0  ;;  %616 = vst.msk [vmem:[#allocation2 + $0xc0] sm:$0xff] %vm438_vm0, %v5943_v0  ;;  %v370_v22 = vmul.f32 %v6277_v16, %v331_v6  ;;  %5144 = vmatpush3.msra.mxu0 %v511_v18  ;;  %v6295_v23 = vld [vmem:[%s6105_s23 + $0x68] sm:$0xff]  ;;  %v6297_v24 = vld [vmem:[#allocation7 + $0x28] sm:$0xff]  ;;  %v371_v29 = vmul.f32 %v6277_v16, %v332_v7  ;;  %v372_v39 = vmul.f32 %v6277_v16, %v333_v8 }
  0x5b   : > { %617 = vst.msk [vmem:[#allocation2 + $0xc8] sm:$0xff] %vm438_vm0, %v5943_v0  ;;  %619 = vst.msk [vmem:[#allocation2 + $0xd8] sm:$0xff] %vm438_vm0, %v5943_v0  ;;  %v510_v25 = vld [vmem:[#allocation5] sm:$0xff]  ;;  %5145 = vmatprep.subr.mxu0 %v5943_v0  ;;  %v6303_v26 = vld [vmem:[%s6105_s23 + $0x70] sm:$0xff]  ;;  %5254 = vmatprep.subr.mxu1 %v6297_v24  ;;  %v6329_v33 = vadd.f32 %v6282_v17, %v367_v19  ;;  %v6332_v34 = vadd.f32 %v6282_v17, %v368_v20 }
  0x5c   : > { %620 = vst.msk [vmem:[#allocation2 + $0xe0] sm:$0xff] %vm438_vm0, %v5943_v0  ;;  %622 = vst.msk [vmem:[#allocation2 + $0xf0] sm:$0xff] %vm438_vm0, %v5943_v0  ;;  %v6306_v27 = vld [vmem:[%s6105_s23 + $0x78] sm:$0xff]  ;;  %v6309_v28 = vld [vmem:[%s6105_s23 + $0x80] sm:$0xff]  ;;  %v6335_v35 = vadd.f32 %v6282_v17, %v369_v21  ;;  %5146 = vmatpush3.msra.mxu0 %v510_v25  ;;  %v6354_v40 = vadd.f32 %v6282_v17, %v370_v22  ;;  %v373_v47 = vmul.f32 %v6277_v16, %v6239_v9 }
  0x5d   : > { %623 = vst.msk [vmem:[#allocation2 + $0xf8] sm:$0xff] %vm438_vm0, %v5943_v0  ;;  %625 = vst.msk [vmem:[#allocation2 + $0x108] sm:$0xff] %vm438_vm0, %v5943_v0  ;;  %v6316_v30 = vld [vmem:[%s6105_s23 + $0x88] sm:$0xff]  ;;  %v6319_v31 = vld [vmem:[%s6105_s23 + $0x90] sm:$0xff]  ;;  %5150 = vmatprep.subr.mxu0 %v6225_v1  ;;  %v6390_v48 = vadd.f32 %v6282_v17, %v371_v29  ;;  %v439_v49 = vsel %vm438_vm0, %v6329_v33, 0.0  ;;  %v440_v50 = vsel %vm438_vm0, %v6332_v34, 0.0  ;;  %v374_v57 = vmul.f32 %v6277_v16, %v6246_v10 }
  0x5e   : > { %626 = vst.msk [vmem:[#allocation2 + $0x110] sm:$0xff] %vm438_vm0, %v5943_v0  ;;  %628 = vst.msk [vmem:[#allocation2 + $0x120] sm:$0xff] %vm438_vm0, %v5943_v0  ;;  %v6322_v32 = vld [vmem:[%s6105_s23 + $0x98] sm:$0xff]  ;;  %v6338_v36 = vld [vmem:[%s6105_s23 + $0xa0] sm:$0xff]  ;;  %v441_v54 = vadd.f32 %v440_v50, %v439_v49  ;;  %v442_v55 = vsel %vm438_vm0, %v6335_v35, 0.0  ;;  %v6424_v58 = vadd.f32 %v6282_v17, %v372_v39  ;;  %v444_v59 = vsel %vm438_vm0, %v6354_v40, 0.0 }
  0x5f   : > { %629 = vst.msk [vmem:[#allocation2 + $0x128] sm:$0xff] %vm438_vm0, %v5943_v0  ;;  %631 = vst.msk [vmem:[#allocation2 + $0x138] sm:$0xff] %vm438_vm0, %v5943_v0  ;;  %v6341_v37 = vld [vmem:[%s6105_s23 + $0xa8] sm:$0xff]  ;;  %v6344_v38 = vld [vmem:[%s6105_s23 + $0xb0] sm:$0xff]  ;;  %v375_v63 = vmul.f32 %v6277_v16, %v6249_v11  ;;  %v377_v18 = vmul.f32 %v6277_v16, %v6260_v13  ;;  %v379_v39 = vmul.f32 %v6277_v16, %v6266_v15 }
  0x60   : > { %632 = vst.msk [vmem:[#allocation2 + $0x140] sm:$0xff] %vm438_vm0, %v5943_v0  ;;  %634 = vst.msk [vmem:[#allocation2 + $0x150] sm:$0xff] %vm438_vm0, %v5943_v0  ;;  %v6358_v41 = vld [vmem:[%s6105_s23 + $0xb8] sm:$0xff]  ;;  %v6361_v42 = vld [vmem:[%s6105_s23 + $0xc0] sm:$0xff]  ;;  %v443_v61 = vadd.f32 %v442_v55, %v441_v54 }
  0x61   : > { %635 = vst.msk [vmem:[#allocation2 + $0x158] sm:$0xff] %vm438_vm0, %v5943_v0  ;;  %637 = vst.msk [vmem:[#allocation2 + $0x168] sm:$0xff] %vm438_vm0, %v5943_v0  ;;  %v6364_v43 = vld [vmem:[%s6105_s23 + $0xc8] sm:$0xff]  ;;  %v6373_v44 = vld [vmem:[%s6105_s23 + $0xd0] sm:$0xff]  ;;  %v6462_v19 = vadd.f32 %v6282_v17, %v375_v63  ;;  %v6507_v63 = vadd.f32 %v6282_v17, %v379_v39 }
  0x62   : > { %638 = vst.msk [vmem:[#allocation2 + $0x170] sm:$0xff] %vm438_vm0, %v5943_v0  ;;  %640 = vst.msk [vmem:[#allocation2 + $0x180] sm:$0xff] %vm438_vm0, %v5943_v0  ;;  %v6376_v45 = vld [vmem:[%s6105_s23 + $0xd8] sm:$0xff]  ;;  %v6379_v46 = vld [vmem:[%s6105_s23 + $0xe0] sm:$0xff] }
  0x63   : > { %641 = vst.msk [vmem:[#allocation2 + $0x188] sm:$0xff] %vm438_vm0, %v5943_v0  ;;  %643 = vst.msk [vmem:[#allocation2 + $0x198] sm:$0xff] %vm438_vm0, %v5943_v0  ;;  %v6399_v52 = vld [vmem:[%s6105_s23 + $0xe8] sm:$0xff]  ;;  %v6402_v53 = vld [vmem:[%s6105_s23 + $0xf0] sm:$0xff]  ;;  %v454_v49 = vsel %vm438_vm0, %v6462_v19, 0.0 }
  0x64   : > { %644 = vst.msk [vmem:[#allocation2 + $0x1a0] sm:$0xff] %vm438_vm0, %v5943_v0  ;;  %647 = vst.msk [vmem:[#allocation2 + $0x19] sm:$0xff] %vm438_vm0, %v328_v3  ;;  %v6415_v56 = vld [vmem:[%s6105_s23 + $0xf8] sm:$0xff]  ;;  %v446_v3 = vsel %vm438_vm0, %v6390_v48, 0.0 }
  0x65   : > { %615 = vst.msk [vmem:[#allocation2 + $0xb8] sm:$0x3] %vm593_vm1, %v5943_v0  ;;  %594 = vst.msk [vmem:[#allocation2 + $0x10] sm:$0x3] %vm593_vm1, %v5943_v0 }
  0x66   : > { %597 = vst.msk [vmem:[#allocation2 + $0x28] sm:$0x3] %vm593_vm1, %v5943_v0  ;;  %600 = vst.msk [vmem:[#allocation2 + $0x40] sm:$0x3] %vm593_vm1, %v5943_v0 }
  0x67   : > { %603 = vst.msk [vmem:[#allocation2 + $0x58] sm:$0x3] %vm593_vm1, %v5943_v0  ;;  %606 = vst.msk [vmem:[#allocation2 + $0x70] sm:$0x3] %vm593_vm1, %v5943_v0 }
  0x68   : > { %609 = vst.msk [vmem:[#allocation2 + $0x88] sm:$0x3] %vm593_vm1, %v5943_v0  ;;  %612 = vst.msk [vmem:[#allocation2 + $0xa0] sm:$0x3] %vm593_vm1, %v5943_v0 }
  0x69   : > { %618 = vst.msk [vmem:[#allocation2 + $0xd0] sm:$0x3] %vm593_vm1, %v5943_v0  ;;  %621 = vst.msk [vmem:[#allocation2 + $0xe8] sm:$0x3] %vm593_vm1, %v5943_v0 }
  0x6a   : > { %624 = vst.msk [vmem:[#allocation2 + $0x100] sm:$0x3] %vm593_vm1, %v5943_v0  ;;  %627 = vst.msk [vmem:[#allocation2 + $0x118] sm:$0x3] %vm593_vm1, %v5943_v0 }
  0x6b   : > { %630 = vst.msk [vmem:[#allocation2 + $0x130] sm:$0x3] %vm593_vm1, %v5943_v0  ;;  %633 = vst.msk [vmem:[#allocation2 + $0x148] sm:$0x3] %vm593_vm1, %v5943_v0 }
  0x6c   : > { %636 = vst.msk [vmem:[#allocation2 + $0x160] sm:$0x3] %vm593_vm1, %v5943_v0  ;;  %639 = vst.msk [vmem:[#allocation2 + $0x178] sm:$0x3] %vm593_vm1, %v5943_v0 }
  0x6d   : > { %642 = vst.msk [vmem:[#allocation2 + $0x190] sm:$0x3] %vm593_vm1, %v5943_v0  ;;  %645 = vst.msk [vmem:[#allocation2 + $0x1a8] sm:$0x3] %vm593_vm1, %v5943_v0  ;;  %v6439_v0 = vadd.f32 %v6282_v17, %v373_v47  ;;  %v6484_v47 = vadd.f32 %v6282_v17, %v377_v18  ;;  %v382_v18 = vmul.f32 %v6277_v16, %v6306_v27 }
  0x6e   : > { %649 = vst.msk [vmem:[#allocation2 + $0x31] sm:$0xff] %vm438_vm0, %v330_v5  ;;  %648 = vst.msk [vmem:[#allocation2 + $0x21] sm:$0xff] %vm438_vm0, %v329_v4  ;;  %v445_v5 = vadd.f32 %v444_v59, %v443_v61  ;;  %v6501_v59 = vld [vmem:[#allocation7 + $0x48] sm:$0xff] }
  0x6f   : > { %650 = vst.msk [vmem:[#allocation2 + $0x39] sm:$0xff] %vm438_vm0, %v331_v6  ;;  %651 = vst.msk [vmem:[#allocation2 + $0x49] sm:$0xff] %vm438_vm0, %v332_v7  ;;  %v376_v7 = vmul.f32 %v6277_v16, %v6252_v12 }
  0x70   : > { %653 = vst.msk [vmem:[#allocation2 + $0x61] sm:$0xff] %vm438_vm0, %v6239_v9  ;;  %652 = vst.msk [vmem:[#allocation2 + $0x51] sm:$0xff] %vm438_vm0, %v333_v8  ;;  %v6453_v8 = vadd.f32 %v6282_v17, %v374_v57  ;;  %v448_v9 = vsel %vm438_vm0, %v6424_v58, 0.0  ;;  %v380_v57 = vmul.f32 %v6277_v16, %v6295_v23 }
  0x71   : > { %655 = vst.msk [vmem:[#allocation2 + $0x79] sm:$0xff] %vm438_vm0, %v6249_v11  ;;  %654 = vst.msk [vmem:[#allocation2 + $0x69] sm:$0xff] %vm438_vm0, %v6246_v10  ;;  %v447_v10 = vadd.f32 %v446_v3, %v445_v5  ;;  %v1423_v11 = vld [vmem:[#allocation7 + $0x20] sm:$0xff]  ;;  %v458_v3 = vsel %vm438_vm0, %v6484_v47, 0.0  ;;  %v381_v5 = vmul.f32 %v6277_v16, %v6303_v26 }
  0x72   : > { %656 = vst.msk [vmem:[#allocation2 + $0x81] sm:$0xff] %vm438_vm0, %v6252_v12  ;;  %659 = vst.msk [vmem:[#allocation2 + $0xa9] sm:$0xff] %vm438_vm0, %v6266_v15  ;;  %v450_v12 = vsel %vm438_vm0, %v6439_v0, 0.0  ;;  %v452_v25 = vsel %vm438_vm0, %v6453_v8, 0.0 }
  0x73   : > { %657 = vst.msk [vmem:[#allocation2 + $0x91] sm:$0xff] %vm438_vm0, %v6260_v13  ;;  %658 = vst.msk [vmem:[#allocation2 + $0x99] sm:$0xff] %vm438_vm0, %v6263_v14  ;;  %v449_v21 = vadd.f32 %v448_v9, %v447_v10  ;;  %v6475_v13 = vadd.f32 %v6282_v17, %v376_v7 }
  0x74   : > { %660 = vst.msk [vmem:[#allocation2 + $0xb1] sm:$0xff] %vm438_vm0, %v6295_v23  ;;  %661 = vst.msk [vmem:[#allocation2 + $0xc1] sm:$0xff] %vm438_vm0, %v6303_v26  ;;  %v462_v26 = vsel %vm438_vm0, %v6507_v63, 0.0 }
  0x75   : > { %662 = vst.msk [vmem:[#allocation2 + $0xc9] sm:$0xff] %vm438_vm0, %v6306_v27  ;;  %663 = vst.msk [vmem:[#allocation2 + $0xd9] sm:$0xff] %vm438_vm0, %v6309_v28  ;;  %v451_v29 = vadd.f32 %v450_v12, %v449_v21  ;;  %v456_v15 = vsel %vm438_vm0, %v6475_v13, 0.0  ;;  %v6531_v21 = vadd.f32 %v6282_v17, %v381_v5 }
  0x76   : > { %8569 = vst [vmem:[#allocation10_spill] sm:$0xff] %v6329_v33  ;;  %8570 = vst [vmem:[#allocation11_spill] sm:$0xff] %v6332_v34  ;;  %v2976_v33 = vld [vmem:[#allocation7 + $0x60] sm:$0xff] }
  0x77   : > { %8571 = vst [vmem:[#allocation12_spill] sm:$0xff] %v6335_v35  ;;  %664 = vst.msk [vmem:[#allocation2 + $0xe1] sm:$0xff] %vm438_vm0, %v6316_v30  ;;  %v453_v50 = vadd.f32 %v452_v25, %v451_v29  ;;  %v679_v34 = vld [vmem:[#allocation2] sm:$0xff] }
  0x78   : > { %665 = vst.msk [vmem:[#allocation2 + $0xf1] sm:$0xff] %vm438_vm0, %v6319_v31  ;;  %666 = vst.msk [vmem:[#allocation2 + $0xf9] sm:$0xff] %vm438_vm0, %v6322_v32 }
  0x79   : > { %8572 = vst [vmem:[#allocation13_spill] sm:$0xff] %v6354_v40  ;;  %667 = vst.msk [vmem:[#allocation2 + $0x109] sm:$0xff] %vm438_vm0, %v6338_v36  ;;  %v6396_v51 = vld [vmem:[#allocation2 + $0xa9] sm:$0xff]  ;;  %v455_v61 = vadd.f32 %v454_v49, %v453_v50  ;;  %v384_v49 = vmul.f32 %v6277_v16, %v6316_v30  ;;  %v6546_v50 = vadd.f32 %v6282_v17, %v382_v18 }
  0x7a   : > { %668 = vst.msk [vmem:[#allocation2 + $0x111] sm:$0xff] %vm438_vm0, %v6341_v37  ;;  %669 = vst.msk [vmem:[#allocation2 + $0x121] sm:$0xff] %vm438_vm0, %v6344_v38  ;;  %5175 = vmatprep.mubr.msk.f32.mxu1 %vm438_vm0, %v6396_v51  ;;  %v725_v35 = vld [vmem:[#allocation2 + $0x91] sm:$0xff]  ;;  %v726_v40 = vld [vmem:[#allocation2 + $0x99] sm:$0xff] }
  0x7b   : > { %670 = vst.msk [vmem:[#allocation2 + $0x129] sm:$0xff] %vm438_vm0, %v6358_v41  ;;  %671 = vst.msk [vmem:[#allocation2 + $0x139] sm:$0xff] %vm438_vm0, %v6361_v42  ;;  %v6428_v60 = vld [vmem:[#allocation2 + $0xb1] sm:$0xff]  ;;  %v6434_v62 = vld [vmem:[#allocation2 + $0xc1] sm:$0xff]  ;;  %v457_v7 = vadd.f32 %v456_v15, %v455_v61 }
  0x7c   : > { %672 = vst.msk [vmem:[#allocation2 + $0x141] sm:$0xff] %vm438_vm0, %v6364_v43  ;;  %8573 = vst [vmem:[#allocation14_spill] sm:$0xff] %v6390_v48  ;;  %5176 = vmatmul.mubr.msk.f32.vlgmr.msra.gmra.mxu1 %vm438_vm0, %v6428_v60  ;;  %v6446_v4 = vld [vmem:[#allocation2 + $0xc9] sm:$0xff]  ;;  %v6448_v6 = vld [vmem:[#allocation2 + $0xd9] sm:$0xff] }
  0x7d   : > { %674 = vst.msk [vmem:[#allocation2 + $0x159] sm:$0xff] %vm438_vm0, %v6376_v45  ;;  %675 = vst.msk [vmem:[#allocation2 + $0x169] sm:$0xff] %vm438_vm0, %v6379_v46  ;;  %5255 = vmatpush3.msra.mxu1 %v6297_v24  ;;  %5178 = vmatprep.mubr.msk.f32.mxu1 %vm438_vm0, %v6434_v62  ;;  %v378_v24 = vmul.f32 %v6277_v16, %v6263_v14  ;;  %v459_v12 = vadd.f32 %v458_v3, %v457_v7 }
  0x7e   : > { %673 = vst.msk [vmem:[#allocation2 + $0x151] sm:$0xff] %vm438_vm0, %v6373_v44  ;;  %676 = vst.msk [vmem:[#allocation2 + $0x171] sm:$0xff] %vm438_vm0, %v6399_v52  ;;  %v6468_v20 = vld [vmem:[#allocation2 + $0xe1] sm:$0xff]  ;;  %5256 = vmatprep.subr.mxu1 %v1423_v11  ;;  %v386_v7 = vmul.f32 %v6277_v16, %v6322_v32 }
  0x7f   : > { %677 = vst.msk [vmem:[#allocation2 + $0x181] sm:$0xff] %vm438_vm0, %v6402_v53  ;;  %8574 = vst [vmem:[#allocation15_spill] sm:$0xff] %v6424_v58  ;;  %v6470_v22 = vld [vmem:[#allocation2 + $0xf1] sm:$0xff]  ;;  %5257 = vmatpush3.msra.mxu1 %v1423_v11  ;;  %v6490_v14 = vld [vmem:[#allocation2 + $0xf9] sm:$0xff]  ;;  %v6495_v55 = vadd.f32 %v6282_v17, %v378_v24  ;;  %v6522_v11 = vadd.f32 %v6282_v17, %v380_v57  ;;  %v383_v24 = vmul.f32 %v6277_v16, %v6309_v28 }
  0x80   : > { %678 = vst.msk [vmem:[#allocation2 + $0x189] sm:$0xff] %vm438_vm0, %v6415_v56  ;;  %8575 = vst [vmem:[#allocation16_spill] sm:$0xff] %v6439_v0  ;;  %5179 = vmatmul.mubr.msk.f32.gmra.mxu1 %vm438_vm0, %v6446_v4  ;;  %v6492_v54 = vld [vmem:[#allocation2 + $0x109] sm:$0xff]  ;;  %5358 = vmatprep.subr.mxu1 %v6501_v59  ;;  %v466_v28 = vsel %vm438_vm0, %v6531_v21, 0.0  ;;  %v385_v57 = vmul.f32 %v6277_v16, %v6319_v31  ;;  %v468_v31 = vsel %vm438_vm0, %v6546_v50, 0.0  ;;  %v724_v58 = vld [vmem:[#allocation2 + $0x81] sm:$0xff] }
  0x81   : > { %8576 = vst [vmem:[#allocation17_spill] sm:$0xff] %v6453_v8  ;;  %8577 = vst [vmem:[#allocation18_spill] sm:$0xff] %v6462_v19  ;;  %5181 = vmatprep.mubr.msk.f32.mxu1 %vm438_vm0, %v6448_v6  ;;  %v6515_v23 = vld [vmem:[#allocation2 + $0x111] sm:$0xff]  ;;  %v6517_v9 = vld [vmem:[#allocation2 + $0x121] sm:$0xff]  ;;  %v460_v10 = vsel %vm438_vm0, %v6495_v55, 0.0  ;;  %v464_v39 = vsel %vm438_vm0, %v6522_v11, 0.0  ;;  %v6555_v61 = vadd.f32 %v6282_v17, %v383_v24 }
  0x82   : > { %8578 = vst [vmem:[#allocation19_spill] sm:$0xff] %v6475_v13  ;;  %8579 = vst [vmem:[#allocation20_spill] sm:$0xff] %v6484_v47  ;;  %v6537_v25 = vld [vmem:[#allocation2 + $0x129] sm:$0xff]  ;;  %v461_v29 = vadd.f32 %v460_v10, %v459_v12  ;;  %v6539_v27 = vld [vmem:[#allocation2 + $0x139] sm:$0xff]  ;;  %v6566_v10 = vadd.f32 %v6282_v17, %v384_v49  ;;  %v387_v12 = vmul.f32 %v6277_v16, %v6338_v36 }
  0x83   : > { %8580 = vst [vmem:[#allocation21_spill] sm:$0xff] %v6495_v55  ;;  %8581 = vst [vmem:[#allocation22_spill] sm:$0xff] %v6507_v63  ;;  %v6559_v30 = vld [vmem:[#allocation2 + $0x141] sm:$0xff]  ;;  %v470_v24 = vsel %vm438_vm0, %v6555_v61, 0.0  ;;  %v388_v49 = vmul.f32 %v6277_v16, %v6341_v37  ;;  %v719_v63 = vld [vmem:[#allocation2 + $0x49] sm:$0xff] }
  0x84   : > { %5182 = vmatmul.mubr.msk.f32.gmra.mxu1 %vm438_vm0, %v6468_v20  ;;  %8582 = vst [vmem:[#allocation23_spill] sm:$0xff] %v6522_v11  ;;  %8583 = vst [vmem:[#allocation24_spill] sm:$0xff] %v6531_v21  ;;  %v463_v15 = vadd.f32 %v462_v26, %v461_v29  ;;  %v6575_v26 = vadd.f32 %v6282_v17, %v385_v57  ;;  %v6581_v32 = vld [vmem:[#allocation2 + $0x159] sm:$0xff]  ;;  %v472_v36 = vsel %vm438_vm0, %v6566_v10, 0.0  ;;  %v720_v47 = vld [vmem:[#allocation2 + $0x51] sm:$0xff] }
  0x85   : > { %5184 = vmatprep.mubr.msk.f32.mxu1 %vm438_vm0, %v6470_v22  ;;  %8584 = vst [vmem:[#allocation25_spill] sm:$0xff] %v6546_v50  ;;  %8585 = vst [vmem:[#allocation26_spill] sm:$0xff] %v6555_v61  ;;  %v6561_v5 = vld [vmem:[#allocation2 + $0x151] sm:$0xff]  ;;  %v389_v57 = vmul.f32 %v6277_v16, %v6344_v38  ;;  %v721_v55 = vld [vmem:[#allocation2 + $0x61] sm:$0xff] }
  0x86   : > { %v465_v3 = vadd.f32 %v464_v39, %v463_v15  ;;  %8586 = vst [vmem:[#allocation27_spill] sm:$0xff] %v6566_v10  ;;  %8587 = vst [vmem:[#allocation28_spill] sm:$0xff] %v6575_v26  ;;  %v6583_v39 = vld [vmem:[#allocation2 + $0x169] sm:$0xff]  ;;  %v6588_v15 = vadd.f32 %v6282_v17, %v386_v7  ;;  %v6603_v37 = vld [vmem:[#allocation2 + $0x171] sm:$0xff] }
  0x87   : > { %v6617_v61 = vadd.f32 %v6282_v17, %v389_v57  ;;  %v2199_v57 = vld [vmem:[#allocation7 + $0x40] sm:$0xff]  ;;  %v1812_v21 = vld [vmem:[#allocation7 + $0x38] sm:$0xff]  ;;  %v6815_v13 = vld [vmem:[#allocation2 + $0x16a] sm:$0xff] }
  0x88   : > { %5185 = vmatmul.mubr.msk.f32.gmra.mxu1 %vm438_vm0, %v6490_v14  ;;  %v467_v18 = vadd.f32 %v466_v28, %v465_v3  ;;  %8588 = vst [vmem:[#allocation29_spill] sm:$0xff] %v6588_v15  ;;  %v6597_v3 = vadd.f32 %v6282_v17, %v387_v12  ;;  %v476_v38 = vsel %vm438_vm0, %v6588_v15, 0.0  ;;  %v711_v10 = vld [vmem:[#allocation7] sm:$0xff]  ;;  %v6785_v50 = vld [vmem:[#allocation2 + $0x31] sm:$0xff]  ;;  %8601 = vst [vmem:[#allocation42_spill] sm:$0xff] %v6815_v13 }
  0x89   : > { %5187 = vmatprep.mubr.msk.f32.mxu1 %vm438_vm0, %v6492_v54  ;;  %8591 = vst [vmem:[#allocation32_spill] sm:$0xff] %v6617_v61  ;;  %v6805_v11 = vld [vmem:[#allocation2 + $0x152] sm:$0xff]  ;;  %v6812_v19 = vld [vmem:[#allocation2 + $0x15a] sm:$0xff]  ;;  %v722_v0 = vld [vmem:[#allocation2 + $0x69] sm:$0xff] }
  0x8a   : > { %v469_v29 = vadd.f32 %v468_v31, %v467_v18  ;;  %8589 = vst [vmem:[#allocation30_spill] sm:$0xff] %v6597_v3  ;;  %v474_v31 = vsel %vm438_vm0, %v6575_v26, 0.0  ;;  %v1390_v18 = vld [vmem:[#allocation2 + $0x2] sm:$0xff]  ;;  %v391_v26 = vmul.f32 %v6277_v16, %v6361_v42  ;;  %v723_v8 = vld [vmem:[#allocation2 + $0x79] sm:$0xff] }
  0x8b   : > { %v6822_v48 = vld [vmem:[#allocation2 + $0x172] sm:$0xff] }
  0x8c   : > { %5188 = vmatmul.mubr.msk.f32.gmra.mxu1 %vm438_vm0, %v6515_v23  ;;  %v471_v28 = vadd.f32 %v470_v24, %v469_v29  ;;  %v390_v24 = vmul.f32 %v6277_v16, %v6358_v41  ;;  %v6608_v29 = vadd.f32 %v6282_v17, %v388_v49  ;;  %v1391_v41 = vld [vmem:[#allocation2 + $0xa] sm:$0xff]  ;;  %8602 = vst [vmem:[#allocation43_spill] sm:$0xff] %v6822_v48 }
  0x8d   : > { %5190 = vmatprep.mubr.msk.f32.mxu1 %vm438_vm0, %v6517_v9 }
  0x8e   : > { %v473_v7 = vadd.f32 %v472_v36, %v471_v28  ;;  %8590 = vst [vmem:[#allocation31_spill] sm:$0xff] %v6608_v29  ;;  %v478_v36 = vsel %vm438_vm0, %v6597_v3, 0.0  ;;  %v6622_v28 = vld [vmem:[#allocation2 + $0x1a] sm:$0xff]  ;;  %v480_v42 = vsel %vm438_vm0, %v6608_v29, 0.0 }
  0x8f   : > { %v713_v29 = vld [vmem:[#allocation2 + $0x1] sm:$0xff] }
  0x90   : > { %5191 = vmatmul.mubr.msk.f32.gmra.mxu1 %vm438_vm0, %v6537_v25  ;;  %v475_v12 = vadd.f32 %v474_v31, %v473_v7  ;;  %v392_v31 = vmul.f32 %v6277_v16, %v6364_v43  ;;  %v6627_v7 = vadd.f32 %v6282_v17, %v390_v24  ;;  %v6642_v43 = vld [vmem:[#allocation2 + $0x22] sm:$0xff] }
  0x91   : > { %5193 = vmatprep.mubr.msk.f32.mxu1 %vm438_vm0, %v6539_v27 }
  0x92   : > { %v477_v49 = vadd.f32 %v476_v38, %v475_v12  ;;  %8592 = vst [vmem:[#allocation33_spill] sm:$0xff] %v6627_v7  ;;  %v6635_v38 = vadd.f32 %v6282_v17, %v391_v26  ;;  %v482_v12 = vsel %vm438_vm0, %v6617_v61, 0.0  ;;  %v6649_v26 = vadd.f32 %v6282_v17, %v392_v31  ;;  %v6664_v31 = vld [vmem:[#allocation2 + $0x3a] sm:$0xff] }
  0x94   : > { %5194 = vmatmul.mubr.msk.f32.gmra.mxu1 %vm438_vm0, %v6559_v30  ;;  %v479_v15 = vadd.f32 %v478_v36, %v477_v49  ;;  %8593 = vst [vmem:[#allocation34_spill] sm:$0xff] %v6635_v38  ;;  %v6644_v36 = vld [vmem:[#allocation2 + $0x32] sm:$0xff]  ;;  %8594 = vst [vmem:[#allocation35_spill] sm:$0xff] %v6649_v26 }
  0x95   : > { %5196 = vmatprep.mubr.msk.f32.mxu1 %vm438_vm0, %v6561_v5 }
  0x96   : > { %v481_v24 = vadd.f32 %v480_v42, %v479_v15  ;;  %v395_v15 = vmul.f32 %v6277_v16, %v6379_v46  ;;  %v488_v46 = vsel %vm438_vm0, %v6649_v26, 0.0  ;;  %v398_v26 = vmul.f32 %v6277_v16, %v6415_v56 }
  0x98   : > { %5197 = vmatmul.mubr.msk.f32.gmra.mxu1 %vm438_vm0, %v6581_v32 }
  0x99   : > { %5199 = vmatprep.mubr.msk.f32.mxu1 %vm438_vm0, %v6583_v39 }
  0x9c   : > { %5200 = vmatmul.mubr.msk.f32.gmra.mxu1 %vm438_vm0, %v6603_v37 }
  0x9d   : > { %5258 = vmatprep.mubr.msk.f32.mxu1 %vm438_vm0, %v1390_v18  ;;  %v393_v18 = vmul.f32 %v6277_v16, %v6373_v44  ;;  %v394_v44 = vmul.f32 %v6277_v16, %v6376_v45  ;;  %v486_v45 = vsel %vm438_vm0, %v6635_v38, 0.0 }
  0x9f   : > { %v6658_v49 = vadd.f32 %v6282_v17, %v393_v18  ;;  %v6675_v18 = vld [vmem:[#allocation7 + $0x68] sm:$0xff] }
  0xa0   : > { %5259 = vmatmul.mubr.msk.f32.vlgmr.msra.gmra.mxu1 %vm438_vm0, %v1391_v41  ;;  %v484_v41 = vsel %vm438_vm0, %v6627_v7, 0.0  ;;  %v6760_v7 = vld [vmem:[#allocation2 + $0xf2] sm:$0xff] }
  0xa1   : > { %5359 = vmatpush3.msra.mxu1 %v6501_v59  ;;  %5261 = vmatprep.mubr.msk.f32.mxu1 %vm438_vm0, %v6622_v28  ;;  %v483_v59 = vadd.f32 %v482_v12, %v481_v24  ;;  %8595 = vst [vmem:[#allocation36_spill] sm:$0xff] %v6658_v49  ;;  %v396_v12 = vmul.f32 %v6277_v16, %v6399_v52  ;;  %v490_v52 = vsel %vm438_vm0, %v6658_v49, 0.0 }
  0xa2   : > { %5360 = vmatprep.subr.mxu1 %v2199_v57  ;;  %v6671_v24 = vadd.f32 %v6282_v17, %v394_v44  ;;  %v6689_v44 = vld [vmem:[#allocation2 + $0x52] sm:$0xff] }
  0xa3   : > { %5361 = vmatpush3.msra.mxu1 %v2199_v57  ;;  %v485_v42 = vadd.f32 %v484_v41, %v483_v59  ;;  %v6666_v57 = vld [vmem:[#allocation2 + $0x4a] sm:$0xff]  ;;  %v397_v41 = vmul.f32 %v6277_v16, %v6402_v53  ;;  %v6683_v59 = vadd.f32 %v6282_v17, %v395_v15  ;;  %v6696_v61 = vadd.f32 %v6282_v17, %v396_v12  ;;  %v6711_v12 = vld [vmem:[#allocation2 + $0x7a] sm:$0xff] }
  0xa4   : > { %5262 = vmatmul.mubr.msk.f32.gmra.mxu1 %vm438_vm0, %v6642_v43  ;;  %8596 = vst [vmem:[#allocation37_spill] sm:$0xff] %v6671_v24  ;;  %5462 = vmatprep.subr.mxu1 %v6675_v18  ;;  %v492_v53 = vsel %vm438_vm0, %v6671_v24, 0.0  ;;  %v6709_v16 = vld [vmem:[#allocation2 + $0x6a] sm:$0xff] }
  0xa5   : > { %5264 = vmatprep.mubr.msk.f32.mxu1 %vm438_vm0, %v6644_v36  ;;  %v487_v38 = vadd.f32 %v486_v45, %v485_v42  ;;  %8597 = vst [vmem:[#allocation38_spill] sm:$0xff] %v6683_v59  ;;  %v6691_v42 = vld [vmem:[#allocation2 + $0x62] sm:$0xff]  ;;  %8598 = vst [vmem:[#allocation39_spill] sm:$0xff] %v6696_v61  ;;  %v6703_v49 = vadd.f32 %v6282_v17, %v397_v41 }
  0xa7   : > { %v489_v45 = vadd.f32 %v488_v46, %v487_v38  ;;  %8599 = vst [vmem:[#allocation40_spill] sm:$0xff] %v6703_v49  ;;  %v494_v38 = vsel %vm438_vm0, %v6683_v59, 0.0  ;;  %v6714_v46 = vadd.f32 %v6282_v17, %v398_v26  ;;  %v498_v41 = vsel %vm438_vm0, %v6703_v49, 0.0  ;;  %v6724_v59 = vld [vmem:[#allocation2 + $0x82] sm:$0xff]  ;;  %v6736_v49 = vld [vmem:[#allocation2 + $0xaa] sm:$0xff] }
  0xa8   : > { %5265 = vmatmul.mubr.msk.f32.gmra.mxu1 %vm438_vm0, %v6664_v31 }
  0xa9   : > { %5267 = vmatprep.mubr.msk.f32.mxu1 %vm438_vm0, %v6666_v57  ;;  %v491_v15 = vadd.f32 %v490_v52, %v489_v45  ;;  %8600 = vst [vmem:[#allocation41_spill] sm:$0xff] %v6714_v46  ;;  %v496_v52 = vsel %vm438_vm0, %v6696_v61, 0.0  ;;  %v500_v17 = vsel %vm438_vm0, %v6714_v46, 0.0  ;;  %v6752_v46 = vld [vmem:[#allocation2 + $0xda] sm:$0xff] }
  0xab   : > { %v493_v56 = vadd.f32 %v492_v53, %v491_v15  ;;  %v6726_v15 = vld [vmem:[#allocation2 + $0x92] sm:$0xff] }
  0xac   : > { %5268 = vmatmul.mubr.msk.f32.gmra.mxu1 %vm438_vm0, %v6689_v44 }
  0xad   : > { %5270 = vmatprep.mubr.msk.f32.mxu1 %vm438_vm0, %v6691_v42  ;;  %v495_v45 = vadd.f32 %v494_v38, %v493_v56  ;;  %v6734_v38 = vld [vmem:[#allocation2 + $0x9a] sm:$0xff] }
  0xaf   : > { %v497_v53 = vadd.f32 %v496_v52, %v495_v45  ;;  %v6742_v52 = vld [vmem:[#allocation2 + $0xb2] sm:$0xff] }
  0xb0   : > { %5271 = vmatmul.mubr.msk.f32.gmra.mxu1 %vm438_vm0, %v6709_v16 }
  0xb1   : > { %5273 = vmatprep.mubr.msk.f32.mxu1 %vm438_vm0, %v6711_v12  ;;  %v499_v26 = vadd.f32 %v498_v41, %v497_v53  ;;  %v6744_v41 = vld [vmem:[#allocation2 + $0xc2] sm:$0xff] }
  0xb3   : > { %v501_v56 = vadd.f32 %v500_v17, %v499_v26  ;;  %v6750_v17 = vld [vmem:[#allocation2 + $0xca] sm:$0xff] }
  0xb4   : > { %5274 = vmatmul.mubr.msk.f32.gmra.mxu1 %vm438_vm0, %v6724_v59 }
  0xb5   : > { %5276 = vmatprep.mubr.msk.f32.mxu1 %vm438_vm0, %v6726_v15  ;;  %v502_v61 = vrot.slane %v501_v56, 4 }
  0xb7   : > { %v503_v45 = vadd.f32 %v502_v61, %v501_v56  ;;  %v6758_v61 = vld [vmem:[#allocation2 + $0xe2] sm:$0xff] }
  0xb8   : > { %5277 = vmatmul.mubr.msk.f32.gmra.mxu1 %vm438_vm0, %v6734_v38 }
  0xb9   : > { %5279 = vmatprep.mubr.msk.f32.mxu1 %vm438_vm0, %v6736_v49  ;;  %v504_v53 = vrot.slane %v503_v45, 2 }
  0xbb   : > { %v505_v26 = vadd.f32 %v504_v53, %v503_v45  ;;  %v6766_v45 = vld [vmem:[#allocation2 + $0xfa] sm:$0xff]  ;;  %v6769_v53 = vld [vmem:[#allocation2 + $0x10a] sm:$0xff] }
  0xbc   : > { %5280 = vmatmul.mubr.msk.f32.gmra.mxu1 %vm438_vm0, %v6742_v52 }
  0xbd   : > { %5282 = vmatprep.mubr.msk.f32.mxu1 %vm438_vm0, %v6744_v41  ;;  %v506_v24 = vrot.slane %v505_v26, 1 }
  0xbf   : > { %v507_v56 = vadd.f32 %v506_v24, %v505_v26  ;;  %v712_v24 = vld [vmem:[#allocation7 + $0x8] sm:$0xff] }
  0xc0   : > { %5283 = vmatmul.mubr.msk.f32.gmra.mxu1 %vm438_vm0, %v6750_v17  ;;  %v714_v26 = vld [vmem:[#allocation2 + $0x9] sm:$0xff] }
  0xc1   : > { %5285 = vmatprep.mubr.msk.f32.mxu1 %vm438_vm0, %v6752_v46  ;;  %v509_v3 = vmul.f32 0.00390625, %v507_v56  ;;  %v715_v56 = vld [vmem:[#allocation2 + $0x19] sm:$0xff] }
  0xc3   : > { %5148 = vmatmul.mubr.msk.f32.vlgmr.msra.gmra.mxu0 %vm438_vm0, %v509_v3  ;;  %v6779_v3 = vld [vmem:[#allocation2 + $0x112] sm:$0xff] }
  0xc4   : > { %5286 = vmatmul.mubr.msk.f32.gmra.mxu1 %vm438_vm0, %v6758_v61  ;;  %5151 = vmatpush3.msra.mxu0 %v6225_v1  ;;  %v6782_v1 = vld [vmem:[#allocation2 + $0x122] sm:$0xff] }
  0xc5   : > { %5288 = vmatprep.mubr.msk.f32.mxu1 %vm438_vm0, %v6760_v7  ;;  %5154 = vmatprep.mubr.msk.f32.mxu0 %vm438_vm0, %v713_v29  ;;  %v716_v29 = vld [vmem:[#allocation2 + $0x21] sm:$0xff] }
  0xc6   : > { %5152 = vmatprep.subr.mxu0 %v6227_v2 }
  0xc7   : > { %5153 = vmatpush3.msra.mxu0 %v6227_v2  ;;  %v6791_v2 = vld [vmem:[#allocation2 + $0x12a] sm:$0xff] }
  0xc8   : > { %5289 = vmatmul.mubr.msk.f32.gmra.mxu1 %vm438_vm0, %v6766_v45  ;;  %5202 = vmatprep.subr.mxu0 %v712_v24 }
  0xc9   : > { %5291 = vmatprep.mubr.msk.f32.mxu1 %vm438_vm0, %v6769_v53  ;;  %5155 = vmatmul.mubr.msk.f32.vlgmr.msra.gmra.mxu0 %vm438_vm0, %v714_v26  ;;  %v718_v26 = vld [vmem:[#allocation2 + $0x39] sm:$0xff] }
  0xca   : > { %5203 = vmatpush3.msra.mxu0 %v712_v24  ;;  %5157 = vmatprep.mubr.msk.f32.mxu0 %vm438_vm0, %v715_v56  ;;  %v6794_v24 = vld [vmem:[#allocation2 + $0x13a] sm:$0xff] }
  0xcb   : > { %5204 = vmatprep.subr.mxu0 %v711_v10 }
  0xcc   : > { %5292 = vmatmul.mubr.msk.f32.gmra.mxu1 %vm438_vm0, %v6779_v3  ;;  %5205 = vmatpush3.msra.mxu0 %v711_v10  ;;  %v6802_v10 = vld [vmem:[#allocation2 + $0x142] sm:$0xff] }
  0xcd   : > { %5294 = vmatprep.mubr.msk.f32.mxu1 %vm438_vm0, %v6782_v1  ;;  %5158 = vmatmul.mubr.msk.f32.gmra.mxu0 %vm438_vm0, %v716_v29 }
  0xce   : > { %5306 = vmatprep.subr.mxu0 %v1812_v21  ;;  %5160 = vmatprep.mubr.msk.f32.mxu0 %vm438_vm0, %v6785_v50 }
  0xd0   : > { %5295 = vmatmul.mubr.msk.f32.gmra.mxu1 %vm438_vm0, %v6791_v2 }
  0xd1   : > { %5297 = vmatprep.mubr.msk.f32.mxu1 %vm438_vm0, %v6794_v24  ;;  %5161 = vmatmul.mubr.msk.f32.gmra.mxu0 %vm438_vm0, %v718_v26 }
  0xd2   : > { %5163 = vmatprep.mubr.msk.f32.mxu0 %vm438_vm0, %v719_v63 }
  0xd4   : > { %5298 = vmatmul.mubr.msk.f32.gmra.mxu1 %vm438_vm0, %v6802_v10 }
  0xd5   : > { %5300 = vmatprep.mubr.msk.f32.mxu1 %vm438_vm0, %v6805_v11  ;;  %5164 = vmatmul.mubr.msk.f32.gmra.mxu0 %vm438_vm0, %v720_v47 }
  0xd6   : > { %5166 = vmatprep.mubr.msk.f32.mxu0 %vm438_vm0, %v721_v55 }
  0xd8   : > { %5301 = vmatmul.mubr.msk.f32.gmra.mxu1 %vm438_vm0, %v6812_v19 }
  0xd9   : > { %5303 = vmatprep.mubr.msk.f32.mxu1 %vm438_vm0, %v6815_v13  ;;  %5167 = vmatmul.mubr.msk.f32.gmra.mxu0 %vm438_vm0, %v722_v0  ;;  %v1811_v13 = vld [vmem:[#allocation7 + $0x30] sm:$0xff] }
  0xda   : > { %5169 = vmatprep.mubr.msk.f32.mxu0 %vm438_vm0, %v723_v8 }
  0xdc   : > { %5304 = vmatmul.mubr.msk.f32.gmra.mxu1 %vm438_vm0, %v6822_v48  ;;  %v6837_v48 = vld [vmem:[#allocation2 + $0x18] sm:$0xff] }
  0xdd   : > { %5362 = vmatprep.mubr.msk.f32.mxu1 %vm438_vm0, %v715_v56  ;;  %5170 = vmatmul.mubr.msk.f32.gmra.mxu0 %vm438_vm0, %v724_v58  ;;  %v680_v56 = vld [vmem:[#allocation2 + $0x8] sm:$0xff] }
  0xde   : > { %5172 = vmatprep.mubr.msk.f32.mxu0 %vm438_vm0, %v725_v35 }
  0xe0   : > { %5363 = vmatmul.mubr.msk.f32.vlgmr.msra.gmra.mxu1 %vm438_vm0, %v716_v29  ;;  %v6846_v29 = vld [vmem:[#allocation7 + $0x58] sm:$0xff] }
  0xe1   : > { %5463 = vmatpush3.msra.mxu1 %v6675_v18  ;;  %5365 = vmatprep.mubr.msk.f32.mxu1 %vm438_vm0, %v6785_v50  ;;  %v6844_v18 = vld [vmem:[#allocation2 + $0x20] sm:$0xff] }
  0xe2   : > { %5173 = vmatmul.mubr.msk.f32.gmra.mxu0 %vm438_vm0, %v726_v40  ;;  %5464 = vmatprep.subr.mxu1 %v2976_v33 }
  0xe3   : > { %5206 = vmatprep.mubr.msk.f32.mxu0 %vm438_vm0, %v679_v34  ;;  %5465 = vmatpush3.msra.mxu1 %v2976_v33  ;;  %v6848_v34 = vld [vmem:[#allocation2 + $0x30] sm:$0xff]  ;;  %v6851_v33 = vld [vmem:[#allocation7 + $0x88] sm:$0xff] }
  0xe4   : > { %5366 = vmatmul.mubr.msk.f32.gmra.mxu1 %vm438_vm0, %v718_v26  ;;  %5566 = vmatprep.subr.mxu1 %v6851_v33  ;;  %v7005_v26 = vld [vmem:[#allocation2 + $0x168] sm:$0xff] }
  0xe5   : > { %5368 = vmatprep.mubr.msk.f32.mxu1 %vm438_vm0, %v719_v63  ;;  %v6859_v63 = vld [vmem:[#allocation2 + $0x38] sm:$0xff] }
  0xe6   : > { %5207 = vmatmul.mubr.msk.f32.vlgmr.msra.gmra.mxu0 %vm438_vm0, %v680_v56  ;;  %v3752_v56 = vld [vmem:[#allocation7 + $0x80] sm:$0xff] }
  0xe7   : > { %5307 = vmatpush3.msra.mxu0 %v1812_v21  ;;  %5209 = vmatprep.mubr.msk.f32.mxu0 %vm438_vm0, %v6837_v48  ;;  %v6862_v21 = vld [vmem:[#allocation2 + $0x48] sm:$0xff] }
  0xe8   : > { %5308 = vmatprep.subr.mxu0 %v1811_v13  ;;  %5369 = vmatmul.mubr.msk.f32.gmra.mxu1 %vm438_vm0, %v720_v47  ;;  %v6872_v47 = vld [vmem:[#allocation2 + $0x60] sm:$0xff] }
  0xe9   : > { %5309 = vmatpush3.msra.mxu0 %v1811_v13  ;;  %5371 = vmatprep.mubr.msk.f32.mxu1 %vm438_vm0, %v721_v55  ;;  %v6870_v13 = vld [vmem:[#allocation2 + $0x50] sm:$0xff] }
  0xea   : > { %5210 = vmatmul.mubr.msk.f32.gmra.mxu0 %vm438_vm0, %v6844_v18  ;;  %5410 = vmatprep.subr.mxu0 %v6846_v29  ;;  %v6963_v55 = vld [vmem:[#allocation2 + $0x110] sm:$0xff] }
  0xeb   : > { %5212 = vmatprep.mubr.msk.f32.mxu0 %vm438_vm0, %v6848_v34 }
  0xec   : > { %5372 = vmatmul.mubr.msk.f32.gmra.mxu1 %vm438_vm0, %v722_v0  ;;  %v6880_v0 = vld [vmem:[#allocation2 + $0x68] sm:$0xff] }
  0xed   : > { %5374 = vmatprep.mubr.msk.f32.mxu1 %vm438_vm0, %v723_v8  ;;  %v6882_v8 = vld [vmem:[#allocation2 + $0x78] sm:$0xff] }
  0xee   : > { %5213 = vmatmul.mubr.msk.f32.gmra.mxu0 %vm438_vm0, %v6859_v63 }
  0xef   : > { %5215 = vmatprep.mubr.msk.f32.mxu0 %vm438_vm0, %v6862_v21 }
  0xf0   : > { %5375 = vmatmul.mubr.msk.f32.gmra.mxu1 %vm438_vm0, %v724_v58  ;;  %v6893_v58 = vld [vmem:[#allocation2 + $0x90] sm:$0xff] }
  0xf1   : > { %5377 = vmatprep.mubr.msk.f32.mxu1 %vm438_vm0, %v725_v35  ;;  %v6891_v35 = vld [vmem:[#allocation2 + $0x80] sm:$0xff] }
  0xf2   : > { %5216 = vmatmul.mubr.msk.f32.gmra.mxu0 %vm438_vm0, %v6870_v13 }
  0xf3   : > { %5218 = vmatprep.mubr.msk.f32.mxu0 %vm438_vm0, %v6872_v47 }
  0xf4   : > { %5378 = vmatmul.mubr.msk.f32.gmra.mxu1 %vm438_vm0, %v726_v40  ;;  %v6903_v40 = vld [vmem:[#allocation2 + $0x98] sm:$0xff] }
  0xf5   : > { %5380 = vmatprep.mubr.msk.f32.mxu1 %vm438_vm0, %v6396_v51  ;;  %v6905_v51 = vld [vmem:[#allocation2 + $0xa8] sm:$0xff] }
  0xf6   : > { %5219 = vmatmul.mubr.msk.f32.gmra.mxu0 %vm438_vm0, %v6880_v0 }
  0xf7   : > { %5221 = vmatprep.mubr.msk.f32.mxu0 %vm438_vm0, %v6882_v8 }
  0xf8   : > { %5381 = vmatmul.mubr.msk.f32.gmra.mxu1 %vm438_vm0, %v6428_v60  ;;  %v6915_v60 = vld [vmem:[#allocation2 + $0xb0] sm:$0xff] }
  0xf9   : > { %5383 = vmatprep.mubr.msk.f32.mxu1 %vm438_vm0, %v6434_v62  ;;  %v6917_v62 = vld [vmem:[#allocation2 + $0xc0] sm:$0xff] }
  0xfa   : > { %5222 = vmatmul.mubr.msk.f32.gmra.mxu0 %vm438_vm0, %v6891_v35 }
  0xfb   : > { %5224 = vmatprep.mubr.msk.f32.mxu0 %vm438_vm0, %v6893_v58 }
  0xfc   : > { %5384 = vmatmul.mubr.msk.f32.gmra.mxu1 %vm438_vm0, %v6446_v4  ;;  %v6927_v4 = vld [vmem:[#allocation2 + $0xc8] sm:$0xff] }
  0xfd   : > { %5386 = vmatprep.mubr.msk.f32.mxu1 %vm438_vm0, %v6448_v6  ;;  %v6929_v6 = vld [vmem:[#allocation2 + $0xd8] sm:$0xff] }
  0xfe   : > { %5225 = vmatmul.mubr.msk.f32.gmra.mxu0 %vm438_vm0, %v6903_v40 }
  0xff   : > { %5227 = vmatprep.mubr.msk.f32.mxu0 %vm438_vm0, %v6905_v51 }
 0x100   : > { %5387 = vmatmul.mubr.msk.f32.gmra.mxu1 %vm438_vm0, %v6468_v20  ;;  %v6939_v20 = vld [vmem:[#allocation2 + $0xe0] sm:$0xff] }
 0x101   : > { %5389 = vmatprep.mubr.msk.f32.mxu1 %vm438_vm0, %v6470_v22  ;;  %v6941_v22 = vld [vmem:[#allocation2 + $0xf0] sm:$0xff] }
 0x102   : > { %5228 = vmatmul.mubr.msk.f32.gmra.mxu0 %vm438_vm0, %v6915_v60 }
 0x103   : > { %5230 = vmatprep.mubr.msk.f32.mxu0 %vm438_vm0, %v6917_v62 }
 0x104   : > { %5390 = vmatmul.mubr.msk.f32.gmra.mxu1 %vm438_vm0, %v6490_v14  ;;  %v6951_v14 = vld [vmem:[#allocation2 + $0xf8] sm:$0xff] }
 0x105   : > { %5392 = vmatprep.mubr.msk.f32.mxu1 %vm438_vm0, %v6492_v54  ;;  %v6953_v54 = vld [vmem:[#allocation2 + $0x108] sm:$0xff] }
 0x106   : > { %5231 = vmatmul.mubr.msk.f32.gmra.mxu0 %vm438_vm0, %v6927_v4 }
 0x107   : > { %5233 = vmatprep.mubr.msk.f32.mxu0 %vm438_vm0, %v6929_v6 }
 0x108   : > { %5393 = vmatmul.mubr.msk.f32.gmra.mxu1 %vm438_vm0, %v6515_v23  ;;  %v6965_v23 = vld [vmem:[#allocation2 + $0x120] sm:$0xff] }
 0x109   : > { %5395 = vmatprep.mubr.msk.f32.mxu1 %vm438_vm0, %v6517_v9  ;;  %v6975_v9 = vld [vmem:[#allocation2 + $0x128] sm:$0xff] }
 0x10a   : > { %5234 = vmatmul.mubr.msk.f32.gmra.mxu0 %vm438_vm0, %v6939_v20 }
 0x10b   : > { %5236 = vmatprep.mubr.msk.f32.mxu0 %vm438_vm0, %v6941_v22 }
 0x10c   : > { %5396 = vmatmul.mubr.msk.f32.gmra.mxu1 %vm438_vm0, %v6537_v25  ;;  %v6977_v25 = vld [vmem:[#allocation2 + $0x138] sm:$0xff] }
 0x10d   : > { %5398 = vmatprep.mubr.msk.f32.mxu1 %vm438_vm0, %v6539_v27  ;;  %v6985_v27 = vld [vmem:[#allocation2 + $0x181] sm:$0xff] }
 0x10e   : > { %5237 = vmatmul.mubr.msk.f32.gmra.mxu0 %vm438_vm0, %v6951_v14 }
 0x10f   : > { %5239 = vmatprep.mubr.msk.f32.mxu0 %vm438_vm0, %v6953_v54 }
 0x110   : > { %5399 = vmatmul.mubr.msk.f32.gmra.mxu1 %vm438_vm0, %v6559_v30  ;;  %v6989_v30 = vld [vmem:[#allocation2 + $0x140] sm:$0xff] }
 0x111   : > { %5401 = vmatprep.mubr.msk.f32.mxu1 %vm438_vm0, %v6561_v5  ;;  %v6991_v5 = vld [vmem:[#allocation2 + $0x150] sm:$0xff] }
 0x112   : > { %5240 = vmatmul.mubr.msk.f32.gmra.mxu0 %vm438_vm0, %v6963_v55 }
 0x113   : > { %5242 = vmatprep.mubr.msk.f32.mxu0 %vm438_vm0, %v6965_v23 }
 0x114   : > { %5402 = vmatmul.mubr.msk.f32.gmra.mxu1 %vm438_vm0, %v6581_v32  ;;  %v6997_v32 = vld [vmem:[#allocation2 + $0x189] sm:$0xff] }
 0x115   : > { %5404 = vmatprep.mubr.msk.f32.mxu1 %vm438_vm0, %v6583_v39  ;;  %8603 = vst [vmem:[#allocation44_spill] sm:$0xff] %v6997_v32  ;;  %v7003_v39 = vld [vmem:[#allocation2 + $0x158] sm:$0xff] }
 0x116   : > { %5243 = vmatmul.mubr.msk.f32.gmra.mxu0 %vm438_vm0, %v6975_v9 }
 0x117   : > { %5245 = vmatprep.mubr.msk.f32.mxu0 %vm438_vm0, %v6977_v25 }
 0x118   : > { %5405 = vmatmul.mubr.msk.f32.gmra.mxu1 %vm438_vm0, %v6603_v37  ;;  %v7015_v37 = vld [vmem:[#allocation2 + $0x170] sm:$0xff] }
 0x119   : > { %5407 = vmatprep.mubr.msk.f32.mxu1 %vm438_vm0, %v6985_v27 }
 0x11a   : > { %5246 = vmatmul.mubr.msk.f32.gmra.mxu0 %vm438_vm0, %v6989_v30 }
 0x11b   : > { %5248 = vmatprep.mubr.msk.f32.mxu0 %vm438_vm0, %v6991_v5 }
 0x11c   : > { %5408 = vmatmul.mubr.msk.f32.gmra.mxu1 %vm438_vm0, %v6997_v32  ;;  %v2587_v32 = vld [vmem:[#allocation7 + $0x50] sm:$0xff] }
 0x11d   : > { %5466 = vmatprep.mubr.msk.f32.mxu1 %vm438_vm0, %v6848_v34 }
 0x11e   : > { %5249 = vmatmul.mubr.msk.f32.gmra.mxu0 %vm438_vm0, %v7003_v39 }
 0x11f   : > { %5251 = vmatprep.mubr.msk.f32.mxu0 %vm438_vm0, %v7005_v26 }
 0x120   : > { %5467 = vmatmul.mubr.msk.f32.vlgmr.msra.gmra.mxu1 %vm438_vm0, %v6859_v63 }
 0x121   : > { %5567 = vmatpush3.msra.mxu1 %v6851_v33  ;;  %5469 = vmatprep.mubr.msk.f32.mxu1 %vm438_vm0, %v6862_v21  ;;  %v7035_v33 = vld [vmem:[#allocation7 + $0x78] sm:$0xff] }
 0x122   : > { %5252 = vmatmul.mubr.msk.f32.gmra.mxu0 %vm438_vm0, %v7015_v37  ;;  %5568 = vmatprep.subr.mxu1 %v3752_v56 }
 0x123   : > { %5310 = vmatprep.mubr.msk.f32.mxu0 %vm438_vm0, %v6837_v48  ;;  %5569 = vmatpush3.msra.mxu1 %v3752_v56 }
 0x124   : > { %5470 = vmatmul.mubr.msk.f32.gmra.mxu1 %vm438_vm0, %v6870_v13 }
 0x125   : > { %5472 = vmatprep.mubr.msk.f32.mxu1 %vm438_vm0, %v6872_v47 }
 0x126   : > { %5311 = vmatmul.mubr.msk.f32.vlgmr.msra.gmra.mxu0 %vm438_vm0, %v6844_v18 }
 0x127   : > { %5411 = vmatpush3.msra.mxu0 %v6846_v29  ;;  %5313 = vmatprep.mubr.msk.f32.mxu0 %vm438_vm0, %v6848_v34 }
 0x128   : > { %5412 = vmatprep.subr.mxu0 %v2587_v32  ;;  %5473 = vmatmul.mubr.msk.f32.gmra.mxu1 %vm438_vm0, %v6880_v0 }
 0x129   : > { %5413 = vmatpush3.msra.mxu0 %v2587_v32  ;;  %5475 = vmatprep.mubr.msk.f32.mxu1 %vm438_vm0, %v6882_v8 }
 0x12a   : > { %5314 = vmatmul.mubr.msk.f32.gmra.mxu0 %vm438_vm0, %v6859_v63  ;;  %5514 = vmatprep.subr.mxu0 %v7035_v33 }
 0x12b   : > { %5316 = vmatprep.mubr.msk.f32.mxu0 %vm438_vm0, %v6862_v21 }
 0x12c   : > { %5476 = vmatmul.mubr.msk.f32.gmra.mxu1 %vm438_vm0, %v6891_v35 }
 0x12d   : > { %5478 = vmatprep.mubr.msk.f32.mxu1 %vm438_vm0, %v6893_v58 }
 0x12e   : > { %5317 = vmatmul.mubr.msk.f32.gmra.mxu0 %vm438_vm0, %v6870_v13 }
 0x12f   : > { %5319 = vmatprep.mubr.msk.f32.mxu0 %vm438_vm0, %v6872_v47 }
 0x130   : > { %5479 = vmatmul.mubr.msk.f32.gmra.mxu1 %vm438_vm0, %v6903_v40 }
 0x131   : > { %5481 = vmatprep.mubr.msk.f32.mxu1 %vm438_vm0, %v6905_v51 }
 0x132   : > { %5320 = vmatmul.mubr.msk.f32.gmra.mxu0 %vm438_vm0, %v6880_v0 }
 0x133   : > { %5322 = vmatprep.mubr.msk.f32.mxu0 %vm438_vm0, %v6882_v8 }
 0x134   : > { %5482 = vmatmul.mubr.msk.f32.gmra.mxu1 %vm438_vm0, %v6915_v60 }
 0x135   : > { %5484 = vmatprep.mubr.msk.f32.mxu1 %vm438_vm0, %v6917_v62 }
 0x136   : > { %5323 = vmatmul.mubr.msk.f32.gmra.mxu0 %vm438_vm0, %v6891_v35 }
 0x137   : > { %5325 = vmatprep.mubr.msk.f32.mxu0 %vm438_vm0, %v6893_v58 }
 0x138   : > { %5485 = vmatmul.mubr.msk.f32.gmra.mxu1 %vm438_vm0, %v6927_v4 }
 0x139   : > { %5487 = vmatprep.mubr.msk.f32.mxu1 %vm438_vm0, %v6929_v6 }
 0x13a   : > { %5326 = vmatmul.mubr.msk.f32.gmra.mxu0 %vm438_vm0, %v6903_v40  ;;  %v1808_v40 = vld [vmem:[#allocation2 + $0x180] sm:$0xff] }
 0x13b   : > { %5328 = vmatprep.mubr.msk.f32.mxu0 %vm438_vm0, %v6905_v51 }
 0x13c   : > { %v7078_v48 = vpop.f32.mrf.mxu1  ;;  %5488 = vmatmul.mubr.msk.f32.gmra.mxu1 %vm438_vm0, %v6939_v20 }
 0x13d   : > { %5490 = vmatprep.mubr.msk.f32.mxu1 %vm438_vm0, %v6941_v22 }
 0x13e   : > { %5329 = vmatmul.mubr.msk.f32.gmra.mxu0 %vm438_vm0, %v6915_v60  ;;  %v7086_v18 = vpop.f32.mrf.mxu1 }
 0x13f   : > { %5331 = vmatprep.mubr.msk.f32.mxu0 %vm438_vm0, %v6917_v62  ;;  %v2973_v62 = vld [vmem:[#allocation2 + $0x198] sm:$0xff] }
 0x140   : > { %v7090_v29 = vpop.f32.mrf.mxu1  ;;  %5491 = vmatmul.mubr.msk.f32.gmra.mxu1 %vm438_vm0, %v6951_v14 }
 0x141   : > { %5493 = vmatprep.mubr.msk.f32.mxu1 %vm438_vm0, %v6953_v54 }
 0x142   : > { %5332 = vmatmul.mubr.msk.f32.gmra.mxu0 %vm438_vm0, %v6927_v4  ;;  %v7098_v34 = vpop.f32.mrf.mxu1  ;;  %v1809_v4 = vld [vmem:[#allocation2 + $0x188] sm:$0xff] }
 0x143   : > { %5334 = vmatprep.mubr.msk.f32.mxu0 %vm438_vm0, %v6929_v6 }
 0x144   : > { %v7102_v63 = vpop.f32.mrf.mxu1  ;;  %5494 = vmatmul.mubr.msk.f32.gmra.mxu1 %vm438_vm0, %v6963_v55 }
 0x145   : > { %5496 = vmatprep.mubr.msk.f32.mxu1 %vm438_vm0, %v6965_v23 }
 0x146   : > { %5335 = vmatmul.mubr.msk.f32.gmra.mxu0 %vm438_vm0, %v6939_v20  ;;  %v7110_v21 = vpop.f32.mrf.mxu1  ;;  %v2974_v20 = vld [vmem:[#allocation2 + $0x1a0] sm:$0xff] }
 0x147   : > { %5337 = vmatprep.mubr.msk.f32.mxu0 %vm438_vm0, %v6941_v22 }
 0x148   : > { %v7114_v13 = vpop.f32.mrf.mxu1  ;;  %5497 = vmatmul.mubr.msk.f32.gmra.mxu1 %vm438_vm0, %v6975_v9 }
 0x149   : > { %5499 = vmatprep.mubr.msk.f32.mxu1 %vm438_vm0, %v6977_v25 }
 0x14a   : > { %5338 = vmatmul.mubr.msk.f32.gmra.mxu0 %vm438_vm0, %v6951_v14  ;;  %v7122_v47 = vpop.f32.mrf.mxu1 }
 0x14b   : > { %5340 = vmatprep.mubr.msk.f32.mxu0 %vm438_vm0, %v6953_v54 }
 0x14c   : > { %v7126_v0 = vpop.f32.mrf.mxu1  ;;  %5500 = vmatmul.mubr.msk.f32.gmra.mxu1 %vm438_vm0, %v6989_v30 }
 0x14d   : > { %5502 = vmatprep.mubr.msk.f32.mxu1 %vm438_vm0, %v6991_v5 }
 0x14e   : > { %5341 = vmatmul.mubr.msk.f32.gmra.mxu0 %vm438_vm0, %v6963_v55  ;;  %v7134_v8 = vpop.f32.mrf.mxu1 }
 0x14f   : > { %8604 = vst [vmem:[#allocation45_spill] sm:$0xff] %v7134_v8  ;;  %5343 = vmatprep.mubr.msk.f32.mxu0 %vm438_vm0, %v6965_v23 }
 0x150   : > { %v7138_v35 = vpop.f32.mrf.mxu1  ;;  %5503 = vmatmul.mubr.msk.f32.gmra.mxu1 %vm438_vm0, %v7003_v39 }
 0x151   : > { %8605 = vst [vmem:[#allocation46_spill] sm:$0xff] %v7138_v35  ;;  %5505 = vmatprep.mubr.msk.f32.mxu1 %vm438_vm0, %v7005_v26 }
 0x152   : > { %5344 = vmatmul.mubr.msk.f32.gmra.mxu0 %vm438_vm0, %v6975_v9  ;;  %v7146_v58 = vpop.f32.mrf.mxu1 }
 0x153   : > { %8606 = vst [vmem:[#allocation47_spill] sm:$0xff] %v7146_v58  ;;  %5346 = vmatprep.mubr.msk.f32.mxu0 %vm438_vm0, %v6977_v25  ;;  %v3364_v25 = vld [vmem:[#allocation7 + $0x70] sm:$0xff] }
 0x154   : > { %v7150_v51 = vpop.f32.mrf.mxu1  ;;  %5506 = vmatmul.mubr.msk.f32.gmra.mxu1 %vm438_vm0, %v7015_v37 }
 0x155   : > { %8607 = vst [vmem:[#allocation48_spill] sm:$0xff] %v7150_v51  ;;  %5508 = vmatprep.mubr.msk.f32.mxu1 %vm438_vm0, %v1808_v40 }
 0x156   : > { %5347 = vmatmul.mubr.msk.f32.gmra.mxu0 %vm438_vm0, %v6989_v30  ;;  %v7157_v60 = vpop.f32.mrf.mxu1 }
 0x157   : > { %8608 = vst [vmem:[#allocation49_spill] sm:$0xff] %v7157_v60  ;;  %5349 = vmatprep.mubr.msk.f32.mxu0 %vm438_vm0, %v6991_v5  ;;  %v3335_v60 = vld [vmem:[#allocation2 + $0x61] sm:$0xff] }
 0x158   : > { %v7161_v6 = vpop.f32.mrf.mxu1  ;;  %5509 = vmatmul.mubr.msk.f32.gmra.mxu1 %vm438_vm0, %v1809_v4 }
 0x159   : > { %8609 = vst [vmem:[#allocation50_spill] sm:$0xff] %v7161_v6  ;;  %5511 = vmatprep.mubr.msk.f32.mxu1 %vm438_vm0, %v2973_v62  ;;  %v3743_v62 = vld [vmem:[#allocation2 + $0x152] sm:$0xff] }
 0x15a   : > { %5350 = vmatmul.mubr.msk.f32.gmra.mxu0 %vm438_vm0, %v7003_v39  ;;  %v7167_v22 = vpop.f32.mrf.mxu1 }
 0x15b   : > { %8610 = vst [vmem:[#allocation51_spill] sm:$0xff] %v7167_v22  ;;  %5352 = vmatprep.mubr.msk.f32.mxu0 %vm438_vm0, %v7005_v26 }
 0x15c   : > { %v7171_v14 = vpop.f32.mrf.mxu1  ;;  %5512 = vmatmul.mubr.msk.f32.gmra.mxu1 %vm438_vm0, %v2974_v20  ;;  %v3744_v20 = vld [vmem:[#allocation2 + $0x15a] sm:$0xff] }
 0x15d   : > { %8611 = vst [vmem:[#allocation52_spill] sm:$0xff] %v7171_v14  ;;  %5570 = vmatprep.mubr.msk.f32.mxu1 %vm438_vm0, %v6644_v36  ;;  %v8623_v14 = vld [vmem:[#allocation42_spill] sm:$0xff] }
 0x15e   : > { %5353 = vmatmul.mubr.msk.f32.gmra.mxu0 %vm438_vm0, %v7015_v37  ;;  %v7178_v54 = vpop.f32.mrf.mxu1 }
 0x15f   : > { %8612 = vst [vmem:[#allocation53_spill] sm:$0xff] %v7178_v54  ;;  %5355 = vmatprep.mubr.msk.f32.mxu0 %vm438_vm0, %v1808_v40 }
 0x160   : > { %v7181_v55 = vpop.f32.mrf.mxu1  ;;  %5571 = vmatmul.mubr.msk.f32.vlgmr.msra.gmra.mxu1 %vm438_vm0, %v6664_v31 }
 0x161   : > { %5573 = vmatprep.mubr.msk.f32.mxu1 %vm438_vm0, %v6666_v57 }
 0x162   : > { %5356 = vmatmul.mubr.msk.f32.gmra.mxu0 %vm438_vm0, %v1809_v4  ;;  %v7188_v23 = vpop.f32.mrf.mxu1 }
 0x163   : > { %5414 = vmatprep.mubr.msk.f32.mxu0 %vm438_vm0, %v6622_v28 }
 0x164   : > { %v7192_v9 = vpop.f32.mrf.mxu1  ;;  %5574 = vmatmul.mubr.msk.f32.gmra.mxu1 %vm438_vm0, %v6689_v44 }
 0x165   : > { %5576 = vmatprep.mubr.msk.f32.mxu1 %vm438_vm0, %v6691_v42 }
 0x166   : > { %5415 = vmatmul.mubr.msk.f32.vlgmr.msra.gmra.mxu0 %vm438_vm0, %v6642_v43  ;;  %v7200_v30 = vpop.f32.mrf.mxu1 }
 0x167   : > { %5515 = vmatpush3.msra.mxu0 %v7035_v33  ;;  %5417 = vmatprep.mubr.msk.f32.mxu0 %vm438_vm0, %v6644_v36  ;;  %v3742_v33 = vld [vmem:[#allocation2 + $0x142] sm:$0xff] }
 0x168   : > { %5516 = vmatprep.subr.mxu0 %v3364_v25  ;;  %v7205_v28 = vpop.f32.mrf.mxu1  ;;  %5577 = vmatmul.mubr.msk.f32.gmra.mxu1 %vm438_vm0, %v6709_v16 }
 0x169   : > { %5517 = vmatpush3.msra.mxu0 %v3364_v25  ;;  %5579 = vmatprep.mubr.msk.f32.mxu1 %vm438_vm0, %v6711_v12 }
 0x16a   : > { %5418 = vmatmul.mubr.msk.f32.gmra.mxu0 %vm438_vm0, %v6664_v31  ;;  %v7213_v43 = vpop.f32.mrf.mxu1 }
 0x16b   : > { %5420 = vmatprep.mubr.msk.f32.mxu0 %vm438_vm0, %v6666_v57 }
 0x16c   : > { %v7217_v5 = vpop.f32.mrf.mxu1  ;;  %5580 = vmatmul.mubr.msk.f32.gmra.mxu1 %vm438_vm0, %v6724_v59 }
 0x16d   : > { %5582 = vmatprep.mubr.msk.f32.mxu1 %vm438_vm0, %v6726_v15 }
 0x16e   : > { %5421 = vmatmul.mubr.msk.f32.gmra.mxu0 %vm438_vm0, %v6689_v44  ;;  %v7225_v36 = vpop.f32.mrf.mxu1 }
 0x16f   : > { %5423 = vmatprep.mubr.msk.f32.mxu0 %vm438_vm0, %v6691_v42 }
 0x170   : > { %v7229_v31 = vpop.f32.mrf.mxu1  ;;  %5583 = vmatmul.mubr.msk.f32.gmra.mxu1 %vm438_vm0, %v6734_v38 }
 0x171   : > { %5585 = vmatprep.mubr.msk.f32.mxu1 %vm438_vm0, %v6736_v49 }
 0x172   : > { %5424 = vmatmul.mubr.msk.f32.gmra.mxu0 %vm438_vm0, %v6709_v16  ;;  %v7237_v57 = vpop.f32.mrf.mxu1 }
 0x173   : > { %5426 = vmatprep.mubr.msk.f32.mxu0 %vm438_vm0, %v6711_v12 }
 0x174   : > { %v7241_v44 = vpop.f32.mrf.mxu1  ;;  %5586 = vmatmul.mubr.msk.f32.gmra.mxu1 %vm438_vm0, %v6742_v52 }
 0x175   : > { %5588 = vmatprep.mubr.msk.f32.mxu1 %vm438_vm0, %v6744_v41 }
 0x176   : > { %5427 = vmatmul.mubr.msk.f32.gmra.mxu0 %vm438_vm0, %v6724_v59  ;;  %v7249_v42 = vpop.f32.mrf.mxu1 }
 0x177   : > { %5429 = vmatprep.mubr.msk.f32.mxu0 %vm438_vm0, %v6726_v15 }
 0x178   : > { %v7253_v16 = vpop.f32.mrf.mxu1  ;;  %5589 = vmatmul.mubr.msk.f32.gmra.mxu1 %vm438_vm0, %v6750_v17 }
 0x179   : > { %5591 = vmatprep.mubr.msk.f32.mxu1 %vm438_vm0, %v6752_v46 }
 0x17a   : > { %5430 = vmatmul.mubr.msk.f32.gmra.mxu0 %vm438_vm0, %v6734_v38  ;;  %v7261_v12 = vpop.f32.mrf.mxu1 }
 0x17b   : > { %5432 = vmatprep.mubr.msk.f32.mxu0 %vm438_vm0, %v6736_v49  ;;  %v3738_v49 = vld [vmem:[#allocation2 + $0x112] sm:$0xff] }
 0x17c   : > { %v7265_v59 = vpop.f32.mrf.mxu1  ;;  %5592 = vmatmul.mubr.msk.f32.gmra.mxu1 %vm438_vm0, %v6758_v61 }
 0x17d   : > { %5594 = vmatprep.mubr.msk.f32.mxu1 %vm438_vm0, %v6760_v7 }
 0x17e   : > { %5433 = vmatmul.mubr.msk.f32.gmra.mxu0 %vm438_vm0, %v6742_v52  ;;  %v7273_v15 = vpop.f32.mrf.mxu1  ;;  %v3739_v52 = vld [vmem:[#allocation2 + $0x122] sm:$0xff] }
 0x17f   : > { %5435 = vmatprep.mubr.msk.f32.mxu0 %vm438_vm0, %v6744_v41  ;;  %v3740_v41 = vld [vmem:[#allocation2 + $0x12a] sm:$0xff] }
 0x180   : > { %v7277_v38 = vpop.f32.mrf.mxu1  ;;  %5595 = vmatmul.mubr.msk.f32.gmra.mxu1 %vm438_vm0, %v6766_v45 }
 0x181   : > { %5597 = vmatprep.mubr.msk.f32.mxu1 %vm438_vm0, %v6769_v53 }
 0x182   : > { %5436 = vmatmul.mubr.msk.f32.gmra.mxu0 %vm438_vm0, %v6750_v17  ;;  %v7285_v32 = vpop.f32.mrf.mxu1  ;;  %v3741_v17 = vld [vmem:[#allocation2 + $0x13a] sm:$0xff] }
 0x183   : > { %5438 = vmatprep.mubr.msk.f32.mxu0 %vm438_vm0, %v6752_v46  ;;  %v7293_v26 = vpop.f32.mrf.mxu0 }
 0x184   : > { %v7289_v39 = vpop.f32.mrf.mxu1  ;;  %5598 = vmatmul.mubr.msk.f32.gmra.mxu1 %vm438_vm0, %v3738_v49  ;;  %8613 = vst [vmem:[#allocation54_spill] sm:$0xff] %v7293_v26  ;;  %v3745_v49 = vld [vmem:[#allocation2 + $0x16a] sm:$0xff] }
 0x185   : > { %5600 = vmatprep.mubr.msk.f32.mxu1 %vm438_vm0, %v3739_v52  ;;  %v5149_v56 = vpop.f32.mrf.mxu0 }
 0x186   : > { %5439 = vmatmul.mubr.msk.f32.gmra.mxu0 %vm438_vm0, %v6758_v61  ;;  %v7297_v37 = vpop.f32.mrf.mxu1  ;;  %v2584_v56 = vld [vmem:[#allocation2 + $0x182] sm:$0xff] }
 0x187   : > { %5441 = vmatprep.mubr.msk.f32.mxu0 %vm438_vm0, %v6760_v7 }
 0x188   : > { %v7301_v46 = vpop.f32.mrf.mxu1  ;;  %5601 = vmatmul.mubr.msk.f32.gmra.mxu1 %vm438_vm0, %v3740_v41  ;;  %v3746_v41 = vld [vmem:[#allocation2 + $0x172] sm:$0xff] }
 0x189   : > { %5603 = vmatprep.mubr.msk.f32.mxu1 %vm438_vm0, %v3741_v17  ;;  %v7305_v40 = vpop.f32.mrf.mxu0 }
 0x18a   : > { %5442 = vmatmul.mubr.msk.f32.gmra.mxu0 %vm438_vm0, %v6766_v45  ;;  %v7309_v61 = vpop.f32.mrf.mxu1 }
 0x18b   : > { %8614 = vst [vmem:[#allocation55_spill] sm:$0xff] %v7309_v61  ;;  %5444 = vmatprep.mubr.msk.f32.mxu0 %vm438_vm0, %v6769_v53  ;;  %v7313_v7 = vpop.f32.mrf.mxu0 }
 0x18c   : > { %v7315_v4 = vpop.f32.mrf.mxu1  ;;  %5604 = vmatmul.mubr.msk.f32.gmra.mxu1 %vm438_vm0, %v3742_v33 }
 0x18d   : > { %8615 = vst [vmem:[#allocation56_spill] sm:$0xff] %v7315_v4  ;;  %5606 = vmatprep.mubr.msk.f32.mxu1 %vm438_vm0, %v3743_v62  ;;  %v7319_v25 = vpop.f32.mrf.mxu0 }
 0x18e   : > { %5445 = vmatmul.mubr.msk.f32.gmra.mxu0 %vm438_vm0, %v6779_v3  ;;  %v7323_v45 = vpop.f32.mrf.mxu1 }
 0x18f   : > { %8616 = vst [vmem:[#allocation57_spill] sm:$0xff] %v7323_v45  ;;  %5447 = vmatprep.mubr.msk.f32.mxu0 %vm438_vm0, %v6782_v1  ;;  %v7327_v53 = vpop.f32.mrf.mxu0 }
 0x190   : > { %v7329_v52 = vpop.f32.mrf.mxu1  ;;  %5607 = vmatmul.mubr.msk.f32.gmra.mxu1 %vm438_vm0, %v3744_v20  ;;  %v3749_v20 = vld [vmem:[#allocation2 + $0x19a] sm:$0xff] }
 0x191   : > { %8617 = vst [vmem:[#allocation58_spill] sm:$0xff] %v7329_v52  ;;  %5609 = vmatprep.mubr.msk.f32.mxu1 %vm438_vm0, %v3745_v49  ;;  %v7333_v17 = vpop.f32.mrf.mxu0 }
 0x192   : > { %5448 = vmatmul.mubr.msk.f32.gmra.mxu0 %vm438_vm0, %v6791_v2  ;;  %v7337_v3 = vpop.f32.mrf.mxu1 }
 0x193   : > { %8618 = vst [vmem:[#allocation59_spill] sm:$0xff] %v7337_v3  ;;  %5450 = vmatprep.mubr.msk.f32.mxu0 %vm438_vm0, %v6794_v24  ;;  %v7341_v1 = vpop.f32.mrf.mxu0  ;;  %v2585_v24 = vld [vmem:[#allocation2 + $0x18a] sm:$0xff] }
 0x194   : > { %v7343_v33 = vpop.f32.mrf.mxu1  ;;  %5610 = vmatmul.mubr.msk.f32.gmra.mxu1 %vm438_vm0, %v3746_v41  ;;  %v3750_v41 = vld [vmem:[#allocation2 + $0x1a2] sm:$0xff] }
 0x195   : > { %8619 = vst [vmem:[#allocation60_spill] sm:$0xff] %v7343_v33  ;;  %5612 = vmatprep.mubr.msk.f32.mxu1 %vm438_vm0, %v2584_v56  ;;  %v7347_v62 = vpop.f32.mrf.mxu0 }
 0x196   : > { %5451 = vmatmul.mubr.msk.f32.gmra.mxu0 %vm438_vm0, %v6802_v10  ;;  %v7351_v2 = vpop.f32.mrf.mxu1 }
 0x197   : > { %8620 = vst [vmem:[#allocation61_spill] sm:$0xff] %v7351_v2  ;;  %5453 = vmatprep.mubr.msk.f32.mxu0 %vm438_vm0, %v6805_v11  ;;  %v7355_v49 = vpop.f32.mrf.mxu0 }
 0x198   : > { %v7357_v26 = vpop.f32.mrf.mxu1  ;;  %5613 = vmatmul.mubr.msk.f32.gmra.mxu1 %vm438_vm0, %v2585_v24 }
 0x199   : > { %8621 = vst [vmem:[#allocation62_spill] sm:$0xff] %v7357_v26  ;;  %5615 = vmatprep.mubr.msk.f32.mxu1 %vm438_vm0, %v3749_v20  ;;  %v7361_v54 = vpop.f32.mrf.mxu0  ;;  %v8625_v20 = vld [vmem:[#allocation43_spill] sm:$0xff] }
 0x19a   : > { %5454 = vmatmul.mubr.msk.f32.gmra.mxu0 %vm438_vm0, %v6812_v19  ;;  %v7365_v10 = vpop.f32.mrf.mxu1 }
 0x19b   : > { %8622 = vst [vmem:[#allocation63_spill] sm:$0xff] %v7365_v10  ;;  %5456 = vmatprep.mubr.msk.f32.mxu0 %vm438_vm0, %v8623_v14  ;;  %v7369_v11 = vpop.f32.mrf.mxu0 }
 0x19c   : > { %v7371_v22 = vpop.f32.mrf.mxu1  ;;  %5616 = vmatmul.mubr.msk.f32.gmra.mxu1 %vm438_vm0, %v3750_v41  ;;  %v3332_v41 = vld [vmem:[#allocation2 + $0x39] sm:$0xff] }
 0x19d   : > { %8624 = vst [vmem:[#allocation42_spill] sm:$0xff] %v7371_v22  ;;  %v7374_v26 = vpop.f32.mrf.mxu0 }
 0x19e   : > { %5457 = vmatmul.mubr.msk.f32.gmra.mxu0 %vm438_vm0, %v8625_v20  ;;  %v7378_v2 = vpop.f32.mrf.mxu1  ;;  %v3333_v20 = vld [vmem:[#allocation2 + $0x49] sm:$0xff] }
 0x19f   : > { %8626 = vst [vmem:[#allocation43_spill] sm:$0xff] %v7378_v2  ;;  %5459 = vmatprep.mubr.msk.f32.mxu0 %vm438_vm0, %v2584_v56  ;;  %v7381_v19 = vpop.f32.mrf.mxu0 }
 0x1a0   : > { %v7383_v10 = vpop.f32.mrf.mxu1 }
 0x1a1   : > { %8627 = vst [vmem:[#allocation64_spill] sm:$0xff] %v7383_v10 }
 0x1a2   : > { %v7385_v14 = vpop.f32.mrf.mxu0  ;;  %5460 = vmatmul.mubr.msk.f32.gmra.mxu0 %vm438_vm0, %v2585_v24  ;;  %v7388_v22 = vpop.f32.mrf.mxu1  ;;  %v3334_v24 = vld [vmem:[#allocation2 + $0x51] sm:$0xff] }
 0x1a3   : > { %8628 = vst [vmem:[#allocation65_spill] sm:$0xff] %v7388_v22  ;;  %5518 = vmatprep.mubr.msk.f32.mxu0 %vm438_vm0, %v6785_v50 }
 0x1a4   : > { %v7392_v6 = vpop.f32.mrf.mxu0  ;;  %v7394_v2 = vpop.f32.mrf.mxu1 }
 0x1a5   : > { %8629 = vst [vmem:[#allocation66_spill] sm:$0xff] %v7394_v2 }
 0x1a6   : > { %v5208_v56 = vpop.f32.mrf.mxu0  ;;  %5519 = vmatmul.mubr.msk.f32.vlgmr.msra.gmra.mxu0 %vm438_vm0, %v3332_v41  ;;  %v7397_v33 = vpop.f32.mrf.mxu1 }
 0x1a7   : > { %8630 = vst [vmem:[#allocation67_spill] sm:$0xff] %v7397_v33  ;;  %v7400_v10 = vadd.f32 %v5208_v56, %v7305_v40  ;;  %5521 = vmatprep.mubr.msk.f32.mxu0 %vm438_vm0, %v3333_v20  ;;  %v3336_v40 = vld [vmem:[#allocation2 + $0x69] sm:$0xff]  ;;  %v3337_v56 = vld [vmem:[#allocation2 + $0x79] sm:$0xff] }
 0x1a8   : > { %v1231_v22 = vpop.f32.mrf.mxu0  ;;  %v7403_v50 = vpop.f32.mrf.mxu1 }
 0x1a9   : > { %8631 = vst [vmem:[#allocation68_spill] sm:$0xff] %v7403_v50  ;;  %v7406_v3 = vadd.f32 %v1231_v22, %v7313_v7 }
 0x1aa   : > { %v5211_v51 = vpop.f32.mrf.mxu0  ;;  %5522 = vmatmul.mubr.msk.f32.gmra.mxu0 %vm438_vm0, %v3334_v24  ;;  %v7409_v2 = vpop.f32.mrf.mxu1 }
 0x1ab   : > { %8632 = vst [vmem:[#allocation69_spill] sm:$0xff] %v7409_v2  ;;  %v7412_v41 = vadd.f32 %v5211_v51, %v7319_v25  ;;  %5524 = vmatprep.mubr.msk.f32.mxu0 %vm438_vm0, %v3335_v60  ;;  %v3338_v51 = vld [vmem:[#allocation2 + $0x81] sm:$0xff]  ;;  %v3339_v25 = vld [vmem:[#allocation2 + $0x91] sm:$0xff] }
 0x1ac   : > { %v1241_v20 = vpop.f32.mrf.mxu0  ;;  %v7415_v33 = vpop.f32.mrf.mxu1 }
 0x1ad   : > { %8633 = vst [vmem:[#allocation70_spill] sm:$0xff] %v7415_v33  ;;  %v7418_v50 = vadd.f32 %v1241_v20, %v7327_v53 }
 0x1ae   : > { %v5214_v22 = vpop.f32.mrf.mxu0  ;;  %5525 = vmatmul.mubr.msk.f32.gmra.mxu0 %vm438_vm0, %v3336_v40  ;;  %v7421_v7 = vpop.f32.mrf.mxu1 }
 0x1af   : > { %8634 = vst [vmem:[#allocation71_spill] sm:$0xff] %v7421_v7  ;;  %v7424_v24 = vadd.f32 %v5214_v22, %v7333_v17  ;;  %5527 = vmatprep.mubr.msk.f32.mxu0 %vm438_vm0, %v3337_v56  ;;  %v3340_v17 = vld [vmem:[#allocation2 + $0x99] sm:$0xff]  ;;  %v3341_v22 = vld [vmem:[#allocation2 + $0xa9] sm:$0xff] }
 0x1b0   : > { %v1251_v60 = vpop.f32.mrf.mxu0  ;;  %v7427_v2 = vpop.f32.mrf.mxu1 }
 0x1b1   : > { %8635 = vst [vmem:[#allocation72_spill] sm:$0xff] %v7427_v2  ;;  %v7430_v33 = vadd.f32 %v1251_v60, %v7341_v1 }
 0x1b2   : > { %v5217_v53 = vpop.f32.mrf.mxu0  ;;  %5528 = vmatmul.mubr.msk.f32.gmra.mxu0 %vm438_vm0, %v3338_v51  ;;  %v7433_v20 = vpop.f32.mrf.mxu1 }
 0x1b3   : > { %8636 = vst [vmem:[#allocation73_spill] sm:$0xff] %v7433_v20  ;;  %v7436_v40 = vadd.f32 %v5217_v53, %v7347_v62  ;;  %5530 = vmatprep.mubr.msk.f32.mxu0 %vm438_vm0, %v3339_v25  ;;  %v3342_v62 = vld [vmem:[#allocation2 + $0xb1] sm:$0xff]  ;;  %v3343_v53 = vld [vmem:[#allocation2 + $0xc1] sm:$0xff] }
 0x1b4   : > { %v1261_v56 = vpop.f32.mrf.mxu0  ;;  %v7439_v7 = vpop.f32.mrf.mxu1 }
 0x1b5   : > { %8637 = vst [vmem:[#allocation74_spill] sm:$0xff] %v7439_v7  ;;  %v7442_v2 = vadd.f32 %v1261_v56, %v7355_v49 }
 0x1b6   : > { %v5220_v1 = vpop.f32.mrf.mxu0  ;;  %5531 = vmatmul.mubr.msk.f32.gmra.mxu0 %vm438_vm0, %v3340_v17  ;;  %v7445_v60 = vpop.f32.mrf.mxu1 }
 0x1b7   : > { %8638 = vst [vmem:[#allocation75_spill] sm:$0xff] %v7445_v60  ;;  %v7448_v51 = vadd.f32 %v5220_v1, %v7361_v54  ;;  %5533 = vmatprep.mubr.msk.f32.mxu0 %vm438_vm0, %v3341_v22  ;;  %v3344_v54 = vld [vmem:[#allocation2 + $0xc9] sm:$0xff]  ;;  %v3345_v1 = vld [vmem:[#allocation2 + $0xd9] sm:$0xff] }
 0x1b8   : > { %v1271_v25 = vpop.f32.mrf.mxu0  ;;  %v7451_v20 = vpop.f32.mrf.mxu1 }
 0x1b9   : > { %8639 = vst [vmem:[#allocation76_spill] sm:$0xff] %v7451_v20  ;;  %v7454_v7 = vadd.f32 %v1271_v25, %v7369_v11 }
 0x1ba   : > { %v5223_v49 = vpop.f32.mrf.mxu0  ;;  %5534 = vmatmul.mubr.msk.f32.gmra.mxu0 %vm438_vm0, %v3342_v62  ;;  %v7457_v56 = vpop.f32.mrf.mxu1 }
 0x1bb   : > { %8640 = vst [vmem:[#allocation77_spill] sm:$0xff] %v7457_v56  ;;  %v7460_v17 = vadd.f32 %v5223_v49, %v7374_v26  ;;  %5536 = vmatprep.mubr.msk.f32.mxu0 %vm438_vm0, %v3343_v53  ;;  %v3346_v26 = vld [vmem:[#allocation2 + $0xe1] sm:$0xff]  ;;  %v3347_v49 = vld [vmem:[#allocation2 + $0xf1] sm:$0xff] }
 0x1bc   : > { %v1281_v22 = vpop.f32.mrf.mxu0  ;;  %v7463_v60 = vpop.f32.mrf.mxu1 }
 0x1bd   : > { %8641 = vst [vmem:[#allocation78_spill] sm:$0xff] %v7463_v60  ;;  %v7466_v20 = vadd.f32 %v1281_v22, %v7381_v19 }
 0x1be   : > { %v5226_v11 = vpop.f32.mrf.mxu0  ;;  %5537 = vmatmul.mubr.msk.f32.gmra.mxu0 %vm438_vm0, %v3344_v54  ;;  %v7469_v25 = vpop.f32.mrf.mxu1 }
 0x1bf   : > { %8642 = vst [vmem:[#allocation79_spill] sm:$0xff] %v7469_v25  ;;  %v7472_v62 = vadd.f32 %v5226_v11, %v7385_v14  ;;  %5539 = vmatprep.mubr.msk.f32.mxu0 %vm438_vm0, %v3345_v1  ;;  %v3348_v14 = vld [vmem:[#allocation2 + $0xf9] sm:$0xff]  ;;  %v3349_v1 = vld [vmem:[#allocation2 + $0x109] sm:$0xff] }
 0x1c0   : > { %v1291_v53 = vpop.f32.mrf.mxu0  ;;  %v7475_v56 = vpop.f32.mrf.mxu1 }
 0x1c1   : > { %8643 = vst [vmem:[#allocation80_spill] sm:$0xff] %v7475_v56  ;;  %v7478_v60 = vadd.f32 %v1291_v53, %v7392_v6  ;;  %v3350_v53 = vld [vmem:[#allocation2 + $0x111] sm:$0xff] }
 0x1c2   : > { %v7480_v19 = vpop.f32.mrf.mxu0  ;;  %5540 = vmatmul.mubr.msk.f32.gmra.mxu0 %vm438_vm0, %v3346_v26  ;;  %v7483_v54 = vpop.f32.mrf.mxu1 }
 0x1c3   : > { %8644 = vst [vmem:[#allocation81_spill] sm:$0xff] %v7483_v54  ;;  %5542 = vmatprep.mubr.msk.f32.mxu0 %vm438_vm0, %v3347_v49  ;;  %v3351_v54 = vld [vmem:[#allocation2 + $0x121] sm:$0xff] }
 0x1c4   : > { %v7486_v22 = vpop.f32.mrf.mxu0  ;;  %v7488_v11 = vpop.f32.mrf.mxu1 }
 0x1c5   : > { %8645 = vst [vmem:[#allocation82_spill] sm:$0xff] %v7488_v11  ;;  %v3352_v11 = vld [vmem:[#allocation2 + $0x129] sm:$0xff] }
 0x1c6   : > { %v7490_v25 = vpop.f32.mrf.mxu0  ;;  %5543 = vmatmul.mubr.msk.f32.gmra.mxu0 %vm438_vm0, %v3348_v14  ;;  %v7493_v6 = vpop.f32.mrf.mxu1 }
 0x1c7   : > { %8646 = vst [vmem:[#allocation83_spill] sm:$0xff] %v7493_v6  ;;  %5545 = vmatprep.mubr.msk.f32.mxu0 %vm438_vm0, %v3349_v1  ;;  %v3353_v6 = vld [vmem:[#allocation2 + $0x139] sm:$0xff] }
 0x1c8   : > { %v7496_v26 = vpop.f32.mrf.mxu0  ;;  %v7498_v56 = vpop.f32.mrf.mxu1 }
 0x1c9   : > { %8647 = vst [vmem:[#allocation84_spill] sm:$0xff] %v7498_v56  ;;  %v3354_v56 = vld [vmem:[#allocation2 + $0x141] sm:$0xff] }
 0x1ca   : > { %v7500_v49 = vpop.f32.mrf.mxu0  ;;  %5546 = vmatmul.mubr.msk.f32.gmra.mxu0 %vm438_vm0, %v3350_v53  ;;  %v7503_v52 = vpop.f32.mrf.mxu1 }
 0x1cb   : > { %8648 = vst [vmem:[#allocation85_spill] sm:$0xff] %v7503_v52  ;;  %5548 = vmatprep.mubr.msk.f32.mxu0 %vm438_vm0, %v3351_v54  ;;  %v3355_v52 = vld [vmem:[#allocation2 + $0x151] sm:$0xff] }
 0x1cc   : > { %v7506_v14 = vpop.f32.mrf.mxu0  ;;  %v7508_v58 = vpop.f32.mrf.mxu1 }
 0x1cd   : > { %8649 = vst [vmem:[#allocation86_spill] sm:$0xff] %v7508_v58  ;;  %v3356_v58 = vld [vmem:[#allocation2 + $0x159] sm:$0xff] }
 0x1ce   : > { %v7510_v1 = vpop.f32.mrf.mxu0  ;;  %5549 = vmatmul.mubr.msk.f32.gmra.mxu0 %vm438_vm0, %v3352_v11  ;;  %v7513_v45 = vpop.f32.mrf.mxu1 }
 0x1cf   : > { %8650 = vst [vmem:[#allocation87_spill] sm:$0xff] %v7513_v45  ;;  %5551 = vmatprep.mubr.msk.f32.mxu0 %vm438_vm0, %v3353_v6  ;;  %v3357_v45 = vld [vmem:[#allocation2 + $0x169] sm:$0xff] }
 0x1d0   : > { %v7516_v53 = vpop.f32.mrf.mxu0  ;;  %v7518_v35 = vpop.f32.mrf.mxu1 }
 0x1d1   : > { %8651 = vst [vmem:[#allocation88_spill] sm:$0xff] %v7518_v35  ;;  %v3358_v35 = vld [vmem:[#allocation2 + $0x171] sm:$0xff] }
 0x1d2   : > { %v7520_v54 = vpop.f32.mrf.mxu0  ;;  %5552 = vmatmul.mubr.msk.f32.gmra.mxu0 %vm438_vm0, %v3354_v56  ;;  %v7523_v4 = vpop.f32.mrf.mxu1 }
 0x1d3   : > { %8652 = vst [vmem:[#allocation89_spill] sm:$0xff] %v7523_v4  ;;  %5554 = vmatprep.mubr.msk.f32.mxu0 %vm438_vm0, %v3355_v52 }
 0x1d4   : > { %v7526_v11 = vpop.f32.mrf.mxu0  ;;  %v7528_v8 = vpop.f32.mrf.mxu1 }
 0x1d5   : > { %8653 = vst [vmem:[#allocation90_spill] sm:$0xff] %v7526_v11  ;;  %8654 = vst [vmem:[#allocation91_spill] sm:$0xff] %v7528_v8 }
 0x1d6   : > { %v7530_v6 = vpop.f32.mrf.mxu0  ;;  %5555 = vmatmul.mubr.msk.f32.gmra.mxu0 %vm438_vm0, %v3356_v58  ;;  %v7533_v61 = vpop.f32.mrf.mxu1  ;;  %v3361_v58 = vld [vmem:[#allocation2 + $0x199] sm:$0xff] }
 0x1d7   : > { %8655 = vst [vmem:[#allocation92_spill] sm:$0xff] %v7530_v6  ;;  %8656 = vst [vmem:[#allocation93_spill] sm:$0xff] %v7533_v61  ;;  %5557 = vmatprep.mubr.msk.f32.mxu0 %vm438_vm0, %v3357_v45  ;;  %v8664_v6 = vld [vmem:[#allocation44_spill] sm:$0xff] }
 0x1d8   : > { %v7536_v56 = vpop.f32.mrf.mxu0  ;;  %v7538_v4 = vpop.f32.mrf.mxu1 }
 0x1d9   : > { %8657 = vst [vmem:[#allocation94_spill] sm:$0xff] %v7536_v56  ;;  %8658 = vst [vmem:[#allocation95_spill] sm:$0xff] %v7538_v4 }
 0x1da   : > { %v7540_v52 = vpop.f32.mrf.mxu0  ;;  %5558 = vmatmul.mubr.msk.f32.gmra.mxu0 %vm438_vm0, %v3358_v35  ;;  %v7543_v11 = vpop.f32.mrf.mxu1  ;;  %v3362_v35 = vld [vmem:[#allocation2 + $0x1a1] sm:$0xff] }
 0x1db   : > { %8659 = vst [vmem:[#allocation96_spill] sm:$0xff] %v7540_v52  ;;  %8660 = vst [vmem:[#allocation97_spill] sm:$0xff] %v7543_v11  ;;  %5560 = vmatprep.mubr.msk.f32.mxu0 %vm438_vm0, %v6985_v27 }
 0x1dc   : > { %v7547_v8 = vpop.f32.mrf.mxu0  ;;  %v7549_v61 = vpop.f32.mrf.mxu1 }
 0x1dd   : > { %8661 = vst [vmem:[#allocation98_spill] sm:$0xff] %v7547_v8  ;;  %8662 = vst [vmem:[#allocation99_spill] sm:$0xff] %v7549_v61 }
 0x1de   : > { %v7551_v45 = vpop.f32.mrf.mxu0  ;;  %5561 = vmatmul.mubr.msk.f32.gmra.mxu0 %vm438_vm0, %v8664_v6  ;;  %v7555_v4 = vpop.f32.mrf.mxu1  ;;  %v1747_v6 = vadd.f32 %v7181_v55, %v7400_v10  ;;  %v1748_v55 = vadd.f32 %v7200_v30, %v7418_v50  ;;  %v1753_v50 = vadd.f32 %v7217_v5, %v7436_v40  ;;  %v1754_v40 = vadd.f32 %v7237_v57, %v7454_v7 }
 0x1df   : > { %8663 = vst [vmem:[#allocation100_spill] sm:$0xff] %v7551_v45  ;;  %8665 = vst [vmem:[#allocation44_spill] sm:$0xff] %v7555_v4  ;;  %5563 = vmatprep.mubr.msk.f32.mxu0 %vm438_vm0, %v3361_v58  ;;  %v1759_v7 = vadd.f32 %v7253_v16, %v7472_v62 }
 0x1e0   : > { %v7558_v52 = vpop.f32.mrf.mxu0  ;;  %v7560_v11 = vpop.f32.mrf.mxu1 }
 0x1e1   : > { %8666 = vst [vmem:[#allocation101_spill] sm:$0xff] %v7558_v52  ;;  %8667 = vst [vmem:[#allocation102_spill] sm:$0xff] %v7560_v11  ;;  %v1746_v52 = vadd.f32 %v7188_v23, %v7406_v3 }
 0x1e2   : > { %v7562_v27 = vpop.f32.mrf.mxu0  ;;  %5564 = vmatmul.mubr.msk.f32.gmra.mxu0 %vm438_vm0, %v3362_v35  ;;  %v7565_v8 = vpop.f32.mrf.mxu1  ;;  %v1749_v35 = vadd.f32 %v7192_v9, %v7412_v41  ;;  %v1750_v41 = vadd.f32 %v7213_v43, %v7430_v33  ;;  %v1755_v33 = vadd.f32 %v7229_v31, %v7448_v51  ;;  %v1756_v51 = vadd.f32 %v7249_v42, %v7466_v20 }
 0x1e3   : > { %8668 = vst [vmem:[#allocation103_spill] sm:$0xff] %v7562_v27  ;;  %8669 = vst [vmem:[#allocation104_spill] sm:$0xff] %v7565_v8  ;;  %v1302_v42 = vadd.f32 %v7486_v22, %v7086_v18  ;;  %v1312_v18 = vadd.f32 %v7496_v26, %v7098_v34  ;;  %v1322_v34 = vadd.f32 %v7506_v14, %v7110_v21 }
 0x1e4   : > { %v7567_v61 = vpop.f32.mrf.mxu0  ;;  %v7569_v45 = vpop.f32.mrf.mxu1  ;;  %v1332_v21 = vadd.f32 %v7516_v53, %v7122_v47 }
 0x1e5   : > { %8670 = vst [vmem:[#allocation105_spill] sm:$0xff] %v7567_v61  ;;  %8671 = vst [vmem:[#allocation106_spill] sm:$0xff] %v7569_v45 }
 0x1e6   : > { %v5312_v4 = vpop.f32.mrf.mxu0  ;;  %v7573_v58 = vpop.f32.mrf.mxu1 }
 0x1e7   : > { %8672 = vst [vmem:[#allocation107_spill] sm:$0xff] %v7573_v58  ;;  %v7577_v11 = vadd.f32 %v5312_v4, %v1747_v6  ;;  %v1751_v4 = vadd.f32 %v7205_v28, %v7424_v24  ;;  %v1752_v24 = vadd.f32 %v7225_v36, %v7442_v2  ;;  %v1757_v2 = vadd.f32 %v7241_v44, %v7460_v17 }
 0x1e8   : > { %v1975_v27 = vpop.f32.mrf.mxu0  ;;  %v7579_v56 = vpop.f32.mrf.mxu1 }
 0x1e9   : > { %8673 = vst [vmem:[#allocation108_spill] sm:$0xff] %v7579_v56  ;;  %v7583_v8 = vadd.f32 %v1975_v27, %v1746_v52 }
 0x1ea   : > { %v5315_v45 = vpop.f32.mrf.mxu0  ;;  %v7585_v61 = vpop.f32.mrf.mxu1 }
 0x1eb   : > { %8674 = vst [vmem:[#allocation109_spill] sm:$0xff] %v7585_v61  ;;  %v7589_v10 = vadd.f32 %v5315_v45, %v1749_v35 }
 0x1ec   : > { %v1985_v58 = vpop.f32.mrf.mxu0  ;;  %v7591_v23 = vpop.f32.mrf.mxu1 }
 0x1ed   : > { %8675 = vst [vmem:[#allocation110_spill] sm:$0xff] %v7591_v23  ;;  %v7595_v3 = vadd.f32 %v1985_v58, %v1748_v55 }
 0x1ee   : > { %v5318_v6 = vpop.f32.mrf.mxu0  ;;  %v7597_v9 = vpop.f32.mrf.mxu1 }
 0x1ef   : > { %8676 = vst [vmem:[#allocation111_spill] sm:$0xff] %v7597_v9  ;;  %v7601_v52 = vadd.f32 %v5318_v6, %v1751_v4 }
 0x1f0   : > { %v1995_v27 = vpop.f32.mrf.mxu0  ;;  %v7603_v30 = vpop.f32.mrf.mxu1 }
 0x1f1   : > { %8677 = vst [vmem:[#allocation112_spill] sm:$0xff] %v7603_v30  ;;  %v7607_v45 = vadd.f32 %v1995_v27, %v1750_v41  ;;  %v8734_v30 = vld [vmem:[#allocation79_spill] sm:$0xff] }
 0x1f2   : > { %v5321_v35 = vpop.f32.mrf.mxu0  ;;  %v7609_v28 = vpop.f32.mrf.mxu1 }
 0x1f3   : > { %8678 = vst [vmem:[#allocation113_spill] sm:$0xff] %v7609_v28  ;;  %v7613_v58 = vadd.f32 %v5321_v35, %v1753_v50 }
 0x1f4   : > { %v2005_v55 = vpop.f32.mrf.mxu0  ;;  %v7615_v43 = vpop.f32.mrf.mxu1 }
 0x1f5   : > { %8679 = vst [vmem:[#allocation114_spill] sm:$0xff] %v7615_v43  ;;  %v7619_v4 = vadd.f32 %v2005_v55, %v1752_v24 }
 0x1f6   : > { %v5324_v6 = vpop.f32.mrf.mxu0  ;;  %v7621_v5 = vpop.f32.mrf.mxu1 }
 0x1f7   : > { %8680 = vst [vmem:[#allocation115_spill] sm:$0xff] %v7621_v5  ;;  %v7625_v41 = vadd.f32 %v5324_v6, %v1755_v33  ;;  %v1307_v33 = vadd.f32 %v7480_v19, %v7078_v48  ;;  %v1317_v48 = vadd.f32 %v7490_v25, %v7090_v29  ;;  %v1327_v29 = vadd.f32 %v7500_v49, %v7102_v63 }
 0x1f8   : > { %v2015_v27 = vpop.f32.mrf.mxu0  ;;  %v7627_v36 = vpop.f32.mrf.mxu1  ;;  %v1337_v63 = vadd.f32 %v7510_v1, %v7114_v13  ;;  %v1347_v13 = vadd.f32 %v7520_v54, %v7126_v0  ;;  %v8693_v54 = vld [vmem:[#allocation57_spill] sm:$0xff] }
 0x1f9   : > { %8681 = vst [vmem:[#allocation116_spill] sm:$0xff] %v7627_v36  ;;  %v7631_v50 = vadd.f32 %v2015_v27, %v1754_v40  ;;  %v1758_v40 = vadd.f32 %v7261_v12, %v7478_v60  ;;  %v1761_v16 = vadd.f32 %v7265_v59, %v1307_v33  ;;  %v1760_v12 = vadd.f32 %v7273_v15, %v1302_v42 }
 0x1fa   : > { %v5327_v35 = vpop.f32.mrf.mxu0  ;;  %v7633_v31 = vpop.f32.mrf.mxu1  ;;  %v1763_v59 = vadd.f32 %v7277_v38, %v1317_v48  ;;  %v1762_v15 = vadd.f32 %v7285_v32, %v1312_v18  ;;  %v1765_v38 = vadd.f32 %v7289_v39, %v1327_v29  ;;  %v1764_v32 = vadd.f32 %v7297_v37, %v1322_v34  ;;  %v8687_v18 = vld [vmem:[#allocation45_spill] sm:$0xff]  ;;  %v8688_v37 = vld [vmem:[#allocation90_spill] sm:$0xff]  ;;  %v8690_v29 = vld [vmem:[#allocation56_spill] sm:$0xff] }
 0x1fb   : > { %8682 = vst [vmem:[#allocation117_spill] sm:$0xff] %v7633_v31  ;;  %v7637_v24 = vadd.f32 %v5327_v35, %v1757_v2  ;;  %v1767_v39 = vadd.f32 %v7301_v46, %v1337_v63  ;;  %v8692_v46 = vld [vmem:[#allocation92_spill] sm:$0xff]  ;;  %v8694_v63 = vld [vmem:[#allocation47_spill] sm:$0xff] }
 0x1fc   : > { %v2025_v55 = vpop.f32.mrf.mxu0  ;;  %v7639_v57 = vpop.f32.mrf.mxu1 }
 0x1fd   : > { %8683 = vst [vmem:[#allocation118_spill] sm:$0xff] %v7639_v57  ;;  %v7645_v44 = vadd.f32 %v2025_v55, %v1756_v51 }
 0x1fe   : > { %v5330_v17 = vpop.f32.mrf.mxu0  ;;  %v7647_v6 = vpop.f32.mrf.mxu1 }
 0x1ff   : > { %v7653_v20 = vadd.f32 %v5330_v17, %v1759_v7 }
 0x200   : > { %v2035_v27 = vpop.f32.mrf.mxu0  ;;  %v7655_v2 = vpop.f32.mrf.mxu1 }
 0x201   : > { %v7660_v62 = vadd.f32 %v2035_v27, %v1758_v40 }
 0x202   : > { %v5333_v19 = vpop.f32.mrf.mxu0  ;;  %v7662_v35 = vpop.f32.mrf.mxu1 }
 0x203   : > { %v7667_v60 = vadd.f32 %v5333_v19, %v1761_v16  ;;  %v8686_v19 = vld [vmem:[#allocation55_spill] sm:$0xff] }
 0x204   : > { %v2045_v22 = vpop.f32.mrf.mxu0  ;;  %v7669_v51 = vpop.f32.mrf.mxu1 }
 0x205   : > { %v7674_v25 = vadd.f32 %v2045_v22, %v1760_v12  ;;  %v1766_v12 = vadd.f32 %v8686_v19, %v1332_v21  ;;  %v1342_v22 = vadd.f32 %v8688_v37, %v8687_v18  ;;  %v8698_v18 = vld [vmem:[#allocation48_spill] sm:$0xff] }
 0x206   : > { %v5336_v55 = vpop.f32.mrf.mxu0  ;;  %v7676_v7 = vpop.f32.mrf.mxu1 }
 0x207   : > { %v7681_v26 = vadd.f32 %v5336_v55, %v1763_v59  ;;  %v1769_v55 = vadd.f32 %v8690_v29, %v1347_v13  ;;  %v8699_v13 = vld [vmem:[#allocation96_spill] sm:$0xff]  ;;  %v2536_v9 = vadd.f32 %v8734_v30, %v7674_v25  ;;  %v8739_v30 = vld [vmem:[#allocation82_spill] sm:$0xff] }
 0x208   : > { %v2055_v33 = vpop.f32.mrf.mxu0  ;;  %v7683_v17 = vpop.f32.mrf.mxu1  ;;  %v1367_v37 = vadd.f32 %v8699_v13, %v8698_v18  ;;  %v8708_v13 = vld [vmem:[#allocation51_spill] sm:$0xff] }
 0x209   : > { %v7688_v49 = vadd.f32 %v2055_v33, %v1762_v15  ;;  %v8691_v15 = vld [vmem:[#allocation46_spill] sm:$0xff] }
 0x20a   : > { %v5339_v40 = vpop.f32.mrf.mxu0  ;;  %v7690_v42 = vpop.f32.mrf.mxu1  ;;  %v1357_v34 = vadd.f32 %v8692_v46, %v8691_v15  ;;  %v8701_v46 = vld [vmem:[#allocation49_spill] sm:$0xff] }
 0x20b   : > { %8684 = vst [vmem:[#allocation119_spill] sm:$0xff] %v7690_v42  ;;  %v7695_v14 = vadd.f32 %v5339_v40, %v1765_v38  ;;  %v1768_v38 = vadd.f32 %v8693_v54, %v1342_v22  ;;  %v8695_v40 = vld [vmem:[#allocation94_spill] sm:$0xff] }
 0x20c   : > { %v2065_v27 = vpop.f32.mrf.mxu0  ;;  %v7697_v16 = vpop.f32.mrf.mxu1  ;;  %v8702_v22 = vld [vmem:[#allocation98_spill] sm:$0xff] }
 0x20d   : > { %8685 = vst [vmem:[#allocation120_spill] sm:$0xff] %v7697_v16  ;;  %v7702_v1 = vadd.f32 %v2065_v27, %v1764_v32  ;;  %v1352_v32 = vadd.f32 %v8695_v40, %v8694_v63  ;;  %v1362_v54 = vadd.f32 %v8702_v22, %v8701_v46  ;;  %v8704_v63 = vld [vmem:[#allocation60_spill] sm:$0xff]  ;;  %v8711_v46 = vld [vmem:[#allocation62_spill] sm:$0xff]  ;;  %v2541_v25 = vadd.f32 %v8739_v30, %v7695_v14 }
 0x20e   : > { %v5342_v48 = vpop.f32.mrf.mxu0  ;;  %v7709_v53 = vpop.f32.mrf.mxu1  ;;  %v1773_v40 = vadd.f32 %v8704_v63, %v1367_v37  ;;  %v8713_v37 = vld [vmem:[#allocation103_spill] sm:$0xff] }
 0x20f   : > { %v7707_v59 = vadd.f32 %v5342_v48, %v1767_v39  ;;  %8689 = vst [vmem:[#allocation55_spill] sm:$0xff] %v7709_v53  ;;  %v8697_v48 = vld [vmem:[#allocation58_spill] sm:$0xff] }
 0x210   : > { %v2075_v47 = vpop.f32.mrf.mxu0  ;;  %v7721_v39 = vpop.f32.mrf.mxu1  ;;  %v1771_v19 = vadd.f32 %v8697_v48, %v1357_v34  ;;  %v8706_v34 = vld [vmem:[#allocation100_spill] sm:$0xff] }
 0x211   : > { %v7714_v33 = vadd.f32 %v2075_v47, %v1766_v12  ;;  %8696 = vst [vmem:[#allocation45_spill] sm:$0xff] %v7721_v39  ;;  %v8700_v47 = vld [vmem:[#allocation59_spill] sm:$0xff]  ;;  %v8705_v39 = vld [vmem:[#allocation50_spill] sm:$0xff] }
 0x212   : > { %v5345_v0 = vpop.f32.mrf.mxu0  ;;  %v1770_v15 = vadd.f32 %v8700_v47, %v1352_v32  ;;  %v1377_v48 = vadd.f32 %v8706_v34, %v8705_v39  ;;  %v8709_v32 = vld [vmem:[#allocation101_spill] sm:$0xff] }
 0x213   : > { %v7719_v21 = vadd.f32 %v5345_v0, %v1769_v55  ;;  %v7733_v0 = vpop.f32.mrf.mxu1  ;;  %v1372_v47 = vadd.f32 %v8709_v32, %v8708_v13  ;;  %v8715_v34 = vld [vmem:[#allocation53_spill] sm:$0xff] }
 0x214   : > { %v2085_v27 = vpop.f32.mrf.mxu0  ;;  %8703 = vst [vmem:[#allocation90_spill] sm:$0xff] %v7733_v0  ;;  %v1775_v22 = vadd.f32 %v8711_v46, %v1377_v48  ;;  %v8712_v0 = vld [vmem:[#allocation52_spill] sm:$0xff]  ;;  %v8718_v48 = vld [vmem:[#allocation42_spill] sm:$0xff] }
 0x215   : > { %v7726_v29 = vadd.f32 %v2085_v27, %v1768_v38  ;;  %v8707_v27 = vld [vmem:[#allocation61_spill] sm:$0xff]  ;;  %v1387_v63 = vadd.f32 %v8713_v37, %v8712_v0 }
 0x216   : > { %v5348_v12 = vpop.f32.mrf.mxu0  ;;  %v1772_v18 = vadd.f32 %v8707_v27, %v1362_v54  ;;  %v8714_v54 = vld [vmem:[#allocation63_spill] sm:$0xff] }
 0x217   : > { %v7731_v53 = vadd.f32 %v5348_v12, %v1771_v19  ;;  %v7745_v12 = vpop.f32.mrf.mxu1  ;;  %v1777_v46 = vadd.f32 %v8718_v48, %v1387_v63 }
 0x218   : > { %v2095_v55 = vpop.f32.mrf.mxu0  ;;  %8710 = vst [vmem:[#allocation56_spill] sm:$0xff] %v7745_v12  ;;  %v8720_v12 = vld [vmem:[#allocation43_spill] sm:$0xff] }
 0x219   : > { %v7738_v16 = vadd.f32 %v2095_v55, %v1770_v15  ;;  %v512_v15 = vld [vmem:[%s8517_s4] sm:$0x1]  ;;  %v1774_v55 = vadd.f32 %v8714_v54, %v1372_v47  ;;  %v7760_v32 = vpop.f32.mrf.mxu1 }
 0x21a   : > { %v5351_v38 = vpop.f32.mrf.mxu0  ;;  %8717 = vst [vmem:[#allocation46_spill] sm:$0xff] %v7760_v32 }
 0x21b   : > { %v7743_v42 = vadd.f32 %v5351_v38, %v1773_v40  ;;  %v8716_v40 = vld [vmem:[#allocation105_spill] sm:$0xff]  ;;  %v7769_v54 = vpop.f32.mrf.mxu1 }
 0x21c   : > { %v2105_v19 = vpop.f32.mrf.mxu0  ;;  %v1382_v38 = vadd.f32 %v8716_v40, %v8715_v34  ;;  %8721 = vst [vmem:[#allocation92_spill] sm:$0xff] %v7769_v54 }
 0x21d   : > { %v7750_v57 = vadd.f32 %v2105_v19, %v1772_v18  ;;  %v8719_v18 = vld [vmem:[#allocation54_spill] sm:$0xff]  ;;  %v7777_v63 = vpop.f32.mrf.mxu1 }
 0x21e   : > { %v5354_v39 = vpop.f32.mrf.mxu0  ;;  %v583_v19 = vadd.f32 %v8719_v18, %v512_v15  ;;  %v1776_v31 = vadd.f32 %v8720_v12, %v1382_v38  ;;  %8722 = vst [vmem:[#allocation57_spill] sm:$0xff] %v7777_v63 }
 0x21f   : > { %v7758_v27 = vadd.f32 %v5354_v39, %v1775_v22  ;;  %v7783_v12 = vpop.f32.mrf.mxu1 }
 0x220   : > { %v2115_v13 = vpop.f32.mrf.mxu0  ;;  %v586_v22 = vsub.f32 0.0, %v583_v19  ;;  %8723 = vst [vmem:[#allocation47_spill] sm:$0xff] %v7783_v12 }
 0x221   : > { %v7763_v0 = vadd.f32 %v2115_v13, %v1774_v55 }
 0x222   : > { %v5357_v37 = vpop.f32.mrf.mxu0  ;;  %v587_v55 = vmul.f32 1.442695, %v586_v22 }
 0x223   : > { %v7767_v36 = vadd.f32 %v5357_v37, %v1777_v46 }
 0x224   : > { %v2125_v47 = vpop.f32.mrf.mxu0  ;;  %5686 = vpow2.f32 %v587_v55 }
 0x225   : > { %v7771_v34 = vadd.f32 %v2125_v47, %v1776_v31  ;;  %v7789_v31 = vpop.f32.mrf.mxu1 }
 0x226   : > { %v7773_v39 = vpop.f32.mrf.mxu0  ;;  %8724 = vst [vmem:[#allocation94_spill] sm:$0xff] %v7789_v31 }
 0x227   : > { %v7795_v19 = vpop.f32.mrf.mxu1 }
 0x228   : > { %v7775_v40 = vpop.f32.mrf.mxu0  ;;  %8725 = vst [vmem:[#allocation58_spill] sm:$0xff] %v7795_v19 }
 0x229   : > { %v7801_v22 = vpop.f32.mrf.mxu1 }
 0x22a   : > { %v7779_v13 = vpop.f32.mrf.mxu0  ;;  %8726 = vst [vmem:[#allocation48_spill] sm:$0xff] %v7801_v22 }
 0x22b   : > { %v7807_v54 = vpop.f32.mrf.mxu1 }
 0x22c   : > { %v7781_v15 = vpop.f32.mrf.mxu0  ;;  %8729 = vst [vmem:[#allocation49_spill] sm:$0xff] %v7807_v54 }
 0x22d   : > { %v7813_v43 = vpop.f32.mrf.mxu1 }
 0x22e   : > { %v7785_v38 = vpop.f32.mrf.mxu0  ;;  %8732 = vst [vmem:[#allocation50_spill] sm:$0xff] %v7813_v43 }
 0x22f   : > { %v7819_v23 = vpop.f32.mrf.mxu1 }
 0x230   : > { %v7787_v48 = vpop.f32.mrf.mxu0  ;;  %8735 = vst [vmem:[#allocation61_spill] sm:$0xff] %v7819_v23 }
 0x231   : > { %v5687_v55 = vpop.eup %5686  ;;  %v7828_v61 = vpop.f32.mrf.mxu1 }
 0x232   : > { %v7791_v46 = vpop.f32.mrf.mxu0  ;;  %v589_v31 = vadd.f32 1.0, %v5687_v55  ;;  %v4146_v55 = vlaneseq }
 0x234   : > { %v7793_v18 = vpop.f32.mrf.mxu0  ;;  %5688 = vrcp.f32 %v589_v31 }
 0x236   : > { %v7797_v37 = vpop.f32.mrf.mxu0 }
 0x238   : > { %v7799_v47 = vpop.f32.mrf.mxu0 }
 0x23a   : > { %v7803_v12 = vpop.f32.mrf.mxu0 }
 0x23b   : > { %8727 = vst [vmem:[#allocation96_spill] sm:$0xff] %v7803_v12 }
 0x23c   : > { %v7805_v63 = vpop.f32.mrf.mxu0 }
 0x23d   : > { %8728 = vst [vmem:[#allocation59_spill] sm:$0xff] %v7805_v63  ;;  %v8736_v63 = vld [vmem:[#allocation80_spill] sm:$0xff] }
 0x23e   : > { %v7809_v32 = vpop.f32.mrf.mxu0  ;;  %v2539_v12 = vadd.f32 %v8736_v63, %v7681_v26 }
 0x23f   : > { %8730 = vst [vmem:[#allocation98_spill] sm:$0xff] %v7809_v32  ;;  %v8737_v32 = vld [vmem:[#allocation81_spill] sm:$0xff] }
 0x240   : > { %v7811_v5 = vpop.f32.mrf.mxu0 }
 0x241   : > { %8731 = vst [vmem:[#allocation60_spill] sm:$0xff] %v7811_v5  ;;  %v2538_v5 = vadd.f32 %v8737_v32, %v7688_v49 }
 0x242   : > { %v7815_v28 = vpop.f32.mrf.mxu0 }
 0x243   : > { %8733 = vst [vmem:[#allocation100_spill] sm:$0xff] %v7815_v28 }
 0x244   : > { %v2821_v22 = vpop.f32.mrf.mxu0 }
 0x245   : > { %v2924_v54 = vadd.f32 %v2821_v22, %v2536_v9  ;;  %v4147_v9 = vshrl.u32 %v4146_v55, 7  ;;  %v8741_v22 = vld [vmem:[#allocation83_spill] sm:$0xff]  ;;  %v5689_v55 = vpop.eup %5688 }
 0x246   : > { %v5440_v19 = vpop.f32.mrf.mxu0  ;;  %v2540_v56 = vadd.f32 %v8741_v22, %v7702_v1 }
 0x247   : > { %v7826_v43 = vadd.f32 %v7647_v6, %v2924_v54  ;;  %v2927_v31 = vadd.f32 %v5440_v19, %v2539_v12  ;;  %v7840_v54 = vpop.f32.mrf.mxu1  ;;  %v8743_v12 = vld [vmem:[#allocation84_spill] sm:$0xff] }
 0x248   : > { %v2831_v28 = vpop.f32.mrf.mxu0  ;;  %v2543_v19 = vadd.f32 %v8743_v12, %v7707_v59 }
 0x249   : > { %8738 = vst [vmem:[#allocation51_spill] sm:$0xff] %v7826_v43  ;;  %v7833_v23 = vadd.f32 %v7655_v2, %v2927_v31  ;;  %v2926_v26 = vadd.f32 %v2831_v28, %v2538_v5  ;;  %v4148_v28 = vsub.s32 0, %v4147_v9  ;;  %v8745_v31 = vld [vmem:[#allocation85_spill] sm:$0xff] }
 0x24a   : > { %v5443_v63 = vpop.f32.mrf.mxu0  ;;  %v2542_v1 = vadd.f32 %v8745_v31, %v7714_v33  ;;  %v8750_v33 = vld [vmem:[#allocation87_spill] sm:$0xff] }
 0x24b   : > { %8740 = vst [vmem:[#allocation101_spill] sm:$0xff] %v7833_v23  ;;  %v7838_v49 = vadd.f32 %v7662_v35, %v2926_v26  ;;  %v2929_v6 = vadd.f32 %v5443_v63, %v2541_v25  ;;  %v7852_v26 = vpop.f32.mrf.mxu1  ;;  %v8747_v63 = vld [vmem:[#allocation86_spill] sm:$0xff]  ;;  %v7861_v9 = vrot.slane %v5689_v55, %v4148_v28  ;;  %v8771_v23 = vld [vmem:[#allocation23_spill] sm:$0xff] }
 0x24c   : > { %v2841_v32 = vpop.f32.mrf.mxu0  ;;  %v2545_v59 = vadd.f32 %v8747_v63, %v7719_v21  ;;  %v8753_v28 = vld [vmem:[#allocation10_spill] sm:$0xff] }
 0x24d   : > { %8742 = vst [vmem:[#allocation62_spill] sm:$0xff] %v7838_v49  ;;  %v7845_v14 = vadd.f32 %v7669_v51, %v2929_v6  ;;  %v2928_v2 = vadd.f32 %v2841_v32, %v2540_v56  ;;  %8749 = vst [vmem:[#allocation53_spill] sm:$0xff] %v7861_v9  ;;  %v2544_v6 = vadd.f32 %v8750_v33, %v7726_v29  ;;  %v7867_v12 = vpop.f32.mrf.mxu1  ;;  %v8754_v29 = vld [vmem:[#allocation13_spill] sm:$0xff]  ;;  %v8769_v49 = vld [vmem:[#allocation20_spill] sm:$0xff] }
 0x24e   : > { %v5446_v5 = vpop.f32.mrf.mxu0  ;;  %v7879_v55 = vmul.f32 %v7861_v9, %v8753_v28  ;;  %v7933_v43 = vmul.f32 %v7861_v9, %v8771_v23 }
 0x24f   : > { %8744 = vst [vmem:[#allocation52_spill] sm:$0xff] %v7845_v14  ;;  %v7850_v35 = vadd.f32 %v7676_v7, %v2928_v2  ;;  %v2931_v30 = vadd.f32 %v5446_v5, %v2543_v19  ;;  %v8751_v19 = vld [vmem:[#allocation88_spill] sm:$0xff]  ;;  %v8752_v5 = vld [vmem:[#allocation11_spill] sm:$0xff] }
 0x250   : > { %v2851_v25 = vpop.f32.mrf.mxu0  ;;  %v2547_v2 = vadd.f32 %v8751_v19, %v7731_v53  ;;  %v7875_v31 = vmul.f32 %v7861_v9, %v8752_v5  ;;  %v8756_v53 = vld [vmem:[#allocation12_spill] sm:$0xff]  ;;  %v8759_v5 = vld [vmem:[#allocation17_spill] sm:$0xff]  ;;  %8772 = vst [vmem:[#allocation80_spill] sm:$0xff] %v7933_v43 }
 0x251   : > { %8746 = vst [vmem:[#allocation103_spill] sm:$0xff] %v7850_v35  ;;  %v7857_v51 = vadd.f32 %v7683_v17, %v2931_v30  ;;  %v7859_v56 = vadd.f32 %v2851_v25, %v2542_v1  ;;  %v7883_v1 = vmul.f32 %v7861_v9, %v8754_v29  ;;  %v8755_v30 = vld [vmem:[#allocation89_spill] sm:$0xff]  ;;  %v7903_v28 = vmul.f32 %v7861_v9, %v8759_v5 }
 0x252   : > { %v5449_v22 = vpop.f32.mrf.mxu0  ;;  %v2546_v25 = vadd.f32 %v8755_v30, %v7738_v16  ;;  %v8760_v16 = vld [vmem:[#allocation16_spill] sm:$0xff]  ;;  %v7913_v30 = vpop.f32.mrf.mxu1  ;;  %v8767_v5 = vld [vmem:[#allocation21_spill] sm:$0xff] }
 0x253   : > { %8748 = vst [vmem:[#allocation63_spill] sm:$0xff] %v7857_v51  ;;  %v7865_v7 = vadd.f32 %v5449_v22, %v2545_v59  ;;  %v7891_v59 = vmul.f32 %v7861_v9, %v8756_v53  ;;  %v8757_v22 = vld [vmem:[#allocation15_spill] sm:$0xff]  ;;  %8763 = vst [vmem:[#allocation42_spill] sm:$0xff] %v7913_v30  ;;  %v7925_v14 = vmul.f32 %v7861_v9, %v8767_v5 }
 0x254   : > { %v2861_v32 = vpop.f32.mrf.mxu0  ;;  %v7895_v33 = vmul.f32 %v7861_v9, %v8757_v22  ;;  %v8764_v53 = vld [vmem:[#allocation91_spill] sm:$0xff] }
 0x255   : > { %v7871_v21 = vadd.f32 %v2861_v32, %v2544_v6  ;;  %v8758_v32 = vld [vmem:[#allocation14_spill] sm:$0xff]  ;;  %v2549_v22 = vadd.f32 %v8764_v53, %v7743_v42  ;;  %8768 = vst [vmem:[#allocation43_spill] sm:$0xff] %v7925_v14  ;;  %v8810_v30 = vld [vmem:[#allocation39_spill] sm:$0xff] }
 0x256   : > { %v5452_v17 = vpop.f32.mrf.mxu0  ;;  %v7899_v19 = vmul.f32 %v7861_v9, %v8758_v32  ;;  %v8765_v32 = vld [vmem:[#allocation18_spill] sm:$0xff] }
 0x257   : > { %v7887_v63 = vadd.f32 %v5452_v17, %v2547_v2  ;;  %v7907_v2 = vmul.f32 %v7861_v9, %v8760_v16  ;;  %v8761_v17 = vld [vmem:[#allocation19_spill] sm:$0xff]  ;;  %v7921_v35 = vmul.f32 %v7861_v9, %v8765_v32  ;;  %v8773_v42 = vld [vmem:[#allocation22_spill] sm:$0xff]  ;;  %v8777_v32 = vld [vmem:[#allocation93_spill] sm:$0xff] }
 0x258   : > { %v2871_v6 = vpop.f32.mrf.mxu0  ;;  %v7911_v29 = vmul.f32 %v7861_v9, %v8761_v17  ;;  %v7929_v17 = vmul.f32 %v7861_v9, %v8769_v49  ;;  %v2548_v5 = vadd.f32 %v8777_v32, %v7750_v57 }
 0x259   : > { %v7917_v51 = vadd.f32 %v2871_v6, %v2546_v25  ;;  %8766 = vst [vmem:[#allocation54_spill] sm:$0xff] %v7921_v35  ;;  %v7937_v25 = vmul.f32 %v7861_v9, %v8773_v42  ;;  %v8775_v6 = vld [vmem:[#allocation25_spill] sm:$0xff]  ;;  %v8778_v35 = vld [vmem:[#allocation24_spill] sm:$0xff]  ;;  %v7955_v42 = vpop.f32.mrf.mxu1 }
 0x25a   : > { %8762 = vst [vmem:[#allocation105_spill] sm:$0xff] %v7911_v29  ;;  %v5455_v16 = vpop.f32.mrf.mxu0  ;;  %8770 = vst [vmem:[#allocation79_spill] sm:$0xff] %v7929_v17  ;;  %v7941_v53 = vmul.f32 %v7861_v9, %v8775_v6  ;;  %v7949_v49 = vmul.f32 %v7861_v9, %v8778_v35  ;;  %v8780_v17 = vld [vmem:[#allocation27_spill] sm:$0xff] }
 0x25b   : > { %8774 = vst [vmem:[#allocation81_spill] sm:$0xff] %v7937_v25  ;;  %v7945_v14 = vadd.f32 %v5455_v16, %v2549_v22  ;;  %v7953_v23 = vmul.f32 %v7861_v9, %v8780_v17  ;;  %8782 = vst [vmem:[#allocation85_spill] sm:$0xff] %v7955_v42  ;;  %v8783_v25 = vld [vmem:[#allocation26_spill] sm:$0xff]  ;;  %v8787_v22 = vld [vmem:[#allocation28_spill] sm:$0xff] }
 0x25c   : > { %8776 = vst [vmem:[#allocation82_spill] sm:$0xff] %v7941_v53  ;;  %8779 = vst [vmem:[#allocation83_spill] sm:$0xff] %v7949_v49  ;;  %v2881_v43 = vpop.f32.mrf.mxu0  ;;  %v7959_v6 = vmul.f32 %v7861_v9, %v8783_v25  ;;  %v8785_v53 = vld [vmem:[#allocation29_spill] sm:$0xff]  ;;  %v7967_v16 = vmul.f32 %v7861_v9, %v8787_v22  ;;  %v8789_v35 = vld [vmem:[#allocation31_spill] sm:$0xff] }
 0x25d   : > { %8781 = vst [vmem:[#allocation84_spill] sm:$0xff] %v7953_v23  ;;  %v7963_v57 = vmul.f32 %v7861_v9, %v8785_v53  ;;  %v7971_v32 = vmul.f32 %v7861_v9, %v8789_v35  ;;  %v8791_v17 = vld [vmem:[#allocation95_spill] sm:$0xff]  ;;  %v7975_v49 = vadd.f32 %v2881_v43, %v2548_v5  ;;  %v8792_v42 = vld [vmem:[#allocation30_spill] sm:$0xff]  ;;  %v8796_v22 = vld [vmem:[#allocation32_spill] sm:$0xff] }
 0x25e   : > { %8784 = vst [vmem:[#allocation86_spill] sm:$0xff] %v7959_v6  ;;  %8788 = vst [vmem:[#allocation88_spill] sm:$0xff] %v7967_v16  ;;  %v2551_v23 = vadd.f32 %v8791_v17, %v7758_v27  ;;  %v7979_v25 = vmul.f32 %v7861_v9, %v8792_v42  ;;  %v8794_v6 = vld [vmem:[#allocation33_spill] sm:$0xff]  ;;  %v7987_v16 = vmul.f32 %v7861_v9, %v8796_v22  ;;  %v8798_v35 = vld [vmem:[#allocation35_spill] sm:$0xff] }
 0x25f   : > { %8786 = vst [vmem:[#allocation87_spill] sm:$0xff] %v7963_v57  ;;  %8790 = vst [vmem:[#allocation11_spill] sm:$0xff] %v7971_v32  ;;  %v7983_v53 = vmul.f32 %v7861_v9, %v8794_v6  ;;  %v5458_v57 = vpop.f32.mrf.mxu0  ;;  %v7991_v32 = vmul.f32 %v7861_v9, %v8798_v35  ;;  %v8800_v27 = vld [vmem:[#allocation34_spill] sm:$0xff]  ;;  %v8802_v5 = vld [vmem:[#allocation37_spill] sm:$0xff] }
 0x260   : > { %8793 = vst [vmem:[#allocation10_spill] sm:$0xff] %v7979_v25  ;;  %8797 = vst [vmem:[#allocation89_spill] sm:$0xff] %v7987_v16  ;;  %v7995_v43 = vmul.f32 %v7861_v9, %v8800_v27  ;;  %v7999_v42 = vmul.f32 %v7861_v9, %v8802_v5  ;;  %v8804_v6 = vld [vmem:[#allocation64_spill] sm:$0xff]  ;;  %v8005_v22 = vadd.f32 %v5458_v57, %v2551_v23  ;;  %v8814_v57 = vld [vmem:[#allocation67_spill] sm:$0xff] }
 0x261   : > { %8795 = vst [vmem:[#allocation13_spill] sm:$0xff] %v7983_v53  ;;  %8799 = vst [vmem:[#allocation12_spill] sm:$0xff] %v7991_v32  ;;  %v2523_v17 = vadd.f32 %v8804_v6, %v7577_v11  ;;  %v8805_v53 = vld [vmem:[#allocation97_spill] sm:$0xff]  ;;  %v8806_v16 = vld [vmem:[#allocation36_spill] sm:$0xff]  ;;  %v2891_v5 = vpop.f32.mrf.mxu0  ;;  %v8019_v11 = vmul.f32 %v7861_v9, %v8810_v30 }
 0x262   : > { %8801 = vst [vmem:[#allocation15_spill] sm:$0xff] %v7995_v43  ;;  %8803 = vst [vmem:[#allocation14_spill] sm:$0xff] %v7999_v42  ;;  %v2550_v25 = vadd.f32 %v8805_v53, %v7763_v0  ;;  %v8009_v35 = vmul.f32 %v7861_v9, %v8806_v16  ;;  %v8808_v32 = vld [vmem:[#allocation65_spill] sm:$0xff]  ;;  %v8809_v43 = vld [vmem:[#allocation66_spill] sm:$0xff]  ;;  %v8015_v42 = vpop.f32.mrf.mxu1  ;;  %v2524_v16 = vadd.f32 %v8814_v57, %v7595_v3 }
 0x263   : > { %v2522_v27 = vadd.f32 %v8808_v32, %v7583_v8  ;;  %v2525_v29 = vadd.f32 %v8809_v43, %v7589_v10  ;;  %8811 = vst [vmem:[#allocation16_spill] sm:$0xff] %v8019_v11  ;;  %v8812_v0 = vld [vmem:[#allocation38_spill] sm:$0xff]  ;;  %v8815_v53 = vld [vmem:[#allocation99_spill] sm:$0xff]  ;;  %v2911_v32 = vadd.f32 %v7773_v39, %v2523_v17  ;;  %v8816_v43 = vld [vmem:[#allocation68_spill] sm:$0xff]  ;;  %v5461_v3 = vpop.f32.mrf.mxu0 }
 0x264   : > { %8807 = vst [vmem:[#allocation17_spill] sm:$0xff] %v8009_v35  ;;  %v8023_v23 = vmul.f32 %v7861_v9, %v8812_v0  ;;  %v2553_v8 = vadd.f32 %v8815_v53, %v7767_v36  ;;  %v8030_v10 = vadd.f32 %v2891_v5, %v2550_v25  ;;  %v2527_v6 = vadd.f32 %v8816_v43, %v7601_v52  ;;  %v8817_v30 = vld [vmem:[#allocation69_spill] sm:$0xff]  ;;  %v8818_v35 = vld [vmem:[#allocation70_spill] sm:$0xff]  ;;  %v8819_v9 = vld [vmem:[#allocation71_spill] sm:$0xff]  ;;  %v8053_v43 = vpop.f32.mrf.mxu1 }
 0x265   : > { %v2526_v11 = vadd.f32 %v8817_v30, %v7607_v45  ;;  %v2529_v0 = vadd.f32 %v8818_v35, %v7613_v58  ;;  %v8820_v57 = vld [vmem:[#allocation44_spill] sm:$0xff]  ;;  %v2910_v39 = vadd.f32 %v7775_v40, %v2522_v27  ;;  %v2913_v25 = vadd.f32 %v7779_v13, %v2525_v29  ;;  %v8822_v45 = vld [vmem:[#allocation73_spill] sm:$0xff]  ;;  %v8823_v58 = vld [vmem:[#allocation74_spill] sm:$0xff] }
 0x266   : > { %8813 = vst [vmem:[#allocation19_spill] sm:$0xff] %v8023_v23  ;;  %v2528_v23 = vadd.f32 %v8819_v9, %v7619_v4  ;;  %v2552_v36 = vadd.f32 %v8820_v57, %v7771_v34  ;;  %v8044_v17 = vadd.f32 %v5461_v3, %v2553_v8  ;;  %v8821_v52 = vld [vmem:[#allocation72_spill] sm:$0xff]  ;;  %v2530_v53 = vadd.f32 %v8822_v45, %v7631_v50  ;;  %v2901_v9 = vpop.f32.mrf.mxu0  ;;  %v8824_v34 = vld [vmem:[#allocation102_spill] sm:$0xff] }
 0x267   : > { %v2531_v5 = vadd.f32 %v8821_v52, %v7625_v41  ;;  %v2533_v35 = vadd.f32 %v8823_v58, %v7637_v24  ;;  %v2912_v4 = vadd.f32 %v7781_v15, %v2524_v16  ;;  %v3300_v40 = vadd.f32 %v8824_v34, %v2911_v32  ;;  %v8825_v41 = vld [vmem:[#allocation75_spill] sm:$0xff]  ;;  %v8826_v50 = vld [vmem:[#allocation76_spill] sm:$0xff]  ;;  %v8827_v24 = vld [vmem:[#allocation77_spill] sm:$0xff] }
 0x268   : > { %v2915_v13 = vadd.f32 %v7785_v38, %v2527_v6  ;;  %v2914_v29 = vadd.f32 %v7787_v48, %v2526_v11  ;;  %v8058_v27 = vadd.f32 %v2901_v9, %v2552_v36  ;;  %v2532_v8 = vadd.f32 %v8825_v41, %v7645_v44  ;;  %v8828_v16 = vld [vmem:[#allocation78_spill] sm:$0xff]  ;;  %v5520_v57 = vpop.f32.mrf.mxu0  ;;  %v8829_v32 = vld [vmem:[#allocation104_spill] sm:$0xff]  ;;  %v8831_v36 = vld [vmem:[#allocation107_spill] sm:$0xff] }
 0x269   : > { %v2535_v30 = vadd.f32 %v8826_v50, %v7653_v20  ;;  %v2534_v15 = vadd.f32 %v8827_v24, %v7660_v62  ;;  %v2537_v3 = vadd.f32 %v8828_v16, %v7667_v60  ;;  %v3299_v52 = vadd.f32 %v8829_v32, %v2910_v39  ;;  %v8830_v38 = vld [vmem:[#allocation106_spill] sm:$0xff]  ;;  %v8078_v62 = vld [vmem:[%s8519_s6] ss:$0 sm:$0xff]  ;;  %v8080_v39 = vpop.f32.mrf.mxu1 }
 0x26a   : > { %v3302_v6 = vadd.f32 %v8830_v38, %v2913_v25  ;;  %v2917_v48 = vadd.f32 %v7791_v46, %v2529_v0  ;;  %v3688_v11 = vadd.f32 %v5520_v57, %v3300_v40  ;;  %v3301_v45 = vadd.f32 %v8831_v36, %v2912_v4  ;;  %v3528_v60 = vpop.f32.mrf.mxu0  ;;  %v8832_v25 = vld [vmem:[#allocation108_spill] sm:$0xff]  ;;  %v8833_v46 = vld [vmem:[#allocation109_spill] sm:$0xff]  ;;  %v8834_v34 = vld [vmem:[#allocation58_spill] sm:$0xff] }
 0x26b   : > { %v2916_v44 = vadd.f32 %v7793_v18, %v2528_v23  ;;  %v2919_v20 = vadd.f32 %v7797_v37, %v2531_v5  ;;  %v2918_v58 = vadd.f32 %v7799_v47, %v2530_v53  ;;  %v3304_v9 = vadd.f32 %v8832_v25, %v2915_v13  ;;  %v8835_v18 = vld [vmem:[#allocation96_spill] sm:$0xff]  ;;  %v8836_v37 = vld [vmem:[#allocation59_spill] sm:$0xff]  ;;  %v8837_v47 = vld [vmem:[#allocation98_spill] sm:$0xff] }
 0x26c   : > { %v3303_v0 = vadd.f32 %v8833_v46, %v2914_v29  ;;  %v4076_v4 = vadd.f32 %v8834_v34, %v3688_v11  ;;  %v3687_v40 = vadd.f32 %v3528_v60, %v3299_v52  ;;  %v2921_v23 = vadd.f32 %v8835_v18, %v2533_v35  ;;  %v8838_v41 = vld [vmem:[#allocation60_spill] sm:$0xff]  ;;  %v5523_v24 = vpop.f32.mrf.mxu0  ;;  %v8839_v16 = vld [vmem:[#allocation110_spill] sm:$0xff]  ;;  %v8841_v29 = vld [vmem:[#allocation111_spill] sm:$0xff]  ;;  %v8098_v34 = vpop.f32.mrf.mxu1 }
 0x26d   : > { %v2920_v5 = vadd.f32 %v8836_v37, %v2532_v8  ;;  %v2923_v53 = vadd.f32 %v8837_v47, %v2535_v30  ;;  %v2922_v50 = vadd.f32 %v8838_v41, %v2534_v15  ;;  %v3306_v57 = vadd.f32 %v8839_v16, %v2917_v48  ;;  %v8840_v38 = vld [vmem:[#allocation48_spill] sm:$0xff]  ;;  %v8843_v60 = vld [vmem:[#allocation113_spill] sm:$0xff]  ;;  %v8846_v18 = vld [vmem:[#allocation114_spill] sm:$0xff] }
 0x26e   : > { %v4115_v32 = vadd.f32 %v8078_v62, %v4076_v4  ;;  %v4075_v13 = vadd.f32 %v8840_v38, %v3687_v40  ;;  %v3690_v36 = vadd.f32 %v5523_v24, %v3302_v6  ;;  %v3305_v25 = vadd.f32 %v8841_v29, %v2916_v44  ;;  %v8842_v11 = vld [vmem:[#allocation112_spill] sm:$0xff]  ;;  %v3538_v30 = vpop.f32.mrf.mxu0  ;;  %v8845_v4 = vld [vmem:[#allocation49_spill] sm:$0xff]  ;;  %v8851_v38 = vld [vmem:[#allocation118_spill] sm:$0xff] }
 0x26f   : > { %v3308_v52 = vadd.f32 %v8842_v11, %v2919_v20  ;;  %v8095_v35 = vadd.f32 %v8843_v60, %v2918_v58  ;;  %v8844_v8 = vld [vmem:[#allocation100_spill] sm:$0xff]  ;;  %v3689_v6 = vadd.f32 %v3538_v30, %v3301_v45  ;;  %v8106_v44 = vadd.f32 %v8846_v18, %v2921_v23  ;;  %v8847_v20 = vld [vmem:[#allocation115_spill] sm:$0xff]  ;;  %v8134_v60 = vpop.f32.mrf.mxu1 }
 0x270   : > { %v2925_v46 = vadd.f32 %v8844_v8, %v2537_v3  ;;  %v8101_v15 = vadd.f32 %v7875_v31, %v4115_v32  ;;  %v4114_v48 = vadd.f32 %v8078_v62, %v4075_v13  ;;  %v4078_v40 = vadd.f32 %v8845_v4, %v3690_v36  ;;  %v8848_v58 = vld [vmem:[#allocation116_spill] sm:$0xff]  ;;  %v8849_v3 = vld [vmem:[#allocation117_spill] sm:$0xff]  ;;  %v5526_v24 = vpop.f32.mrf.mxu0  ;;  %v8850_v32 = vld [vmem:[#allocation50_spill] sm:$0xff] }
 0x271   : > { %v8109_v37 = vadd.f32 %v8847_v20, %v2920_v5  ;;  %v8112_v47 = vadd.f32 %v8848_v58, %v2923_v53  ;;  %v8115_v41 = vadd.f32 %v8849_v3, %v2922_v50  ;;  %v4077_v23 = vadd.f32 %v8850_v32, %v3689_v6  ;;  %v8852_v5 = vld [vmem:[#allocation119_spill] sm:$0xff]  ;;  %v8853_v50 = vld [vmem:[#allocation120_spill] sm:$0xff]  ;;  %v8855_v4 = vld [vmem:[#allocation45_spill] sm:$0xff]  ;;  %v8160_v32 = vpop.f32.mrf.mxu1 }
 0x272   : > { %v4215_v31 = vsub.f32 0.0, %v8101_v15  ;;  %v8119_v16 = vadd.f32 %v7879_v55, %v4114_v48  ;;  %v4117_v45 = vadd.f32 %v8078_v62, %v4078_v40  ;;  %v8124_v13 = vadd.f32 %v8851_v38, %v2925_v46  ;;  %v3548_v11 = vpop.f32.mrf.mxu0  ;;  %v8854_v48 = vld [vmem:[#allocation55_spill] sm:$0xff]  ;;  %v8857_v3 = vld [vmem:[#allocation90_spill] sm:$0xff] }
 0x273   : > { %v8128_v53 = vadd.f32 %v8852_v5, %v7859_v56  ;;  %v8132_v36 = vadd.f32 %v8853_v50, %v7865_v7  ;;  %v3692_v29 = vadd.f32 %v5526_v24, %v3304_v9  ;;  %v4116_v46 = vadd.f32 %v8078_v62, %v4077_v23  ;;  %v8856_v9 = vld [vmem:[#allocation61_spill] sm:$0xff] }
 0x274   : > { %v4248_v55 = vmul.f32 1.442695, %v4215_v31  ;;  %v4214_v8 = vsub.f32 0.0, %v8119_v16  ;;  %v8138_v30 = vadd.f32 %v7883_v1, %v4117_v45  ;;  %v8143_v56 = vadd.f32 %v8854_v48, %v7871_v21  ;;  %v5529_v18 = vpop.f32.mrf.mxu0 }
 0x275   : > { %v8147_v7 = vadd.f32 %v8855_v4, %v7887_v63  ;;  %v4080_v40 = vadd.f32 %v8856_v9, %v3692_v29  ;;  %v3691_v6 = vadd.f32 %v3548_v11, %v3303_v0  ;;  %v8152_v1 = vadd.f32 %v7891_v59, %v4116_v46  ;;  %v8858_v59 = vld [vmem:[#allocation56_spill] sm:$0xff]  ;;  %v8182_v4 = vpop.f32.mrf.mxu1 }
 0x276   : > { %5690 = vpow2.f32 %v4248_v55  ;;  %v4246_v20 = vmul.f32 1.442695, %v4214_v8  ;;  %v4217_v58 = vsub.f32 0.0, %v8138_v30  ;;  %v8156_v24 = vadd.f32 %v8857_v3, %v7917_v51  ;;  %v3558_v45 = vpop.f32.mrf.mxu0  ;;  %v8859_v8 = vld [vmem:[#allocation46_spill] sm:$0xff] }
 0x277   : > { %v4119_v21 = vadd.f32 %v8078_v62, %v4080_v40  ;;  %v4079_v63 = vadd.f32 %v7828_v61, %v3691_v6  ;;  %v3694_v31 = vadd.f32 %v5529_v18, %v3306_v57  ;;  %v4216_v23 = vsub.f32 0.0, %v8152_v1  ;;  %v8861_v3 = vld [vmem:[#allocation42_spill] sm:$0xff] }
 0x278   : > { %5692 = vpow2.f32 %v4246_v20  ;;  %v4252_v0 = vmul.f32 1.442695, %v4217_v58  ;;  %v3693_v38 = vadd.f32 %v3558_v45, %v3305_v25  ;;  %v8165_v5 = vadd.f32 %v8858_v59, %v7945_v14  ;;  %v5532_v57 = vpop.f32.mrf.mxu0  ;;  %v8206_v45 = vpop.f32.mrf.mxu1  ;;  %v8864_v59 = vld [vmem:[#allocation85_spill] sm:$0xff] }
 0x279   : > { %v8168_v51 = vadd.f32 %v7895_v33, %v4119_v21  ;;  %v4118_v50 = vadd.f32 %v8078_v62, %v4079_v63  ;;  %v4082_v61 = vadd.f32 %v7840_v54, %v3694_v31  ;;  %v4250_v29 = vmul.f32 1.442695, %v4216_v23  ;;  %v8862_v21 = vld [vmem:[#allocation57_spill] sm:$0xff] }
 0x27a   : > { %5694 = vpow2.f32 %v4252_v0  ;;  %v4081_v11 = vadd.f32 %v7852_v26, %v3693_v38  ;;  %v3696_v55 = vadd.f32 %v5532_v57, %v3308_v52  ;;  %v8175_v25 = vadd.f32 %v8859_v8, %v7975_v49  ;;  %v3568_v48 = vpop.f32.mrf.mxu0  ;;  %v8860_v49 = vld [vmem:[#allocation92_spill] sm:$0xff]  ;;  %v8863_v0 = vld [vmem:[#allocation105_spill] sm:$0xff]  ;;  %v8866_v8 = vld [vmem:[#allocation54_spill] sm:$0xff] }
 0x27b   : > { %v4219_v14 = vsub.f32 0.0, %v8168_v51  ;;  %v8179_v46 = vadd.f32 %v7899_v19, %v4118_v50  ;;  %v4121_v33 = vadd.f32 %v8078_v62, %v4082_v61  ;;  %5696 = vpow2.f32 %v4250_v29  ;;  %v8865_v50 = vld [vmem:[#allocation47_spill] sm:$0xff] }
 0x27c   : > { %v4120_v54 = vadd.f32 %v8078_v62, %v4081_v11  ;;  %v4084_v26 = vadd.f32 %v7867_v12, %v3696_v55  ;;  %v3695_v52 = vadd.f32 %v3568_v48, %v8095_v35  ;;  %v8189_v9 = vadd.f32 %v8860_v49, %v8005_v22  ;;  %v5535_v18 = vpop.f32.mrf.mxu0  ;;  %v8230_v49 = vpop.f32.mrf.mxu1 }
 0x27d   : > { %v4256_v40 = vmul.f32 1.442695, %v4219_v14  ;;  %v4218_v19 = vsub.f32 0.0, %v8179_v46  ;;  %v8193_v6 = vadd.f32 %v7903_v28, %v4121_v33  ;;  %v3698_v35 = vadd.f32 %v5535_v18, %v8106_v44 }
 0x27e   : > { %v8196_v20 = vadd.f32 %v7907_v2, %v4120_v54  ;;  %v4123_v58 = vadd.f32 %v8078_v62, %v4084_v26  ;;  %v4083_v12 = vadd.f32 %v8861_v3, %v3695_v52  ;;  %v8203_v22 = vadd.f32 %v8862_v21, %v8030_v10  ;;  %v3578_v28 = vpop.f32.mrf.mxu0  ;;  %v8867_v54 = vld [vmem:[#allocation94_spill] sm:$0xff]  ;;  %v8868_v3 = vld [vmem:[#allocation43_spill] sm:$0xff] }
 0x27f   : > { %5698 = vpow2.f32 %v4256_v40  ;;  %v4254_v63 = vmul.f32 1.442695, %v4218_v19  ;;  %v4221_v31 = vsub.f32 0.0, %v8193_v6  ;;  %v4086_v44 = vadd.f32 %v8864_v59, %v3698_v35 }
 0x280   : > { %v4220_v2 = vsub.f32 0.0, %v8196_v20  ;;  %v8210_v23 = vadd.f32 %v8863_v0, %v4123_v58  ;;  %v4122_v38 = vadd.f32 %v8078_v62, %v4083_v12  ;;  %v8216_v10 = vadd.f32 %v8865_v50, %v8044_v17  ;;  %v5538_v29 = vpop.f32.mrf.mxu0  ;;  %v8869_v0 = vld [vmem:[#allocation79_spill] sm:$0xff]  ;;  %v8245_v50 = vpop.f32.mrf.mxu1 }
 0x281   : > { %5700 = vpow2.f32 %v4254_v63  ;;  %v4260_v61 = vmul.f32 1.442695, %v4221_v31  ;;  %v3697_v57 = vadd.f32 %v3578_v28, %v8109_v37  ;;  %v4125_v33 = vadd.f32 %v8078_v62, %v4086_v44 }
 0x282   : > { %v4258_v11 = vmul.f32 1.442695, %v4220_v2  ;;  %v4223_v55 = vsub.f32 0.0, %v8210_v23  ;;  %v8221_v14 = vadd.f32 %v8866_v8, %v4122_v38  ;;  %v8226_v26 = vadd.f32 %v8867_v54, %v8058_v27  ;;  %v3588_v37 = vpop.f32.mrf.mxu0 }
 0x283   : > { %v5691_v48 = vpop.eup %5690  ;;  %5702 = vpow2.f32 %v4260_v61  ;;  %v4085_v17 = vadd.f32 %v8015_v42, %v3697_v57  ;;  %v3700_v52 = vadd.f32 %v5538_v29, %v8112_v47  ;;  %v8234_v12 = vadd.f32 %v8868_v3, %v4125_v33  ;;  %v8873_v3 = vld [vmem:[#allocation82_spill] sm:$0xff] }
 0x284   : > { %v4311_v40 = vadd.f32 1.0, %v5691_v48  ;;  %5704 = vpow2.f32 %v4258_v11  ;;  %v4264_v19 = vmul.f32 1.442695, %v4223_v55  ;;  %v4222_v18 = vsub.f32 0.0, %v8221_v14  ;;  %v5541_v47 = vpop.f32.mrf.mxu0  ;;  %v8870_v11 = vld [vmem:[#allocation80_spill] sm:$0xff] }
 0x285   : > { %v5693_v58 = vpop.eup %5692  ;;  %v4124_v27 = vadd.f32 %v8078_v62, %v4085_v17  ;;  %v4088_v35 = vadd.f32 %v8053_v43, %v3700_v52  ;;  %v3699_v42 = vadd.f32 %v3588_v37, %v8115_v41  ;;  %v3702_v31 = vadd.f32 %v5541_v47, %v8124_v13  ;;  %v8871_v17 = vld [vmem:[#allocation51_spill] sm:$0xff] }
 0x286   : > { %5706 = vrcp.f32 %v4311_v40  ;;  %v4310_v21 = vadd.f32 1.0, %v5693_v58  ;;  %v4262_v63 = vmul.f32 1.442695, %v4222_v18  ;;  %v4225_v2 = vsub.f32 0.0, %v8234_v12  ;;  %v3598_v44 = vpop.f32.mrf.mxu0  ;;  %v8258_v40 = vpop.f32.mrf.mxu1  ;;  %v8872_v18 = vld [vmem:[#allocation81_spill] sm:$0xff] }
 0x287   : > { %v5695_v28 = vpop.eup %5694  ;;  %5708 = vpow2.f32 %v4264_v19  ;;  %v8242_v38 = vadd.f32 %v8869_v0, %v4124_v27  ;;  %v4127_v59 = vadd.f32 %v8078_v62, %v4088_v35  ;;  %v4087_v41 = vadd.f32 %v8080_v39, %v3699_v42  ;;  %v8874_v35 = vld [vmem:[#allocation101_spill] sm:$0xff] }
 0x288   : > { %5710 = vrcp.f32 %v4310_v21  ;;  %v4313_v43 = vadd.f32 1.0, %v5695_v28  ;;  %v4090_v61 = vadd.f32 %v8098_v34, %v3702_v31  ;;  %v5697_v13 = vpop.eup %5696  ;;  %v4268_v57 = vmul.f32 1.442695, %v4225_v2  ;;  %v5544_v8 = vpop.f32.mrf.mxu0 }
 0x289   : > { %5712 = vpow2.f32 %v4262_v63  ;;  %v4224_v29 = vsub.f32 0.0, %v8242_v38  ;;  %v8252_v55 = vadd.f32 %v8870_v11, %v4127_v59  ;;  %v4312_v33 = vadd.f32 1.0, %v5697_v13  ;;  %v8876_v13 = vld [vmem:[#allocation52_spill] sm:$0xff]  ;;  %v8279_v11 = vpop.f32.mrf.mxu1 }
 0x28a   : > { %5714 = vrcp.f32 %v4313_v43  ;;  %v4126_v48 = vadd.f32 %v8078_v62, %v4087_v41  ;;  %v4129_v54 = vadd.f32 %v8078_v62, %v4090_v61  ;;  %v3701_v52 = vadd.f32 %v3598_v44, %v8871_v17  ;;  %v3608_v37 = vpop.f32.mrf.mxu0  ;;  %v8875_v44 = vld [vmem:[#allocation62_spill] sm:$0xff] }
 0x28b   : > { %5716 = vpow2.f32 %v4268_v57  ;;  %v4266_v39 = vmul.f32 1.442695, %v4224_v29  ;;  %v4227_v34 = vsub.f32 0.0, %v8252_v55  ;;  %v3704_v42 = vadd.f32 %v5544_v8, %v8874_v35 }
 0x28c   : > { %v5699_v19 = vpop.eup %5698  ;;  %5718 = vrcp.f32 %v4312_v33  ;;  %v8266_v58 = vadd.f32 %v8872_v18, %v4126_v48  ;;  %v8269_v27 = vadd.f32 %v8873_v3, %v4129_v54  ;;  %v4089_v63 = vadd.f32 %v8134_v60, %v3701_v52  ;;  %v5547_v31 = vpop.f32.mrf.mxu0 }
 0x28d   : > { %v4315_v47 = vadd.f32 1.0, %v5699_v19  ;;  %5720 = vpow2.f32 %v4266_v39  ;;  %v4272_v21 = vmul.f32 1.442695, %v4227_v34  ;;  %v4092_v59 = vadd.f32 %v8160_v32, %v3704_v42  ;;  %v8877_v39 = vld [vmem:[#allocation83_spill] sm:$0xff]  ;;  %v8878_v19 = vld [vmem:[#allocation84_spill] sm:$0xff] }
 0x28e   : > { %v5701_v28 = vpop.eup %5700  ;;  %v4226_v2 = vsub.f32 0.0, %v8266_v58  ;;  %v4229_v0 = vsub.f32 0.0, %v8269_v27  ;;  %v3703_v43 = vadd.f32 %v3608_v37, %v8875_v44  ;;  %v4128_v61 = vadd.f32 %v8078_v62, %v4089_v63  ;;  %v3618_v29 = vpop.f32.mrf.mxu0 }
 0x28f   : > { %5722 = vrcp.f32 %v4315_v47  ;;  %v4314_v41 = vadd.f32 1.0, %v5701_v28  ;;  %v3706_v57 = vadd.f32 %v5547_v31, %v8876_v13  ;;  %v4131_v48 = vadd.f32 %v8078_v62, %v4092_v59  ;;  %v8299_v31 = vpop.f32.mrf.mxu1 }
 0x290   : > { %v5703_v60 = vpop.eup %5702  ;;  %5724 = vpow2.f32 %v4272_v21  ;;  %v4270_v8 = vmul.f32 1.442695, %v4226_v2  ;;  %v4276_v33 = vmul.f32 1.442695, %v4229_v0  ;;  %v8284_v34 = vadd.f32 %v8877_v39, %v4128_v61  ;;  %v5550_v52 = vpop.f32.mrf.mxu0  ;;  %v8882_v39 = vld [vmem:[#allocation63_spill] sm:$0xff] }
 0x291   : > { %v5705_v54 = vpop.eup %5704  ;;  %5726 = vrcp.f32 %v4314_v41  ;;  %v4317_v32 = vadd.f32 1.0, %v5703_v60  ;;  %v4091_v17 = vadd.f32 %v8182_v4, %v3703_v43  ;;  %v8288_v18 = vadd.f32 %v8878_v19, %v4131_v48  ;;  %v8879_v4 = vld [vmem:[#allocation103_spill] sm:$0xff]  ;;  %v8880_v41 = vld [vmem:[#allocation86_spill] sm:$0xff]  ;;  %v8316_v19 = vpop.f32.mrf.mxu1 }
 0x292   : > { %v4316_v37 = vadd.f32 1.0, %v5705_v54  ;;  %5728 = vpow2.f32 %v4270_v8  ;;  %v4094_v3 = vadd.f32 %v8206_v45, %v3706_v57  ;;  %v4228_v42 = vsub.f32 0.0, %v8284_v34  ;;  %v3628_v63 = vpop.f32.mrf.mxu0  ;;  %v8881_v60 = vld [vmem:[#allocation87_spill] sm:$0xff] }
 0x293   : > { %v5707_v35 = vpop.eup %5706  ;;  %5730 = vrcp.f32 %v4317_v32  ;;  %v4130_v47 = vadd.f32 %v8078_v62, %v4091_v17  ;;  %v3705_v21 = vadd.f32 %v3618_v29, %v8879_v4  ;;  %v4231_v2 = vsub.f32 0.0, %v8288_v18 }
 0x294   : > { %v5709_v28 = vpop.eup %5708  ;;  %v4375_v45 = vmul.f32 %v5707_v35, %v8101_v15  ;;  %5732 = vrcp.f32 %v4316_v37  ;;  %v4133_v0 = vadd.f32 %v8078_v62, %v4094_v3  ;;  %v4274_v43 = vmul.f32 1.442695, %v4228_v42  ;;  %v5553_v13 = vpop.f32.mrf.mxu0 }
 0x295   : > { %v5711_v59 = vpop.eup %5710  ;;  %v4319_v44 = vadd.f32 1.0, %v5709_v28  ;;  %5734 = vpow2.f32 %v4276_v33  ;;  %v8305_v61 = vadd.f32 %v8880_v41, %v4130_v47  ;;  %v4280_v15 = vmul.f32 1.442695, %v4231_v2  ;;  %v8883_v2 = vld [vmem:[#allocation88_spill] sm:$0xff] }
 0x296   : > { %v5713_v57 = vpop.eup %5712  ;;  %4407 = vst.msk [vmem:[%s8294_s24 + $0x8] sm:$0xff] %vm438_vm0, %v4375_v45  ;;  %v4374_v29 = vmul.f32 %v5711_v59, %v8119_v16  ;;  %v8311_v8 = vadd.f32 %v8881_v60, %v4133_v0  ;;  %v4093_v48 = vadd.f32 %v8230_v49, %v3705_v21  ;;  %v3708_v17 = vadd.f32 %v5550_v52, %v8882_v39  ;;  %v3638_v37 = vpop.f32.mrf.mxu0 }
 0x297   : > { %v5715_v54 = vpop.eup %5714  ;;  %5736 = vrcp.f32 %v4319_v44  ;;  %v4318_v33 = vadd.f32 1.0, %v5713_v57  ;;  %v4230_v32 = vsub.f32 0.0, %v8305_v61  ;;  %v8332_v57 = vpop.f32.mrf.mxu1 }
 0x298   : > { %v5717_v3 = vpop.eup %5716  ;;  %4406 = vst.msk [vmem:[%s8294_s24] sm:$0xff] %vm438_vm0, %v4374_v29  ;;  %v4377_v16 = vmul.f32 %v5715_v54, %v8138_v30  ;;  %5738 = vpow2.f32 %v4274_v43  ;;  %v4233_v35 = vsub.f32 0.0, %v8311_v8  ;;  %v4132_v49 = vadd.f32 %v8078_v62, %v4093_v48  ;;  %v5556_v21 = vpop.f32.mrf.mxu0  ;;  %v8884_v54 = vld [vmem:[#allocation11_spill] sm:$0xff] }
 0x299   : > { %v5719_v42 = vpop.eup %5718  ;;  %5740 = vrcp.f32 %v4318_v33  ;;  %v4321_v47 = vadd.f32 1.0, %v5717_v3  ;;  %v4278_v4 = vmul.f32 1.442695, %v4230_v32  ;;  %v4096_v52 = vadd.f32 %v8245_v50, %v3708_v17 }
 0x29a   : > { %v5721_v28 = vpop.eup %5720  ;;  %4409 = vst.msk [vmem:[%s8294_s24 + $0x18] sm:$0xff] %vm438_vm0, %v4377_v16  ;;  %v4376_v45 = vmul.f32 %v5719_v42, %v8152_v1  ;;  %5742 = vpow2.f32 %v4280_v15  ;;  %v4284_v30 = vmul.f32 1.442695, %v4233_v35  ;;  %v8328_v0 = vadd.f32 %v8883_v2, %v4132_v49  ;;  %v3648_v41 = vpop.f32.mrf.mxu0 }
 0x29b   : > { %5744 = vrcp.f32 %v4321_v47  ;;  %v4320_v59 = vadd.f32 1.0, %v5721_v28  ;;  %v4135_v44 = vadd.f32 %v8078_v62, %v4096_v52  ;;  %v3707_v43 = vadd.f32 %v3628_v63, %v8128_v53 }
 0x29c   : > { %v5723_v50 = vpop.eup %5722  ;;  %4408 = vst.msk [vmem:[%s8294_s24 + $0x10] sm:$0xff] %vm438_vm0, %v4376_v45  ;;  %5746 = vpow2.f32 %v4278_v4  ;;  %v4232_v1 = vsub.f32 0.0, %v8328_v0  ;;  %v3710_v29 = vadd.f32 %v5553_v13, %v8132_v36  ;;  %v3709_v15 = vadd.f32 %v3638_v37, %v8143_v56  ;;  %v5559_v33 = vpop.f32.mrf.mxu0 }
 0x29d   : > { %v5725_v60 = vpop.eup %5724  ;;  %v4379_v48 = vmul.f32 %v5723_v50, %v8168_v51  ;;  %5748 = vrcp.f32 %v4320_v59  ;;  %v8341_v53 = vadd.f32 %v8884_v54, %v4135_v44  ;;  %v4095_v63 = vadd.f32 %v8258_v40, %v3707_v43  ;;  %v5611_v40 = vpop.f32.mrf.mxu1 }
 0x29e   : > { %v5727_v32 = vpop.eup %5726  ;;  %v4323_v39 = vadd.f32 1.0, %v5725_v60  ;;  %5750 = vpow2.f32 %v4284_v30  ;;  %v4282_v17 = vmul.f32 1.442695, %v4232_v1  ;;  %v4098_v3 = vadd.f32 %v8279_v11, %v3710_v29  ;;  %v8351_v16 = vpop.f32.mrf.mxu0  ;;  %v8886_v30 = vld [vmem:[#allocation13_spill] sm:$0xff] }
 0x29f   : > { %v5729_v36 = vpop.eup %5728  ;;  %4411 = vst.msk [vmem:[%s8294_s24 + $0x28] sm:$0xff] %vm438_vm0, %v4379_v48  ;;  %v4378_v56 = vmul.f32 %v5727_v32, %v8179_v46  ;;  %v4235_v51 = vsub.f32 0.0, %v8341_v53  ;;  %v4134_v13 = vadd.f32 %v8078_v62, %v4095_v63  ;;  %v4097_v37 = vadd.f32 %v8299_v31, %v3709_v15  ;;  %v8885_v31 = vld [vmem:[#allocation10_spill] sm:$0xff]  ;;  %v4046_v44 = vpop.f32.mrf.mxu1  ;;  %v8887_v1 = vld [vmem:[#allocation89_spill] sm:$0xff] }
 0x2a0   : > { %v5731_v35 = vpop.eup %5730  ;;  %5752 = vrcp.f32 %v4323_v39  ;;  %v4322_v49 = vadd.f32 1.0, %v5729_v36  ;;  %v4137_v11 = vadd.f32 %v8078_v62, %v4098_v3  ;;  %v3712_v42 = vadd.f32 %v5556_v21, %v8147_v7  ;;  %v5562_v43 = vpop.f32.mrf.mxu0 }
 0x2a1   : > { %v5733_v47 = vpop.eup %5732  ;;  %4410 = vst.msk [vmem:[%s8294_s24 + $0x20] sm:$0xff] %vm438_vm0, %v4378_v56  ;;  %v4381_v46 = vmul.f32 %v5731_v35, %v8193_v6  ;;  %5754 = vpow2.f32 %v4282_v17  ;;  %v4288_v4 = vmul.f32 1.442695, %v4235_v51  ;;  %v8359_v52 = vadd.f32 %v8885_v31, %v4134_v13 }
 0x2a2   : > { %v5735_v28 = vpop.eup %5734  ;;  %v4380_v45 = vmul.f32 %v5733_v47, %v8196_v20  ;;  %5756 = vrcp.f32 %v4322_v49  ;;  %v8363_v2 = vadd.f32 %v8886_v30, %v4137_v11  ;;  %v4136_v7 = vadd.f32 %v8078_v62, %v4097_v37  ;;  %v3668_v51 = vpop.f32.mrf.mxu0  ;;  %v8890_v30 = vld [vmem:[#allocation14_spill] sm:$0xff] }
 0x2a3   : > { %4413 = vst.msk [vmem:[%s8294_s24 + $0x38] sm:$0xff] %vm438_vm0, %v4381_v46  ;;  %v4325_v21 = vadd.f32 1.0, %v5735_v28  ;;  %5758 = vpow2.f32 %v4288_v4  ;;  %v4234_v6 = vsub.f32 0.0, %v8359_v52  ;;  %v4100_v59 = vadd.f32 %v8316_v19, %v3712_v42  ;;  %v8889_v46 = vld [vmem:[#allocation15_spill] sm:$0xff] }
 0x2a4   : > { %v5737_v50 = vpop.eup %5736  ;;  %4412 = vst.msk [vmem:[%s8294_s24 + $0x30] sm:$0xff] %vm438_vm0, %v4380_v45  ;;  %v4237_v20 = vsub.f32 0.0, %v8363_v2  ;;  %v8374_v29 = vadd.f32 %v8887_v1, %v4136_v7  ;;  %v3711_v15 = vadd.f32 %v3648_v41, %v8156_v24  ;;  %v3714_v60 = vadd.f32 %v5559_v33, %v8165_v5  ;;  %v8888_v5 = vld [vmem:[#allocation12_spill] sm:$0xff]  ;;  %v5614_v33 = vpop.f32.mrf.mxu1 }
 0x2a5   : > { %v5739_v48 = vpop.eup %5738  ;;  %v4383_v54 = vmul.f32 %v5737_v50, %v8210_v23  ;;  %5760 = vrcp.f32 %v4325_v21  ;;  %v4286_v19 = vmul.f32 1.442695, %v4234_v6  ;;  %v4139_v63 = vadd.f32 %v8078_v62, %v4100_v59  ;;  %v5565_v6 = vpop.f32.mrf.mxu0 }
 0x2a6   : > { %v5741_v32 = vpop.eup %5740  ;;  %v4324_v39 = vadd.f32 1.0, %v5739_v48  ;;  %v4292_v17 = vmul.f32 1.442695, %v4237_v20  ;;  %v4236_v3 = vsub.f32 0.0, %v8374_v29  ;;  %v4099_v36 = vadd.f32 %v8332_v57, %v3711_v15  ;;  %v4056_v21 = vpop.f32.mrf.mxu1 }
 0x2a7   : > { %v5743_v56 = vpop.eup %5742  ;;  %4415 = vst.msk [vmem:[%s8294_s24 + $0x48] sm:$0xff] %vm438_vm0, %v4383_v54  ;;  %v4382_v24 = vmul.f32 %v5741_v32, %v8221_v14  ;;  %5762 = vpow2.f32 %v4286_v19  ;;  %v8386_v23 = vadd.f32 %v8888_v5, %v4139_v63  ;;  %v4102_v41 = vadd.f32 %v5611_v40, %v3714_v60 }
 0x2a8   : > { %v5745_v13 = vpop.eup %5744  ;;  %5764 = vrcp.f32 %v4324_v39  ;;  %v4327_v37 = vadd.f32 1.0, %v5743_v56  ;;  %v4290_v35 = vmul.f32 1.442695, %v4236_v3  ;;  %v4138_v49 = vadd.f32 %v8078_v62, %v4099_v36  ;;  %v3678_v3 = vpop.f32.mrf.mxu0 }
 0x2a9   : > { %v5747_v57 = vpop.eup %5746  ;;  %4414 = vst.msk [vmem:[%s8294_s24 + $0x40] sm:$0xff] %vm438_vm0, %v4382_v24  ;;  %v4385_v11 = vmul.f32 %v5745_v13, %v8234_v12  ;;  %5766 = vpow2.f32 %v4292_v17  ;;  %v4239_v14 = vsub.f32 0.0, %v8386_v23  ;;  %v4141_v42 = vadd.f32 %v8078_v62, %v4102_v41  ;;  %v5617_v17 = vpop.f32.mrf.mxu1 }
 0x2aa   : > { %v5749_v40 = vpop.eup %5748  ;;  %5768 = vrcp.f32 %v4327_v37  ;;  %v4326_v47 = vadd.f32 1.0, %v5747_v57  ;;  %v8395_v4 = vadd.f32 %v8889_v46, %v4138_v49  ;;  %v3713_v31 = vadd.f32 %v8351_v16, %v8175_v25 }
 0x2ab   : > { %v5751_v28 = vpop.eup %5750  ;;  %4417 = vst.msk [vmem:[%s8294_s24 + $0x58] sm:$0xff] %vm438_vm0, %v4385_v11  ;;  %v4384_v12 = vmul.f32 %v5749_v40, %v8242_v38  ;;  %5770 = vpow2.f32 %v4290_v35  ;;  %v4296_v45 = vmul.f32 1.442695, %v4239_v14  ;;  %v8403_v7 = vadd.f32 %v8890_v30, %v4141_v42  ;;  %v8893_v35 = vld [vmem:[#allocation19_spill] sm:$0xff]  ;;  %v4066_v57 = vpop.f32.mrf.mxu1  ;;  %v8894_v40 = vld [vmem:[#allocation41_spill] sm:$0xff] }
 0x2ac   : > { %5772 = vrcp.f32 %v4326_v47  ;;  %v4329_v59 = vadd.f32 1.0, %v5751_v28  ;;  %v4238_v50 = vsub.f32 0.0, %v8395_v4  ;;  %v4101_v20 = vadd.f32 %v4046_v44, %v3713_v31  ;;  %v8895_v47 = vld [vmem:[#allocation53_spill] sm:$0xff] }
 0x2ad   : > { %v5753_v1 = vpop.eup %5752  ;;  %4416 = vst.msk [vmem:[%s8294_s24 + $0x50] sm:$0xff] %vm438_vm0, %v4384_v12  ;;  %5774 = vpow2.f32 %v4296_v45  ;;  %v4241_v25 = vsub.f32 0.0, %v8403_v7  ;;  %v3716_v38 = vadd.f32 %v5562_v43, %v8189_v9  ;;  %v3715_v16 = vadd.f32 %v3668_v51, %v8203_v22  ;;  %v8891_v22 = vld [vmem:[#allocation17_spill] sm:$0xff]  ;;  %v8896_v45 = vld [vmem:[#allocation40_spill] sm:$0xff] }
 0x2ae   : > { %v5755_v15 = vpop.eup %5754  ;;  %v4387_v60 = vmul.f32 %v5753_v1, %v8252_v55  ;;  %5776 = vrcp.f32 %v4329_v59  ;;  %v4294_v48 = vmul.f32 1.442695, %v4238_v50  ;;  %v4140_v54 = vadd.f32 %v8078_v62, %v4101_v20 }
 0x2af   : > { %v5757_v19 = vpop.eup %5756  ;;  %v4328_v44 = vadd.f32 1.0, %v5755_v15  ;;  %v4300_v63 = vmul.f32 1.442695, %v4241_v25  ;;  %v4104_v32 = vadd.f32 %v5614_v33, %v3716_v38  ;;  %v4103_v39 = vadd.f32 %v4056_v21, %v3715_v16 }
 0x2b0   : > { %v5759_v36 = vpop.eup %5758  ;;  %4419 = vst.msk [vmem:[%s8294_s24 + $0x68] sm:$0xff] %vm438_vm0, %v4387_v60  ;;  %v4386_v9 = vmul.f32 %v5757_v19, %v8266_v58  ;;  %5778 = vpow2.f32 %v4294_v48  ;;  %v8417_v55 = vadd.f32 %v8891_v22, %v4140_v54  ;;  %v3718_v43 = vadd.f32 %v5565_v6, %v8216_v10  ;;  %v8892_v10 = vld [vmem:[#allocation16_spill] sm:$0xff] }
 0x2b1   : > { %5780 = vrcp.f32 %v4328_v44  ;;  %v4331_v56 = vadd.f32 1.0, %v5759_v36  ;;  %v4143_v24 = vadd.f32 %v8078_v62, %v4104_v32  ;;  %v4142_v5 = vadd.f32 %v8078_v62, %v4103_v39 }
 0x2b2   : > { %v5761_v41 = vpop.eup %5760  ;;  %4418 = vst.msk [vmem:[%s8294_s24 + $0x60] sm:$0xff] %vm438_vm0, %v4386_v9  ;;  %5782 = vpow2.f32 %v4300_v63  ;;  %v4240_v33 = vsub.f32 0.0, %v8417_v55  ;;  %v4106_v58 = vadd.f32 %v5617_v17, %v3718_v43  ;;  %v3717_v51 = vadd.f32 %v3678_v3, %v8226_v26 }
 0x2b3   : > { %v4389_v13 = vmul.f32 %v5761_v41, %v8269_v27  ;;  %5784 = vrcp.f32 %v4331_v56  ;;  %v8428_v37 = vadd.f32 %v8892_v10, %v4143_v24  ;;  %v8431_v49 = vadd.f32 %v8893_v35, %v4142_v5 }
 0x2b4   : > { %v5763_v11 = vpop.eup %5762  ;;  %v4298_v14 = vmul.f32 1.442695, %v4240_v33  ;;  %v4145_v42 = vadd.f32 %v8078_v62, %v4106_v58  ;;  %v4181_v46 = vmul.f32 %v8895_v47, %v8894_v40  ;;  %v4105_v31 = vadd.f32 %v4066_v57, %v3717_v51 }
 0x2b5   : > { %v5765_v28 = vpop.eup %5764  ;;  %4421 = vst.msk [vmem:[%s8294_s24 + $0x78] sm:$0xff] %vm438_vm0, %v4389_v13  ;;  %v4330_v26 = vadd.f32 1.0, %v5763_v11  ;;  %v4243_v27 = vsub.f32 0.0, %v8428_v37  ;;  %v4242_v12 = vsub.f32 0.0, %v8431_v49  ;;  %v4180_v30 = vmul.f32 %v8895_v47, %v8896_v45 }
 0x2b6   : > { %v5767_v21 = vpop.eup %5766  ;;  %v4388_v6 = vmul.f32 %v5765_v28, %v8284_v34  ;;  %5786 = vpow2.f32 %v4298_v14  ;;  %v8443_v59 = vadd.f32 %v4181_v46, %v4145_v42  ;;  %v4144_v50 = vadd.f32 %v8078_v62, %v4105_v31 }
 0x2b7   : > { %v5769_v20 = vpop.eup %5768  ;;  %5788 = vrcp.f32 %v4330_v26  ;;  %v4333_v1 = vadd.f32 1.0, %v5767_v21  ;;  %v4304_v25 = vmul.f32 1.442695, %v4243_v27  ;;  %v4302_v15 = vmul.f32 1.442695, %v4242_v12 }
 0x2b8   : > { %v5771_v38 = vpop.eup %5770  ;;  %4420 = vst.msk [vmem:[%s8294_s24 + $0x70] sm:$0xff] %vm438_vm0, %v4388_v6  ;;  %v4391_v16 = vmul.f32 %v5769_v20, %v8288_v18  ;;  %v4245_v60 = vsub.f32 0.0, %v8443_v59  ;;  %v8450_v34 = vadd.f32 %v4180_v30, %v4144_v50 }
 0x2b9   : > { %v5773_v48 = vpop.eup %5772  ;;  %5790 = vrcp.f32 %v4333_v1  ;;  %v4332_v54 = vadd.f32 1.0, %v5771_v38 }
 0x2ba   : > { %v5775_v19 = vpop.eup %5774  ;;  %4423 = vst.msk [vmem:[%s8294_s24 + $0x88] sm:$0xff] %vm438_vm0, %v4391_v16  ;;  %v4390_v62 = vmul.f32 %v5773_v48, %v8305_v61  ;;  %5792 = vpow2.f32 %v4304_v25  ;;  %v4308_v44 = vmul.f32 1.442695, %v4245_v60  ;;  %v4244_v63 = vsub.f32 0.0, %v8450_v34 }
 0x2bb   : > { %v5777_v18 = vpop.eup %5776  ;;  %5794 = vrcp.f32 %v4332_v54  ;;  %v4335_v32 = vadd.f32 1.0, %v5775_v19 }
 0x2bc   : > { %4422 = vst.msk [vmem:[%s8294_s24 + $0x80] sm:$0xff] %vm438_vm0, %v4390_v62  ;;  %v4393_v39 = vmul.f32 %v5777_v18, %v8311_v8  ;;  %5796 = vpow2.f32 %v4302_v15  ;;  %v4306_v17 = vmul.f32 1.442695, %v4244_v63 }
 0x2bd   : > { %v5779_v3 = vpop.eup %5778  ;;  %5798 = vrcp.f32 %v4335_v32 }
 0x2be   : > { %v5781_v36 = vpop.eup %5780  ;;  %4425 = vst.msk [vmem:[%s8294_s24 + $0x98] sm:$0xff] %vm438_vm0, %v4393_v39  ;;  %v4334_v61 = vadd.f32 1.0, %v5779_v3  ;;  %5800 = vpow2.f32 %v4308_v44 }
 0x2bf   : > { %v5783_v9 = vpop.eup %5782  ;;  %v4392_v22 = vmul.f32 %v5781_v36, %v8328_v0  ;;  %5802 = vpow2.f32 %v4306_v17 }
 0x2c0   : > { %v5785_v43 = vpop.eup %5784  ;;  %5804 = vrcp.f32 %v4334_v61  ;;  %v4337_v56 = vadd.f32 1.0, %v5783_v9 }
 0x2c1   : > { %4424 = vst.msk [vmem:[%s8294_s24 + $0x90] sm:$0xff] %vm438_vm0, %v4392_v22  ;;  %v4395_v8 = vmul.f32 %v5785_v43, %v8341_v53 }
 0x2c2   : > { %5806 = vrcp.f32 %v4337_v56 }
 0x2c3   : > { %v5787_v24 = vpop.eup %5786  ;;  %4427 = vst.msk [vmem:[%s8294_s24 + $0xa8] sm:$0xff] %vm438_vm0, %v4395_v8 }
 0x2c4   : > { %v5789_v5 = vpop.eup %5788  ;;  %v4336_v41 = vadd.f32 1.0, %v5787_v24 }
 0x2c5   : > { %v4394_v33 = vmul.f32 %v5789_v5, %v8359_v52 }
 0x2c6   : > { %v5791_v0 = vpop.eup %5790  ;;  %5808 = vrcp.f32 %v4336_v41 }
 0x2c7   : > { %v5793_v58 = vpop.eup %5792  ;;  %4426 = vst.msk [vmem:[%s8294_s24 + $0xa0] sm:$0xff] %vm438_vm0, %v4394_v33  ;;  %v4397_v51 = vmul.f32 %v5791_v0, %v8363_v2 }
 0x2c8   : > { %v5795_v13 = vpop.eup %5794  ;;  %v4339_v10 = vadd.f32 1.0, %v5793_v58 }
 0x2c9   : > { %v5797_v53 = vpop.eup %5796  ;;  %4429 = vst.msk [vmem:[%s8294_s24 + $0xb8] sm:$0xff] %vm438_vm0, %v4397_v51  ;;  %v4396_v35 = vmul.f32 %v5795_v13, %v8374_v29 }
 0x2ca   : > { %v5799_v57 = vpop.eup %5798  ;;  %5810 = vrcp.f32 %v4339_v10  ;;  %v4338_v11 = vadd.f32 1.0, %v5797_v53 }
 0x2cb   : > { %v5801_v52 = vpop.eup %5800  ;;  %4428 = vst.msk [vmem:[%s8294_s24 + $0xb0] sm:$0xff] %vm438_vm0, %v4396_v35  ;;  %v4399_v14 = vmul.f32 %v5799_v57, %v8386_v23 }
 0x2cc   : > { %v5803_v2 = vpop.eup %5802  ;;  %5812 = vrcp.f32 %v4338_v11  ;;  %v4341_v42 = vadd.f32 1.0, %v5801_v52 }
 0x2cd   : > { %v5805_v40 = vpop.eup %5804  ;;  %4431 = vst.msk [vmem:[%s8294_s24 + $0xc8] sm:$0xff] %vm438_vm0, %v4399_v14  ;;  %v4340_v47 = vadd.f32 1.0, %v5803_v2 }
 0x2ce   : > { %v4398_v29 = vmul.f32 %v5805_v40, %v8395_v4  ;;  %5814 = vrcp.f32 %v4341_v42 }
 0x2cf   : > { %v5807_v46 = vpop.eup %5806  ;;  %5816 = vrcp.f32 %v4340_v47 }
 0x2d0   : > { %4430 = vst.msk [vmem:[%s8294_s24 + $0xc0] sm:$0xff] %vm438_vm0, %v4398_v29  ;;  %v4401_v23 = vmul.f32 %v5807_v46, %v8403_v7 }
 0x2d2   : > { %4433 = vst.msk [vmem:[%s8294_s24 + $0xd8] sm:$0xff] %vm438_vm0, %v4401_v23 }
 0x2d3   : > { %v5809_v31 = vpop.eup %5808 }
 0x2d4   : > { %v4400_v28 = vmul.f32 %v5809_v31, %v8417_v55 }
 0x2d6   : > { %4432 = vst.msk [vmem:[%s8294_s24 + $0xd0] sm:$0xff] %vm438_vm0, %v4400_v28 }
 0x2d7   : > { %v5811_v26 = vpop.eup %5810 }
 0x2d8   : > { %v4403_v4 = vmul.f32 %v5811_v26, %v8428_v37 }
 0x2d9   : > { %v5813_v27 = vpop.eup %5812 }
 0x2da   : > { %4435 = vst.msk [vmem:[%s8294_s24 + $0xe8] sm:$0xff] %vm438_vm0, %v4403_v4  ;;  %v4402_v12 = vmul.f32 %v5813_v27, %v8431_v49 }
 0x2db   : > { %v5815_v45 = vpop.eup %5814 }
 0x2dc   : > { %v5817_v30 = vpop.eup %5816  ;;  %4434 = vst.msk [vmem:[%s8294_s24 + $0xe0] sm:$0xff] %vm438_vm0, %v4402_v12  ;;  %v4405_v7 = vmul.f32 %v5815_v45, %v8443_v59 }
 0x2dd   : > { %v4404_v21 = vmul.f32 %v5817_v30, %v8450_v34 }
 0x2de   : > { %4437 = vst.msk [vmem:[%s8294_s24 + $0xf8] sm:$0xff] %vm438_vm0, %v4405_v7 }
 0x2df   : > { %4436 = vst.msk [vmem:[%s8294_s24 + $0xf0] sm:$0xff] %vm438_vm0, %v4404_v21 }
 0x2e0 PF: > { %p18_p12 = scmp.ge.s32.totalorder %s6053_s21, 4   ;;  %s8897_s24 = smov %s5928_s25 }
 0x2e1   : > { %s8898_s25 = smov %s5932_s26  ;;  %s8899_s26 = smov %s6064_s8 }
 0x2e2   : > { %s8900_s27 = smov %s6053_s21  ;;  %20 = sbr.rel (!%p18_p12) target bundleno = 4 (0x4), region = 106 }
 0x2e7   :  { %4459 = vsyncpa [#allocation4], 1 }
 0x2e8   :  { %4461 = vsyncpa [#allocation4 + $0x1], 1 }
 0x2e9   :  { %4462 = vsyncpa [#allocation6], 1 }

</bundles_post_ra>
